<compile_context>
chip_gen: v6e
topology: v6e:2x2x1
jax: 0.10.0
libtpu: 0.0.40
codegen_flags: <defaults>
</compile_context>

<pallas_src>
import math

import jax
import jax.numpy as jnp
from jax.experimental import pallas as pl
from jax.experimental.pallas import tpu as pltpu

# ---------------- model hyper-parameters (small, deterministic) -------------
B = 2            # batch
V = 16           # vid_len
D = 128          # dimension
C = 8            # compress_len
H = 8            # num_heads
HD = D // H      # head_dim
FF = 4 * D       # feed-forward hidden
EPS = 1e-5       # nn.LayerNorm default eps
NEG = -1000000000.0


def _layernorm(x, gamma, beta):
    # x: (N, D), gamma/beta: (1, D)
    mu = jnp.mean(x, axis=-1, keepdims=True)
    var = jnp.mean((x - mu) ** 2, axis=-1, keepdims=True)
    return (x - mu) * jax.lax.rsqrt(var + EPS) * gamma + beta


def compressor_kernel(
    fv_ref, query_ref, smalls_ref, bf1_ref,
    wq_ref, wkv_ref, wo_ref,
    w1_hbm, w2_hbm,
    o_ref,
    q_scr, k_scr, v_scr, ctx_scr, w1_vmem, w2_vmem, dma_sem,
):
    N = B * V            # 32  rows of Fv (whole batch)
    M = B * C            # 16  rows of compressed output
    HB = H * B           # 16  attention batch dim (head-major, batch-minor)

    # ---- stream the FFN weights (the DMA-dominant operands) behind compute --
    w1_cp = pltpu.make_async_copy(w1_hbm, w1_vmem, dma_sem.at[0])
    w2_cp = pltpu.make_async_copy(w2_hbm, w2_vmem, dma_sem.at[1])
    w1_cp.start()
    w2_cp.start()

    x = fv_ref[...].reshape(N, D)                  # (32, 128) whole batch, stacked
    query = query_ref[...]                         # (8, 128)  shared learned query

    smalls = smalls_ref[...]                       # (16, 128) packed small vectors
    bq, bk, bv, bo = smalls[0:1], smalls[1:2], smalls[2:3], smalls[3:4]
    g1, be1, g2, be2 = smalls[4:5], smalls[5:6], smalls[6:7], smalls[7:8]
    bf2 = smalls[8:9]
    bias = smalls[9:9 + B, :V]                     # (B, V) additive mask bias

    # ---- full-width projections (128/256-lane MXU passes) -------------------
    q_full = jnp.dot(query, wq_ref[...],
                     preferred_element_type=jnp.float32) + bq        # (8, 128)
    kv = jnp.dot(x, wkv_ref[...],
                 preferred_element_type=jnp.float32)                 # (32, 256)
    k_full = kv[:, :D] + bk                                          # (32, 128)
    v_full = kv[:, D:] + bv                                          # (32, 128)

    # ---- head split: tiny static lane-slice copies into scratch -------------
    for h in range(H):
        sl = slice(h * HD, (h + 1) * HD)
        q_scr[h] = q_full[:, sl]                   # (C, HD)
        k_scr[h] = k_full[:, sl]                   # (N, HD)
        v_scr[h] = v_full[:, sl]                   # (N, HD)

    q_h = q_scr[...]                               # (H, C, HD)
    k_hb = k_scr[...].reshape(HB, V, HD)           # (H, B*V, HD) -> (H*B, V, HD)
    v_hb = v_scr[...].reshape(HB, V, HD)
    q_hb = jnp.broadcast_to(q_h[:, None], (H, B, C, HD)).reshape(HB, C, HD)
    bias_hb = jnp.broadcast_to(bias[None, :, None, :], (H, B, C, V)).reshape(HB, C, V)

    # ---- attention: one batched score matmul, one softmax, one PV matmul ----
    s = jnp.einsum("ncd,nvd->ncv", q_hb, k_hb,
                   preferred_element_type=jnp.float32) * (1.0 / math.sqrt(HD))
    s = s + bias_hb                                # additive mask (0 valid / -1e9)
    s = s - jnp.max(s, axis=-1, keepdims=True)
    p = jnp.exp(s)
    p = p / jnp.sum(p, axis=-1, keepdims=True)     # exact division (tight numerics)
    ctx = jnp.einsum("ncv,nvd->ncd", p, v_hb,
                     preferred_element_type=jnp.float32)             # (HB, C, HD)

    # ---- concat heads -> (M, D), then ONE full-depth out-proj matmul --------
    ctx_h = ctx.reshape(H, M, HD)                  # (H, B*C, HD)  pure reshape
    for h in range(H):
        ctx_scr[:, h * HD:(h + 1) * HD] = ctx_h[h]
    attn = jnp.dot(ctx_scr[...], wo_ref[...],
                   preferred_element_type=jnp.float32) + bo          # (M, D)

    # ---- residual + LayerNorm + FFN + residual + LayerNorm ------------------
    res = jnp.broadcast_to(query[None], (B, C, D)).reshape(M, D)
    h1 = _layernorm(res + attn, g1, be1)

    w1_cp.wait()                                   # FFN weights have landed
    ff = jnp.dot(h1, w1_vmem[...], preferred_element_type=jnp.float32) + bf1_ref[...]
    ff = jnp.maximum(ff, 0.0)
    w2_cp.wait()
    ff = jnp.dot(ff, w2_vmem[...], preferred_element_type=jnp.float32) + bf2

    out = _layernorm(h1 + ff, g2, be2)
    o_ref[...] = out.reshape(B, C, D)


@jax.jit
def simple_compressor(Fv, mask, params):
    """Fv: (B, V, D) f32, mask: (B, V) f32 (1.0 valid / 0.0 invalid)."""
    (query, wq, bq, wk, bk, wv, bv, wo, bo,
     g1, be1, w1, bf1, w2, bf2, g2, be2) = params

    # Wrapper-side layout plumbing (fused by XLA, negligible).
    wkv = jnp.concatenate([wk, wv], axis=1)                  # (D, 2D)

    # Additive attention-mask bias: 0 where valid, -1e9 where masked.
    bias = ((mask - 1.0) * 1e9).astype(jnp.float32)          # (B, V)

    # Pack all (1, D) vectors + the mask bias into one (16, D) operand.
    bias_pad = jnp.zeros((B, D), jnp.float32).at[:, :V].set(bias)
    pad = jnp.zeros((16 - 9 - B, D), jnp.float32)
    smalls = jnp.concatenate(
        [bq, bk, bv, bo, g1, be1, g2, be2, bf2, bias_pad, pad], axis=0)  # (16, D)

    vmem_spec = pl.BlockSpec(memory_space=pltpu.MemorySpace.VMEM)
    hbm_spec = pl.BlockSpec(memory_space=pl.ANY)

    out = pl.pallas_call(
        compressor_kernel,
        out_shape=jax.ShapeDtypeStruct((B, C, D), jnp.float32),
        in_specs=[vmem_spec,   # Fv
                  vmem_spec,   # query
                  vmem_spec,   # packed small vectors
                  vmem_spec,   # bf1 (1, 4D)
                  vmem_spec,   # Wq
                  vmem_spec,   # Wkv
                  vmem_spec,   # Wo
                  hbm_spec,    # W1 (streamed)
                  hbm_spec],   # W2 (streamed)
        out_specs=pl.BlockSpec(memory_space=pltpu.MemorySpace.VMEM),
        scratch_shapes=[
            pltpu.VMEM((H, C, HD), jnp.float32),        # q per head
            pltpu.VMEM((H, B * V, HD), jnp.float32),    # k per head
            pltpu.VMEM((H, B * V, HD), jnp.float32),    # v per head
            pltpu.VMEM((B * C, D), jnp.float32),        # concatenated heads
            pltpu.VMEM((D, FF), jnp.float32),           # W1 landing buffer
            pltpu.VMEM((FF, D), jnp.float32),           # W2 landing buffer
            pltpu.SemaphoreType.DMA((2,)),
        ],
        cost_estimate=pl.CostEstimate(
            flops=7_209_000, transcendentals=2_100, bytes_accessed=826_000),
    )(Fv, query, smalls, bf1, wq, wkv, wo, w1, w2)

    compress_mask = jnp.ones((B, C), dtype=jnp.bool_)
    return out, compress_mask


# --------------------------- pure-JAX reference ------------------------------
def reference(Fv, mask, params):
    (query, wq, bq, wk, bk, wv, bv, wo, bo,
     g1, be1, w1, bf1, w2, bf2, g2, be2) = params
    qy = jnp.broadcast_to(query[None], (B, C, D))
    q = qy @ wq + bq
    k = Fv @ wk + bk
    v = Fv @ wv + bv
    q = q.reshape(B, C, H, HD).transpose(0, 2, 1, 3)
    k = k.reshape(B, V, H, HD).transpose(0, 2, 1, 3)
    v = v.reshape(B, V, H, HD).transpose(0, 2, 1, 3)
    s = jnp.einsum("bhcd,bhvd->bhcv", q, k) / math.sqrt(HD)
    s = jnp.where(mask[:, None, None, :] > 0.5, s, NEG)
    p = jax.nn.softmax(s, axis=-1)
    wv_ = jnp.einsum("bhcv,bhvd->bhcd", p, v).transpose(0, 2, 1, 3).reshape(B, C, D)
    attn = wv_ @ wo + bo

    def ln(x, g, b):
        mu = x.mean(-1, keepdims=True)
        var = ((x - mu) ** 2).mean(-1, keepdims=True)
        return (x - mu) / jnp.sqrt(var + EPS) * g + b

    h1 = ln(qy + attn, g1, be1)
    ff = jnp.maximum(h1 @ w1 + bf1, 0.0) @ w2 + bf2
    return ln(h1 + ff, g2, be2)


if __name__ == "__main__":
    key = jax.random.PRNGKey(0)
    ks = jax.random.split(key, 24)

    def lin_w(kw, n_in, n_out):
        # stored as (in, out) so y = x @ W + b (== PyTorch y = x @ W.T + b)
        return jax.random.normal(kw, (n_in, n_out), jnp.float32) / math.sqrt(n_in)

    def lin_b(kb, n_out):
        return jax.random.normal(kb, (1, n_out), jnp.float32) * 0.1

    query = jax.random.normal(ks[0], (C, D), jnp.float32) * math.sqrt(2.0 / (C + D))
    wq, bq = lin_w(ks[1], D, D), lin_b(ks[2], D)
    wk, bk = lin_w(ks[3], D, D), lin_b(ks[4], D)
    wv, bv = lin_w(ks[5], D, D), lin_b(ks[6], D)
    wo, bo = lin_w(ks[7], D, D), lin_b(ks[8], D)
    g1 = 1.0 + 0.1 * jax.random.normal(ks[9], (1, D), jnp.float32)
    be1 = 0.1 * jax.random.normal(ks[10], (1, D), jnp.float32)
    w1, bf1 = lin_w(ks[11], D, FF), lin_b(ks[12], FF)
    w2, bf2 = lin_w(ks[13], FF, D), lin_b(ks[14], D)
    g2 = 1.0 + 0.1 * jax.random.normal(ks[15], (1, D), jnp.float32)
    be2 = 0.1 * jax.random.normal(ks[16], (1, D), jnp.float32)

    params = (query, wq, bq, wk, bk, wv, bv, wo, bo,
              g1, be1, w1, bf1, w2, bf2, g2, be2)

    Fv = jax.random.normal(ks[17], (B, V, D), jnp.float32)
    # mask: first batch fully valid, second batch last 6 positions masked
    mask = jnp.stack([jnp.ones((V,), jnp.float32),
                      jnp.concatenate([jnp.ones((V - 6,), jnp.float32),
                                       jnp.zeros((6,), jnp.float32)])])

    out, compress_mask = simple_compressor(Fv, mask, params)
    out = jax.block_until_ready(out)

    with jax.default_matmul_precision("highest"):
        ref = reference(Fv, mask, params)

    assert out.shape == (B, C, D)
    assert compress_mask.shape == (B, C) and compress_mask.dtype == jnp.bool_
    max_diff = float(jnp.max(jnp.abs(out - ref)))
    assert jnp.allclose(out, ref, atol=1e-3, rtol=1e-3), f"max abs diff {max_diff}"
    print("KERNEL_OK")
</pallas_src>

<mosaic_0001>
module attributes {stable_mosaic.version = 11 : i64} {
  func.func @compressor_kernel(%arg0: memref<2x16x128xf32, #tpu.memory_space<vmem>>, %arg1: memref<8x128xf32, #tpu.memory_space<vmem>>, %arg2: memref<16x128xf32, #tpu.memory_space<vmem>>, %arg3: memref<1x512xf32, #tpu.memory_space<vmem>>, %arg4: memref<128x128xf32, #tpu.memory_space<vmem>>, %arg5: memref<128x256xf32, #tpu.memory_space<vmem>>, %arg6: memref<128x128xf32, #tpu.memory_space<vmem>>, %arg7: memref<128x512xf32, #tpu.memory_space<any>>, %arg8: memref<512x128xf32, #tpu.memory_space<any>>, %arg9: memref<2x8x128xf32, #tpu.memory_space<vmem>>, %arg10: memref<8x8x16xf32, #tpu.memory_space<vmem>>, %arg11: memref<8x32x16xf32, #tpu.memory_space<vmem>>, %arg12: memref<8x32x16xf32, #tpu.memory_space<vmem>>, %arg13: memref<16x128xf32, #tpu.memory_space<vmem>>, %arg14: memref<128x512xf32, #tpu.memory_space<vmem>>, %arg15: memref<512x128xf32, #tpu.memory_space<vmem>>, %arg16: memref<2x!tpu.dma_semaphore, #tpu.memory_space<semaphore_mem>>) attributes {dimension_semantics = [], scalar_prefetch = 0 : i64, scratch_operands = 7 : i64, tpu.core_type = #tpu.core_type<tc>} {
    %c0_i32 = arith.constant 0 : i32
    %0 = tpu.memref_slice %arg16[%c0_i32] : memref<2x!tpu.dma_semaphore, #tpu.memory_space<semaphore_mem>> -> memref<1x!tpu.dma_semaphore, #tpu.memory_space<semaphore_mem>>
    %1 = tpu.memref_squeeze %0 : memref<1x!tpu.dma_semaphore, #tpu.memory_space<semaphore_mem>> -> memref<!tpu.dma_semaphore, #tpu.memory_space<semaphore_mem>>
    tpu.enqueue_dma source(%arg7 : memref<128x512xf32, #tpu.memory_space<any>>) target(%arg14 : memref<128x512xf32, #tpu.memory_space<vmem>>) target_semaphore(%1 : memref<!tpu.dma_semaphore, #tpu.memory_space<semaphore_mem>>)
    %c1_i32 = arith.constant 1 : i32
    %2 = tpu.memref_slice %arg16[%c1_i32] : memref<2x!tpu.dma_semaphore, #tpu.memory_space<semaphore_mem>> -> memref<1x!tpu.dma_semaphore, #tpu.memory_space<semaphore_mem>>
    %3 = tpu.memref_squeeze %2 : memref<1x!tpu.dma_semaphore, #tpu.memory_space<semaphore_mem>> -> memref<!tpu.dma_semaphore, #tpu.memory_space<semaphore_mem>>
    tpu.enqueue_dma source(%arg8 : memref<512x128xf32, #tpu.memory_space<any>>) target(%arg15 : memref<512x128xf32, #tpu.memory_space<vmem>>) target_semaphore(%3 : memref<!tpu.dma_semaphore, #tpu.memory_space<semaphore_mem>>)
    %c0 = arith.constant 0 : index
    %c0_0 = arith.constant 0 : index
    %c0_1 = arith.constant 0 : index
    %4 = vector.load %arg0[%c0, %c0_0, %c0_1] : memref<2x16x128xf32, #tpu.memory_space<vmem>>, vector<2x16x128xf32>
    %5 = vector.shape_cast %4 : vector<2x16x128xf32> to vector<32x128xf32>
    %c0_2 = arith.constant 0 : index
    %c0_3 = arith.constant 0 : index
    %6 = vector.load %arg1[%c0_2, %c0_3] : memref<8x128xf32, #tpu.memory_space<vmem>>, vector<8x128xf32>
    %c0_4 = arith.constant 0 : index
    %c0_5 = arith.constant 0 : index
    %7 = vector.load %arg2[%c0_4, %c0_5] : memref<16x128xf32, #tpu.memory_space<vmem>>, vector<16x128xf32>
    %8 = vector.extract_strided_slice %7 {offsets = [0, 0], sizes = [1, 128], strides = [1, 1]} : vector<16x128xf32> to vector<1x128xf32>
    %9 = vector.extract_strided_slice %7 {offsets = [1, 0], sizes = [1, 128], strides = [1, 1]} : vector<16x128xf32> to vector<1x128xf32>
    %10 = vector.extract_strided_slice %7 {offsets = [2, 0], sizes = [1, 128], strides = [1, 1]} : vector<16x128xf32> to vector<1x128xf32>
    %11 = vector.extract_strided_slice %7 {offsets = [3, 0], sizes = [1, 128], strides = [1, 1]} : vector<16x128xf32> to vector<1x128xf32>
    %12 = vector.extract_strided_slice %7 {offsets = [4, 0], sizes = [1, 128], strides = [1, 1]} : vector<16x128xf32> to vector<1x128xf32>
    %13 = vector.extract_strided_slice %7 {offsets = [5, 0], sizes = [1, 128], strides = [1, 1]} : vector<16x128xf32> to vector<1x128xf32>
    %14 = vector.extract_strided_slice %7 {offsets = [6, 0], sizes = [1, 128], strides = [1, 1]} : vector<16x128xf32> to vector<1x128xf32>
    %15 = vector.extract_strided_slice %7 {offsets = [7, 0], sizes = [1, 128], strides = [1, 1]} : vector<16x128xf32> to vector<1x128xf32>
    %16 = vector.extract_strided_slice %7 {offsets = [8, 0], sizes = [1, 128], strides = [1, 1]} : vector<16x128xf32> to vector<1x128xf32>
    %17 = vector.extract_strided_slice %7 {offsets = [9, 0], sizes = [2, 16], strides = [1, 1]} : vector<16x128xf32> to vector<2x16xf32>
    %c0_6 = arith.constant 0 : index
    %c0_7 = arith.constant 0 : index
    %18 = vector.load %arg4[%c0_6, %c0_7] : memref<128x128xf32, #tpu.memory_space<vmem>>, vector<128x128xf32>
    %cst = arith.constant dense<0.000000e+00> : vector<8x128xf32>
    %19 = tpu.matmul %6, %18, %cst {dimension_numbers = #tpu.dot_dimension_numbers<[1], [0], [0], [1], [0, 0, 1, 1], [], []>} : vector<8x128xf32>, vector<128x128xf32>, vector<8x128xf32> -> vector<8x128xf32>
    %20 = vector.broadcast %8 : vector<1x128xf32> to vector<8x128xf32>
    %21 = arith.addf %19, %20 : vector<8x128xf32>
    %c0_8 = arith.constant 0 : index
    %c0_9 = arith.constant 0 : index
    %22 = vector.load %arg5[%c0_8, %c0_9] : memref<128x256xf32, #tpu.memory_space<vmem>>, vector<128x256xf32>
    %cst_10 = arith.constant dense<0.000000e+00> : vector<32x256xf32>
    %23 = tpu.matmul %5, %22, %cst_10 {dimension_numbers = #tpu.dot_dimension_numbers<[1], [0], [0], [1], [0, 0, 1, 1], [], []>} : vector<32x128xf32>, vector<128x256xf32>, vector<32x256xf32> -> vector<32x256xf32>
    %24 = vector.extract_strided_slice %23 {offsets = [0, 0], sizes = [32, 128], strides = [1, 1]} : vector<32x256xf32> to vector<32x128xf32>
    %25 = vector.broadcast %9 : vector<1x128xf32> to vector<32x128xf32>
    %26 = arith.addf %24, %25 : vector<32x128xf32>
    %27 = vector.extract_strided_slice %23 {offsets = [0, 128], sizes = [32, 128], strides = [1, 1]} : vector<32x256xf32> to vector<32x128xf32>
    %28 = vector.broadcast %10 : vector<1x128xf32> to vector<32x128xf32>
    %29 = arith.addf %27, %28 : vector<32x128xf32>
    %30 = vector.extract_strided_slice %21 {offsets = [0, 0], sizes = [8, 16], strides = [1, 1]} : vector<8x128xf32> to vector<8x16xf32>
    %c0_11 = arith.constant 0 : index
    %c0_12 = arith.constant 0 : index
    %c0_13 = arith.constant 0 : index
    %31 = vector.load %arg10[%c0_11, %c0_12, %c0_13] : memref<8x8x16xf32, #tpu.memory_space<vmem>>, vector<1x8x16xf32>
    %32 = vector.shape_cast %31 : vector<1x8x16xf32> to vector<8x16xf32>
    %33 = vector.shape_cast %30 : vector<8x16xf32> to vector<1x8x16xf32>
    tpu.vector_store %arg10[%c0_11, %c0_12, %c0_13], %33 {strides = array<i32>} : memref<8x8x16xf32, #tpu.memory_space<vmem>>, vector<1x8x16xf32>,
    %34 = vector.extract_strided_slice %26 {offsets = [0, 0], sizes = [32, 16], strides = [1, 1]} : vector<32x128xf32> to vector<32x16xf32>
    %c0_14 = arith.constant 0 : index
    %c0_15 = arith.constant 0 : index
    %c0_16 = arith.constant 0 : index
    %35 = vector.load %arg11[%c0_14, %c0_15, %c0_16] : memref<8x32x16xf32, #tpu.memory_space<vmem>>, vector<1x32x16xf32>
    %36 = vector.shape_cast %35 : vector<1x32x16xf32> to vector<32x16xf32>
    %37 = vector.shape_cast %34 : vector<32x16xf32> to vector<1x32x16xf32>
    tpu.vector_store %arg11[%c0_14, %c0_15, %c0_16], %37 {strides = array<i32>} : memref<8x32x16xf32, #tpu.memory_space<vmem>>, vector<1x32x16xf32>,
    %38 = vector.extract_strided_slice %29 {offsets = [0, 0], sizes = [32, 16], strides = [1, 1]} : vector<32x128xf32> to vector<32x16xf32>
    %c0_17 = arith.constant 0 : index
    %c0_18 = arith.constant 0 : index
    %c0_19 = arith.constant 0 : index
    %39 = vector.load %arg12[%c0_17, %c0_18, %c0_19] : memref<8x32x16xf32, #tpu.memory_space<vmem>>, vector<1x32x16xf32>
    %40 = vector.shape_cast %39 : vector<1x32x16xf32> to vector<32x16xf32>
    %41 = vector.shape_cast %38 : vector<32x16xf32> to vector<1x32x16xf32>
    tpu.vector_store %arg12[%c0_17, %c0_18, %c0_19], %41 {strides = array<i32>} : memref<8x32x16xf32, #tpu.memory_space<vmem>>, vector<1x32x16xf32>,
    %42 = vector.extract_strided_slice %21 {offsets = [0, 16], sizes = [8, 16], strides = [1, 1]} : vector<8x128xf32> to vector<8x16xf32>
    %c1 = arith.constant 1 : index
    %c0_20 = arith.constant 0 : index
    %c0_21 = arith.constant 0 : index
    %43 = vector.load %arg10[%c1, %c0_20, %c0_21] : memref<8x8x16xf32, #tpu.memory_space<vmem>>, vector<1x8x16xf32>
    %44 = vector.shape_cast %43 : vector<1x8x16xf32> to vector<8x16xf32>
    %45 = vector.shape_cast %42 : vector<8x16xf32> to vector<1x8x16xf32>
    tpu.vector_store %arg10[%c1, %c0_20, %c0_21], %45 {strides = array<i32>} : memref<8x8x16xf32, #tpu.memory_space<vmem>>, vector<1x8x16xf32>,
    %46 = vector.extract_strided_slice %26 {offsets = [0, 16], sizes = [32, 16], strides = [1, 1]} : vector<32x128xf32> to vector<32x16xf32>
    %c1_22 = arith.constant 1 : index
    %c0_23 = arith.constant 0 : index
    %c0_24 = arith.constant 0 : index
    %47 = vector.load %arg11[%c1_22, %c0_23, %c0_24] : memref<8x32x16xf32, #tpu.memory_space<vmem>>, vector<1x32x16xf32>
    %48 = vector.shape_cast %47 : vector<1x32x16xf32> to vector<32x16xf32>
    %49 = vector.shape_cast %46 : vector<32x16xf32> to vector<1x32x16xf32>
    tpu.vector_store %arg11[%c1_22, %c0_23, %c0_24], %49 {strides = array<i32>} : memref<8x32x16xf32, #tpu.memory_space<vmem>>, vector<1x32x16xf32>,
    %50 = vector.extract_strided_slice %29 {offsets = [0, 16], sizes = [32, 16], strides = [1, 1]} : vector<32x128xf32> to vector<32x16xf32>
    %c1_25 = arith.constant 1 : index
    %c0_26 = arith.constant 0 : index
    %c0_27 = arith.constant 0 : index
    %51 = vector.load %arg12[%c1_25, %c0_26, %c0_27] : memref<8x32x16xf32, #tpu.memory_space<vmem>>, vector<1x32x16xf32>
    %52 = vector.shape_cast %51 : vector<1x32x16xf32> to vector<32x16xf32>
    %53 = vector.shape_cast %50 : vector<32x16xf32> to vector<1x32x16xf32>
    tpu.vector_store %arg12[%c1_25, %c0_26, %c0_27], %53 {strides = array<i32>} : memref<8x32x16xf32, #tpu.memory_space<vmem>>, vector<1x32x16xf32>,
    %54 = vector.extract_strided_slice %21 {offsets = [0, 32], sizes = [8, 16], strides = [1, 1]} : vector<8x128xf32> to vector<8x16xf32>
    %c2 = arith.constant 2 : index
    %c0_28 = arith.constant 0 : index
    %c0_29 = arith.constant 0 : index
    %55 = vector.load %arg10[%c2, %c0_28, %c0_29] : memref<8x8x16xf32, #tpu.memory_space<vmem>>, vector<1x8x16xf32>
    %56 = vector.shape_cast %55 : vector<1x8x16xf32> to vector<8x16xf32>
    %57 = vector.shape_cast %54 : vector<8x16xf32> to vector<1x8x16xf32>
    tpu.vector_store %arg10[%c2, %c0_28, %c0_29], %57 {strides = array<i32>} : memref<8x8x16xf32, #tpu.memory_space<vmem>>, vector<1x8x16xf32>,
    %58 = vector.extract_strided_slice %26 {offsets = [0, 32], sizes = [32, 16], strides = [1, 1]} : vector<32x128xf32> to vector<32x16xf32>
    %c2_30 = arith.constant 2 : index
    %c0_31 = arith.constant 0 : index
    %c0_32 = arith.constant 0 : index
    %59 = vector.load %arg11[%c2_30, %c0_31, %c0_32] : memref<8x32x16xf32, #tpu.memory_space<vmem>>, vector<1x32x16xf32>
    %60 = vector.shape_cast %59 : vector<1x32x16xf32> to vector<32x16xf32>
    %61 = vector.shape_cast %58 : vector<32x16xf32> to vector<1x32x16xf32>
    tpu.vector_store %arg11[%c2_30, %c0_31, %c0_32], %61 {strides = array<i32>} : memref<8x32x16xf32, #tpu.memory_space<vmem>>, vector<1x32x16xf32>,
    %62 = vector.extract_strided_slice %29 {offsets = [0, 32], sizes = [32, 16], strides = [1, 1]} : vector<32x128xf32> to vector<32x16xf32>
    %c2_33 = arith.constant 2 : index
    %c0_34 = arith.constant 0 : index
    %c0_35 = arith.constant 0 : index
    %63 = vector.load %arg12[%c2_33, %c0_34, %c0_35] : memref<8x32x16xf32, #tpu.memory_space<vmem>>, vector<1x32x16xf32>
    %64 = vector.shape_cast %63 : vector<1x32x16xf32> to vector<32x16xf32>
    %65 = vector.shape_cast %62 : vector<32x16xf32> to vector<1x32x16xf32>
    tpu.vector_store %arg12[%c2_33, %c0_34, %c0_35], %65 {strides = array<i32>} : memref<8x32x16xf32, #tpu.memory_space<vmem>>, vector<1x32x16xf32>,
    %66 = vector.extract_strided_slice %21 {offsets = [0, 48], sizes = [8, 16], strides = [1, 1]} : vector<8x128xf32> to vector<8x16xf32>
    %c3 = arith.constant 3 : index
    %c0_36 = arith.constant 0 : index
    %c0_37 = arith.constant 0 : index
    %67 = vector.load %arg10[%c3, %c0_36, %c0_37] : memref<8x8x16xf32, #tpu.memory_space<vmem>>, vector<1x8x16xf32>
    %68 = vector.shape_cast %67 : vector<1x8x16xf32> to vector<8x16xf32>
    %69 = vector.shape_cast %66 : vector<8x16xf32> to vector<1x8x16xf32>
    tpu.vector_store %arg10[%c3, %c0_36, %c0_37], %69 {strides = array<i32>} : memref<8x8x16xf32, #tpu.memory_space<vmem>>, vector<1x8x16xf32>,
    %70 = vector.extract_strided_slice %26 {offsets = [0, 48], sizes = [32, 16], strides = [1, 1]} : vector<32x128xf32> to vector<32x16xf32>
    %c3_38 = arith.constant 3 : index
    %c0_39 = arith.constant 0 : index
    %c0_40 = arith.constant 0 : index
    %71 = vector.load %arg11[%c3_38, %c0_39, %c0_40] : memref<8x32x16xf32, #tpu.memory_space<vmem>>, vector<1x32x16xf32>
    %72 = vector.shape_cast %71 : vector<1x32x16xf32> to vector<32x16xf32>
    %73 = vector.shape_cast %70 : vector<32x16xf32> to vector<1x32x16xf32>
    tpu.vector_store %arg11[%c3_38, %c0_39, %c0_40], %73 {strides = array<i32>} : memref<8x32x16xf32, #tpu.memory_space<vmem>>, vector<1x32x16xf32>,
    %74 = vector.extract_strided_slice %29 {offsets = [0, 48], sizes = [32, 16], strides = [1, 1]} : vector<32x128xf32> to vector<32x16xf32>
    %c3_41 = arith.constant 3 : index
    %c0_42 = arith.constant 0 : index
    %c0_43 = arith.constant 0 : index
    %75 = vector.load %arg12[%c3_41, %c0_42, %c0_43] : memref<8x32x16xf32, #tpu.memory_space<vmem>>, vector<1x32x16xf32>
    %76 = vector.shape_cast %75 : vector<1x32x16xf32> to vector<32x16xf32>
    %77 = vector.shape_cast %74 : vector<32x16xf32> to vector<1x32x16xf32>
    tpu.vector_store %arg12[%c3_41, %c0_42, %c0_43], %77 {strides = array<i32>} : memref<8x32x16xf32, #tpu.memory_space<vmem>>, vector<1x32x16xf32>,
    %78 = vector.extract_strided_slice %21 {offsets = [0, 64], sizes = [8, 16], strides = [1, 1]} : vector<8x128xf32> to vector<8x16xf32>
    %c4 = arith.constant 4 : index
    %c0_44 = arith.constant 0 : index
    %c0_45 = arith.constant 0 : index
    %79 = vector.load %arg10[%c4, %c0_44, %c0_45] : memref<8x8x16xf32, #tpu.memory_space<vmem>>, vector<1x8x16xf32>
    %80 = vector.shape_cast %79 : vector<1x8x16xf32> to vector<8x16xf32>
    %81 = vector.shape_cast %78 : vector<8x16xf32> to vector<1x8x16xf32>
    tpu.vector_store %arg10[%c4, %c0_44, %c0_45], %81 {strides = array<i32>} : memref<8x8x16xf32, #tpu.memory_space<vmem>>, vector<1x8x16xf32>,
    %82 = vector.extract_strided_slice %26 {offsets = [0, 64], sizes = [32, 16], strides = [1, 1]} : vector<32x128xf32> to vector<32x16xf32>
    %c4_46 = arith.constant 4 : index
    %c0_47 = arith.constant 0 : index
    %c0_48 = arith.constant 0 : index
    %83 = vector.load %arg11[%c4_46, %c0_47, %c0_48] : memref<8x32x16xf32, #tpu.memory_space<vmem>>, vector<1x32x16xf32>
    %84 = vector.shape_cast %83 : vector<1x32x16xf32> to vector<32x16xf32>
    %85 = vector.shape_cast %82 : vector<32x16xf32> to vector<1x32x16xf32>
    tpu.vector_store %arg11[%c4_46, %c0_47, %c0_48], %85 {strides = array<i32>} : memref<8x32x16xf32, #tpu.memory_space<vmem>>, vector<1x32x16xf32>,
    %86 = vector.extract_strided_slice %29 {offsets = [0, 64], sizes = [32, 16], strides = [1, 1]} : vector<32x128xf32> to vector<32x16xf32>
    %c4_49 = arith.constant 4 : index
    %c0_50 = arith.constant 0 : index
    %c0_51 = arith.constant 0 : index
    %87 = vector.load %arg12[%c4_49, %c0_50, %c0_51] : memref<8x32x16xf32, #tpu.memory_space<vmem>>, vector<1x32x16xf32>
    %88 = vector.shape_cast %87 : vector<1x32x16xf32> to vector<32x16xf32>
    %89 = vector.shape_cast %86 : vector<32x16xf32> to vector<1x32x16xf32>
    tpu.vector_store %arg12[%c4_49, %c0_50, %c0_51], %89 {strides = array<i32>} : memref<8x32x16xf32, #tpu.memory_space<vmem>>, vector<1x32x16xf32>,
    %90 = vector.extract_strided_slice %21 {offsets = [0, 80], sizes = [8, 16], strides = [1, 1]} : vector<8x128xf32> to vector<8x16xf32>
    %c5 = arith.constant 5 : index
    %c0_52 = arith.constant 0 : index
    %c0_53 = arith.constant 0 : index
    %91 = vector.load %arg10[%c5, %c0_52, %c0_53] : memref<8x8x16xf32, #tpu.memory_space<vmem>>, vector<1x8x16xf32>
    %92 = vector.shape_cast %91 : vector<1x8x16xf32> to vector<8x16xf32>
    %93 = vector.shape_cast %90 : vector<8x16xf32> to vector<1x8x16xf32>
    tpu.vector_store %arg10[%c5, %c0_52, %c0_53], %93 {strides = array<i32>} : memref<8x8x16xf32, #tpu.memory_space<vmem>>, vector<1x8x16xf32>,
    %94 = vector.extract_strided_slice %26 {offsets = [0, 80], sizes = [32, 16], strides = [1, 1]} : vector<32x128xf32> to vector<32x16xf32>
    %c5_54 = arith.constant 5 : index
    %c0_55 = arith.constant 0 : index
    %c0_56 = arith.constant 0 : index
    %95 = vector.load %arg11[%c5_54, %c0_55, %c0_56] : memref<8x32x16xf32, #tpu.memory_space<vmem>>, vector<1x32x16xf32>
    %96 = vector.shape_cast %95 : vector<1x32x16xf32> to vector<32x16xf32>
    %97 = vector.shape_cast %94 : vector<32x16xf32> to vector<1x32x16xf32>
    tpu.vector_store %arg11[%c5_54, %c0_55, %c0_56], %97 {strides = array<i32>} : memref<8x32x16xf32, #tpu.memory_space<vmem>>, vector<1x32x16xf32>,
    %98 = vector.extract_strided_slice %29 {offsets = [0, 80], sizes = [32, 16], strides = [1, 1]} : vector<32x128xf32> to vector<32x16xf32>
    %c5_57 = arith.constant 5 : index
    %c0_58 = arith.constant 0 : index
    %c0_59 = arith.constant 0 : index
    %99 = vector.load %arg12[%c5_57, %c0_58, %c0_59] : memref<8x32x16xf32, #tpu.memory_space<vmem>>, vector<1x32x16xf32>
    %100 = vector.shape_cast %99 : vector<1x32x16xf32> to vector<32x16xf32>
    %101 = vector.shape_cast %98 : vector<32x16xf32> to vector<1x32x16xf32>
    tpu.vector_store %arg12[%c5_57, %c0_58, %c0_59], %101 {strides = array<i32>} : memref<8x32x16xf32, #tpu.memory_space<vmem>>, vector<1x32x16xf32>,
    %102 = vector.extract_strided_slice %21 {offsets = [0, 96], sizes = [8, 16], strides = [1, 1]} : vector<8x128xf32> to vector<8x16xf32>
    %c6 = arith.constant 6 : index
    %c0_60 = arith.constant 0 : index
    %c0_61 = arith.constant 0 : index
    %103 = vector.load %arg10[%c6, %c0_60, %c0_61] : memref<8x8x16xf32, #tpu.memory_space<vmem>>, vector<1x8x16xf32>
    %104 = vector.shape_cast %103 : vector<1x8x16xf32> to vector<8x16xf32>
    %105 = vector.shape_cast %102 : vector<8x16xf32> to vector<1x8x16xf32>
    tpu.vector_store %arg10[%c6, %c0_60, %c0_61], %105 {strides = array<i32>} : memref<8x8x16xf32, #tpu.memory_space<vmem>>, vector<1x8x16xf32>,
    %106 = vector.extract_strided_slice %26 {offsets = [0, 96], sizes = [32, 16], strides = [1, 1]} : vector<32x128xf32> to vector<32x16xf32>
    %c6_62 = arith.constant 6 : index
    %c0_63 = arith.constant 0 : index
    %c0_64 = arith.constant 0 : index
    %107 = vector.load %arg11[%c6_62, %c0_63, %c0_64] : memref<8x32x16xf32, #tpu.memory_space<vmem>>, vector<1x32x16xf32>
    %108 = vector.shape_cast %107 : vector<1x32x16xf32> to vector<32x16xf32>
    %109 = vector.shape_cast %106 : vector<32x16xf32> to vector<1x32x16xf32>
    tpu.vector_store %arg11[%c6_62, %c0_63, %c0_64], %109 {strides = array<i32>} : memref<8x32x16xf32, #tpu.memory_space<vmem>>, vector<1x32x16xf32>,
    %110 = vector.extract_strided_slice %29 {offsets = [0, 96], sizes = [32, 16], strides = [1, 1]} : vector<32x128xf32> to vector<32x16xf32>
    %c6_65 = arith.constant 6 : index
    %c0_66 = arith.constant 0 : index
    %c0_67 = arith.constant 0 : index
    %111 = vector.load %arg12[%c6_65, %c0_66, %c0_67] : memref<8x32x16xf32, #tpu.memory_space<vmem>>, vector<1x32x16xf32>
    %112 = vector.shape_cast %111 : vector<1x32x16xf32> to vector<32x16xf32>
    %113 = vector.shape_cast %110 : vector<32x16xf32> to vector<1x32x16xf32>
    tpu.vector_store %arg12[%c6_65, %c0_66, %c0_67], %113 {strides = array<i32>} : memref<8x32x16xf32, #tpu.memory_space<vmem>>, vector<1x32x16xf32>,
    %114 = vector.extract_strided_slice %21 {offsets = [0, 112], sizes = [8, 16], strides = [1, 1]} : vector<8x128xf32> to vector<8x16xf32>
    %c7 = arith.constant 7 : index
    %c0_68 = arith.constant 0 : index
    %c0_69 = arith.constant 0 : index
    %115 = vector.load %arg10[%c7, %c0_68, %c0_69] : memref<8x8x16xf32, #tpu.memory_space<vmem>>, vector<1x8x16xf32>
    %116 = vector.shape_cast %115 : vector<1x8x16xf32> to vector<8x16xf32>
    %117 = vector.shape_cast %114 : vector<8x16xf32> to vector<1x8x16xf32>
    tpu.vector_store %arg10[%c7, %c0_68, %c0_69], %117 {strides = array<i32>} : memref<8x8x16xf32, #tpu.memory_space<vmem>>, vector<1x8x16xf32>,
    %118 = vector.extract_strided_slice %26 {offsets = [0, 112], sizes = [32, 16], strides = [1, 1]} : vector<32x128xf32> to vector<32x16xf32>
    %c7_70 = arith.constant 7 : index
    %c0_71 = arith.constant 0 : index
    %c0_72 = arith.constant 0 : index
    %119 = vector.load %arg11[%c7_70, %c0_71, %c0_72] : memref<8x32x16xf32, #tpu.memory_space<vmem>>, vector<1x32x16xf32>
    %120 = vector.shape_cast %119 : vector<1x32x16xf32> to vector<32x16xf32>
    %121 = vector.shape_cast %118 : vector<32x16xf32> to vector<1x32x16xf32>
    tpu.vector_store %arg11[%c7_70, %c0_71, %c0_72], %121 {strides = array<i32>} : memref<8x32x16xf32, #tpu.memory_space<vmem>>, vector<1x32x16xf32>,
    %122 = vector.extract_strided_slice %29 {offsets = [0, 112], sizes = [32, 16], strides = [1, 1]} : vector<32x128xf32> to vector<32x16xf32>
    %c7_73 = arith.constant 7 : index
    %c0_74 = arith.constant 0 : index
    %c0_75 = arith.constant 0 : index
    %123 = vector.load %arg12[%c7_73, %c0_74, %c0_75] : memref<8x32x16xf32, #tpu.memory_space<vmem>>, vector<1x32x16xf32>
    %124 = vector.shape_cast %123 : vector<1x32x16xf32> to vector<32x16xf32>
    %125 = vector.shape_cast %122 : vector<32x16xf32> to vector<1x32x16xf32>
    tpu.vector_store %arg12[%c7_73, %c0_74, %c0_75], %125 {strides = array<i32>} : memref<8x32x16xf32, #tpu.memory_space<vmem>>, vector<1x32x16xf32>,
    %c0_76 = arith.constant 0 : index
    %c0_77 = arith.constant 0 : index
    %c0_78 = arith.constant 0 : index
    %126 = vector.load %arg10[%c0_76, %c0_77, %c0_78] : memref<8x8x16xf32, #tpu.memory_space<vmem>>, vector<8x8x16xf32>
    %c0_79 = arith.constant 0 : index
    %c0_80 = arith.constant 0 : index
    %c0_81 = arith.constant 0 : index
    %127 = vector.load %arg11[%c0_79, %c0_80, %c0_81] : memref<8x32x16xf32, #tpu.memory_space<vmem>>, vector<8x32x16xf32>
    %128 = vector.shape_cast %127 : vector<8x32x16xf32> to vector<16x16x16xf32>
    %c0_82 = arith.constant 0 : index
    %c0_83 = arith.constant 0 : index
    %c0_84 = arith.constant 0 : index
    %129 = vector.load %arg12[%c0_82, %c0_83, %c0_84] : memref<8x32x16xf32, #tpu.memory_space<vmem>>, vector<8x32x16xf32>
    %130 = vector.shape_cast %129 : vector<8x32x16xf32> to vector<16x16x16xf32>
    %131 = vector.shape_cast %126 : vector<8x8x16xf32> to vector<8x1x8x16xf32>
    %132 = vector.shape_cast %131 : vector<8x1x8x16xf32> to vector<8x1x8x16xf32>
    %133 = vector.broadcast %132 : vector<8x1x8x16xf32> to vector<8x2x8x16xf32>
    %134 = vector.shape_cast %133 : vector<8x2x8x16xf32> to vector<16x8x16xf32>
    %135 = vector.shape_cast %17 : vector<2x16xf32> to vector<1x2x1x16xf32>
    %136 = vector.shape_cast %135 : vector<1x2x1x16xf32> to vector<1x2x1x16xf32>
    %137 = vector.broadcast %136 : vector<1x2x1x16xf32> to vector<8x2x8x16xf32>
    %138 = vector.shape_cast %137 : vector<8x2x8x16xf32> to vector<16x8x16xf32>
    "tpu.trace_start"() <{level = 10 : i32, message = "ncd,nvd->ncv"}> : () -> ()
    %cst_85 = arith.constant dense<0.000000e+00> : vector<16x8x16xf32>
    %139 = tpu.matmul %134, %128, %cst_85 {dimension_numbers = #tpu.dot_dimension_numbers<[2], [2], [1], [1], [0, 0, 0, 1, 1, 1], [0], [0]>} : vector<16x8x16xf32>, vector<16x16x16xf32>, vector<16x8x16xf32> -> vector<16x8x16xf32>
    "tpu.trace_stop"() : () -> ()
    %cst_86 = arith.constant 2.500000e-01 : f32
    %140 = vector.broadcast %cst_86 : f32 to vector<16x8x16xf32>
    %141 = arith.mulf %139, %140 : vector<16x8x16xf32>
    %142 = arith.addf %141, %138 : vector<16x8x16xf32>
    %cst_87 = arith.constant dense<0xFF800000> : vector<16x8xf32>
    %143 = vector.multi_reduction <maximumf>, %142, %cst_87 [2] : vector<16x8x16xf32> to vector<16x8xf32>
    %144 = vector.shape_cast %143 : vector<16x8xf32> to vector<16x8x1xf32>
    %145 = vector.broadcast %144 : vector<16x8x1xf32> to vector<16x8x16xf32>
    %146 = arith.subf %142, %145 : vector<16x8x16xf32>
    %147 = math.exp %146 : vector<16x8x16xf32>
    %cst_88 = arith.constant dense<0.000000e+00> : vector<16x8xf32>
    %148 = vector.multi_reduction <add>, %147, %cst_88 [2] : vector<16x8x16xf32> to vector<16x8xf32>
    %149 = vector.shape_cast %148 : vector<16x8xf32> to vector<16x8x1xf32>
    %150 = vector.broadcast %149 : vector<16x8x1xf32> to vector<16x8x16xf32>
    %151 = arith.divf %147, %150 : vector<16x8x16xf32>
    "tpu.trace_start"() <{level = 10 : i32, message = "ncv,nvd->ncd"}> : () -> ()
    %cst_89 = arith.constant dense<0.000000e+00> : vector<16x8x16xf32>
    %152 = tpu.matmul %151, %130, %cst_89 {dimension_numbers = #tpu.dot_dimension_numbers<[2], [1], [1], [2], [0, 0, 0, 1, 1, 2], [0], [0]>} : vector<16x8x16xf32>, vector<16x16x16xf32>, vector<16x8x16xf32> -> vector<16x8x16xf32>
    "tpu.trace_stop"() : () -> ()
    %153 = vector.shape_cast %152 : vector<16x8x16xf32> to vector<8x16x16xf32>
    %154 = vector.extract_strided_slice %153 {offsets = [0, 0, 0], sizes = [1, 16, 16], strides = [1, 1, 1]} : vector<8x16x16xf32> to vector<1x16x16xf32>
    %155 = vector.shape_cast %154 : vector<1x16x16xf32> to vector<16x16xf32>
    %c0_90 = arith.constant 0 : index
    %c0_91 = arith.constant 0 : index
    %156 = vector.load %arg13[%c0_90, %c0_91] : memref<16x128xf32, #tpu.memory_space<vmem>>, vector<16x16xf32>
    tpu.vector_store %arg13[%c0_90, %c0_91], %155 {strides = array<i32>} : memref<16x128xf32, #tpu.memory_space<vmem>>, vector<16x16xf32>,
    %157 = vector.extract_strided_slice %153 {offsets = [1, 0, 0], sizes = [1, 16, 16], strides = [1, 1, 1]} : vector<8x16x16xf32> to vector<1x16x16xf32>
    %158 = vector.shape_cast %157 : vector<1x16x16xf32> to vector<16x16xf32>
    %c0_92 = arith.constant 0 : index
    %c16 = arith.constant 16 : index
    %159 = vector.load %arg13[%c0_92, %c16] : memref<16x128xf32, #tpu.memory_space<vmem>>, vector<16x16xf32>
    tpu.vector_store %arg13[%c0_92, %c16], %158 {strides = array<i32>} : memref<16x128xf32, #tpu.memory_space<vmem>>, vector<16x16xf32>,
    %160 = vector.extract_strided_slice %153 {offsets = [2, 0, 0], sizes = [1, 16, 16], strides = [1, 1, 1]} : vector<8x16x16xf32> to vector<1x16x16xf32>
    %161 = vector.shape_cast %160 : vector<1x16x16xf32> to vector<16x16xf32>
    %c0_93 = arith.constant 0 : index
    %c32 = arith.constant 32 : index
    %162 = vector.load %arg13[%c0_93, %c32] : memref<16x128xf32, #tpu.memory_space<vmem>>, vector<16x16xf32>
    tpu.vector_store %arg13[%c0_93, %c32], %161 {strides = array<i32>} : memref<16x128xf32, #tpu.memory_space<vmem>>, vector<16x16xf32>,
    %163 = vector.extract_strided_slice %153 {offsets = [3, 0, 0], sizes = [1, 16, 16], strides = [1, 1, 1]} : vector<8x16x16xf32> to vector<1x16x16xf32>
    %164 = vector.shape_cast %163 : vector<1x16x16xf32> to vector<16x16xf32>
    %c0_94 = arith.constant 0 : index
    %c48 = arith.constant 48 : index
    %165 = vector.load %arg13[%c0_94, %c48] : memref<16x128xf32, #tpu.memory_space<vmem>>, vector<16x16xf32>
    tpu.vector_store %arg13[%c0_94, %c48], %164 {strides = array<i32>} : memref<16x128xf32, #tpu.memory_space<vmem>>, vector<16x16xf32>,
    %166 = vector.extract_strided_slice %153 {offsets = [4, 0, 0], sizes = [1, 16, 16], strides = [1, 1, 1]} : vector<8x16x16xf32> to vector<1x16x16xf32>
    %167 = vector.shape_cast %166 : vector<1x16x16xf32> to vector<16x16xf32>
    %c0_95 = arith.constant 0 : index
    %c64 = arith.constant 64 : index
    %168 = vector.load %arg13[%c0_95, %c64] : memref<16x128xf32, #tpu.memory_space<vmem>>, vector<16x16xf32>
    tpu.vector_store %arg13[%c0_95, %c64], %167 {strides = array<i32>} : memref<16x128xf32, #tpu.memory_space<vmem>>, vector<16x16xf32>,
    %169 = vector.extract_strided_slice %153 {offsets = [5, 0, 0], sizes = [1, 16, 16], strides = [1, 1, 1]} : vector<8x16x16xf32> to vector<1x16x16xf32>
    %170 = vector.shape_cast %169 : vector<1x16x16xf32> to vector<16x16xf32>
    %c0_96 = arith.constant 0 : index
    %c80 = arith.constant 80 : index
    %171 = vector.load %arg13[%c0_96, %c80] : memref<16x128xf32, #tpu.memory_space<vmem>>, vector<16x16xf32>
    tpu.vector_store %arg13[%c0_96, %c80], %170 {strides = array<i32>} : memref<16x128xf32, #tpu.memory_space<vmem>>, vector<16x16xf32>,
    %172 = vector.extract_strided_slice %153 {offsets = [6, 0, 0], sizes = [1, 16, 16], strides = [1, 1, 1]} : vector<8x16x16xf32> to vector<1x16x16xf32>
    %173 = vector.shape_cast %172 : vector<1x16x16xf32> to vector<16x16xf32>
    %c0_97 = arith.constant 0 : index
    %c96 = arith.constant 96 : index
    %174 = vector.load %arg13[%c0_97, %c96] : memref<16x128xf32, #tpu.memory_space<vmem>>, vector<16x16xf32>
    tpu.vector_store %arg13[%c0_97, %c96], %173 {strides = array<i32>} : memref<16x128xf32, #tpu.memory_space<vmem>>, vector<16x16xf32>,
    %175 = vector.extract_strided_slice %153 {offsets = [7, 0, 0], sizes = [1, 16, 16], strides = [1, 1, 1]} : vector<8x16x16xf32> to vector<1x16x16xf32>
    %176 = vector.shape_cast %175 : vector<1x16x16xf32> to vector<16x16xf32>
    %c0_98 = arith.constant 0 : index
    %c112 = arith.constant 112 : index
    %177 = vector.load %arg13[%c0_98, %c112] : memref<16x128xf32, #tpu.memory_space<vmem>>, vector<16x16xf32>
    tpu.vector_store %arg13[%c0_98, %c112], %176 {strides = array<i32>} : memref<16x128xf32, #tpu.memory_space<vmem>>, vector<16x16xf32>,
    %c0_99 = arith.constant 0 : index
    %c0_100 = arith.constant 0 : index
    %178 = vector.load %arg13[%c0_99, %c0_100] : memref<16x128xf32, #tpu.memory_space<vmem>>, vector<16x128xf32>
    %c0_101 = arith.constant 0 : index
    %c0_102 = arith.constant 0 : index
    %179 = vector.load %arg6[%c0_101, %c0_102] : memref<128x128xf32, #tpu.memory_space<vmem>>, vector<128x128xf32>
    %cst_103 = arith.constant dense<0.000000e+00> : vector<16x128xf32>
    %180 = tpu.matmul %178, %179, %cst_103 {dimension_numbers = #tpu.dot_dimension_numbers<[1], [0], [0], [1], [0, 0, 1, 1], [], []>} : vector<16x128xf32>, vector<128x128xf32>, vector<16x128xf32> -> vector<16x128xf32>
    %181 = vector.broadcast %11 : vector<1x128xf32> to vector<16x128xf32>
    %182 = arith.addf %180, %181 : vector<16x128xf32>
    %183 = vector.shape_cast %6 : vector<8x128xf32> to vector<1x8x128xf32>
    %184 = vector.shape_cast %183 : vector<1x8x128xf32> to vector<1x8x128xf32>
    %185 = vector.broadcast %184 : vector<1x8x128xf32> to vector<2x8x128xf32>
    %186 = vector.shape_cast %185 : vector<2x8x128xf32> to vector<16x128xf32>
    %187 = arith.addf %186, %182 : vector<16x128xf32>
    %cst_104 = arith.constant dense<0.000000e+00> : vector<16xf32>
    %188 = vector.multi_reduction <add>, %187, %cst_104 [1] : vector<16x128xf32> to vector<16xf32>
    %189 = vector.shape_cast %188 : vector<16xf32> to vector<16x1xf32>
    %cst_105 = arith.constant 1.280000e+02 : f32
    %190 = vector.broadcast %cst_105 : f32 to vector<16x1xf32>
    %191 = arith.divf %189, %190 : vector<16x1xf32>
    %192 = vector.broadcast %191 : vector<16x1xf32> to vector<16x128xf32>
    %193 = arith.subf %187, %192 : vector<16x128xf32>
    %194 = arith.mulf %193, %193 : vector<16x128xf32>
    %cst_106 = arith.constant dense<0.000000e+00> : vector<16xf32>
    %195 = vector.multi_reduction <add>, %194, %cst_106 [1] : vector<16x128xf32> to vector<16xf32>
    %196 = vector.shape_cast %195 : vector<16xf32> to vector<16x1xf32>
    %cst_107 = arith.constant 1.280000e+02 : f32
    %197 = vector.broadcast %cst_107 : f32 to vector<16x1xf32>
    %198 = arith.divf %196, %197 : vector<16x1xf32>
    %199 = vector.broadcast %191 : vector<16x1xf32> to vector<16x128xf32>
    %200 = arith.subf %187, %199 : vector<16x128xf32>
    %cst_108 = arith.constant 9.99999974E-6 : f32
    %201 = vector.broadcast %cst_108 : f32 to vector<16x1xf32>
    %202 = arith.addf %198, %201 : vector<16x1xf32>
    %203 = math.rsqrt %202 : vector<16x1xf32>
    %204 = vector.broadcast %203 : vector<16x1xf32> to vector<16x128xf32>
    %205 = arith.mulf %200, %204 : vector<16x128xf32>
    %206 = vector.broadcast %12 : vector<1x128xf32> to vector<16x128xf32>
    %207 = arith.mulf %205, %206 : vector<16x128xf32>
    %208 = vector.broadcast %13 : vector<1x128xf32> to vector<16x128xf32>
    %209 = arith.addf %207, %208 : vector<16x128xf32>
    %c0_i32_109 = arith.constant 0 : i32
    %210 = tpu.memref_slice %arg16[%c0_i32_109] : memref<2x!tpu.dma_semaphore, #tpu.memory_space<semaphore_mem>> -> memref<1x!tpu.dma_semaphore, #tpu.memory_space<semaphore_mem>>
    %211 = tpu.memref_squeeze %210 : memref<1x!tpu.dma_semaphore, #tpu.memory_space<semaphore_mem>> -> memref<!tpu.dma_semaphore, #tpu.memory_space<semaphore_mem>>
    tpu.wait_dma2 semaphore(%211 : memref<!tpu.dma_semaphore, #tpu.memory_space<semaphore_mem>>) src(%arg7 : memref<128x512xf32, #tpu.memory_space<any>>) dst(%arg14 : memref<128x512xf32, #tpu.memory_space<vmem>>)
    %c0_110 = arith.constant 0 : index
    %c0_111 = arith.constant 0 : index
    %212 = vector.load %arg14[%c0_110, %c0_111] : memref<128x512xf32, #tpu.memory_space<vmem>>, vector<128x512xf32>
    %cst_112 = arith.constant dense<0.000000e+00> : vector<16x512xf32>
    %213 = tpu.matmul %209, %212, %cst_112 {dimension_numbers = #tpu.dot_dimension_numbers<[1], [0], [0], [1], [0, 0, 1, 1], [], []>} : vector<16x128xf32>, vector<128x512xf32>, vector<16x512xf32> -> vector<16x512xf32>
    %c0_113 = arith.constant 0 : index
    %c0_114 = arith.constant 0 : index
    %214 = vector.load %arg3[%c0_113, %c0_114] : memref<1x512xf32, #tpu.memory_space<vmem>>, vector<1x512xf32>
    %215 = vector.broadcast %214 : vector<1x512xf32> to vector<16x512xf32>
    %216 = arith.addf %213, %215 : vector<16x512xf32>
    %cst_115 = arith.constant 0.000000e+00 : f32
    %217 = vector.broadcast %cst_115 : f32 to vector<16x512xf32>
    %218 = arith.maximumf %216, %217 : vector<16x512xf32>
    %c1_i32_116 = arith.constant 1 : i32
    %219 = tpu.memref_slice %arg16[%c1_i32_116] : memref<2x!tpu.dma_semaphore, #tpu.memory_space<semaphore_mem>> -> memref<1x!tpu.dma_semaphore, #tpu.memory_space<semaphore_mem>>
    %220 = tpu.memref_squeeze %219 : memref<1x!tpu.dma_semaphore, #tpu.memory_space<semaphore_mem>> -> memref<!tpu.dma_semaphore, #tpu.memory_space<semaphore_mem>>
    tpu.wait_dma2 semaphore(%220 : memref<!tpu.dma_semaphore, #tpu.memory_space<semaphore_mem>>) src(%arg8 : memref<512x128xf32, #tpu.memory_space<any>>) dst(%arg15 : memref<512x128xf32, #tpu.memory_space<vmem>>)
    %c0_117 = arith.constant 0 : index
    %c0_118 = arith.constant 0 : index
    %221 = vector.load %arg15[%c0_117, %c0_118] : memref<512x128xf32, #tpu.memory_space<vmem>>, vector<512x128xf32>
    %cst_119 = arith.constant dense<0.000000e+00> : vector<16x128xf32>
    %222 = tpu.matmul %218, %221, %cst_119 {dimension_numbers = #tpu.dot_dimension_numbers<[1], [0], [0], [1], [0, 0, 1, 1], [], []>} : vector<16x512xf32>, vector<512x128xf32>, vector<16x128xf32> -> vector<16x128xf32>
    %223 = vector.broadcast %16 : vector<1x128xf32> to vector<16x128xf32>
    %224 = arith.addf %222, %223 : vector<16x128xf32>
    %225 = arith.addf %209, %224 : vector<16x128xf32>
    %cst_120 = arith.constant dense<0.000000e+00> : vector<16xf32>
    %226 = vector.multi_reduction <add>, %225, %cst_120 [1] : vector<16x128xf32> to vector<16xf32>
    %227 = vector.shape_cast %226 : vector<16xf32> to vector<16x1xf32>
    %cst_121 = arith.constant 1.280000e+02 : f32
    %228 = vector.broadcast %cst_121 : f32 to vector<16x1xf32>
    %229 = arith.divf %227, %228 : vector<16x1xf32>
    %230 = vector.broadcast %229 : vector<16x1xf32> to vector<16x128xf32>
    %231 = arith.subf %225, %230 : vector<16x128xf32>
    %232 = arith.mulf %231, %231 : vector<16x128xf32>
    %cst_122 = arith.constant dense<0.000000e+00> : vector<16xf32>
    %233 = vector.multi_reduction <add>, %232, %cst_122 [1] : vector<16x128xf32> to vector<16xf32>
    %234 = vector.shape_cast %233 : vector<16xf32> to vector<16x1xf32>
    %cst_123 = arith.constant 1.280000e+02 : f32
    %235 = vector.broadcast %cst_123 : f32 to vector<16x1xf32>
    %236 = arith.divf %234, %235 : vector<16x1xf32>
    %237 = vector.broadcast %229 : vector<16x1xf32> to vector<16x128xf32>
    %238 = arith.subf %225, %237 : vector<16x128xf32>
    %cst_124 = arith.constant 9.99999974E-6 : f32
    %239 = vector.broadcast %cst_124 : f32 to vector<16x1xf32>
    %240 = arith.addf %236, %239 : vector<16x1xf32>
    %241 = math.rsqrt %240 : vector<16x1xf32>
    %242 = vector.broadcast %241 : vector<16x1xf32> to vector<16x128xf32>
    %243 = arith.mulf %238, %242 : vector<16x128xf32>
    %244 = vector.broadcast %14 : vector<1x128xf32> to vector<16x128xf32>
    %245 = arith.mulf %243, %244 : vector<16x128xf32>
    %246 = vector.broadcast %15 : vector<1x128xf32> to vector<16x128xf32>
    %247 = arith.addf %245, %246 : vector<16x128xf32>
    %248 = vector.shape_cast %247 : vector<16x128xf32> to vector<2x8x128xf32>
    %c0_125 = arith.constant 0 : index
    %c0_126 = arith.constant 0 : index
    %c0_127 = arith.constant 0 : index
    %249 = vector.load %arg9[%c0_125, %c0_126, %c0_127] : memref<2x8x128xf32, #tpu.memory_space<vmem>>, vector<2x8x128xf32>
    tpu.vector_store %arg9[%c0_125, %c0_126, %c0_127], %248 {strides = array<i32>} : memref<2x8x128xf32, #tpu.memory_space<vmem>>, vector<2x8x128xf32>,
    return
  }
}

</mosaic_0001>

<bundles_post_ra>
// kernel: simple_compressor.1
= control target key start
LH: loop header
LB: loop body
LE: loop exit
PB: predicated region body
PF: predicated region fallthrough
CT: control target
= control target key end

     0   :  { %14 = vsyncpa [#allocation10], 0  ;;  %s6293_s0 = inlined_call_operand.vmem [shape: f32[2,16,128], index: 0, kind: input, shape index: {}]   ;;  %s6294_s1 = inlined_call_operand.vmem [shape: f32[8,128], index: 1, kind: input, shape index: {}]   ;;  %s6295_s2 = inlined_call_operand.vmem [shape: f32[16,128], index: 2, kind: input, shape index: {}]   ;;  %s6296_s3 = inlined_call_operand.vmem [shape: f32[1,512], index: 3, kind: input, shape index: {}]   ;;  %s6297_s4 = inlined_call_operand.hbm [shape: f32[128,128], index: 4, kind: input, shape index: {}]   ;;  %s6298_s5 = inlined_call_operand.vmem [shape: f32[128,256], index: 5, kind: input, shape index: {}]   ;;  %s6299_s6 = inlined_call_operand.hbm [shape: f32[128,128], index: 6, kind: input, shape index: {}]   ;;  %s6300_s7 = inlined_call_operand.vmem [shape: f32[128,512], index: 7, kind: input, shape index: {}]   ;;  %s6301_s8 = inlined_call_operand.hbm [shape: f32[512,128], index: 8, kind: input, shape index: {}]   ;;  %s6302_s9 = inlined_call_operand.hbm [shape: f32[2,8,128], index: 9, kind: output, shape index: {}]  }
   0x1   :  { %15 = vsyncpa [#allocation13], 0 }
   0x2   :  { %16 = vsyncpa [#allocation11], 0  ;;  %s4996_s30 = smov [#allocation9]  }
   0x3   :  { %s30_s10 = sshll.u32 %s4996_s30, 4  ;;  %s31_s10 = int_to_ptr.vmem [resolvable:$true] %s30_s10 }
   0x4   :  { %s4914_s11 = scalar_lea.vmem %s31_s10, 2048  ;;  %p4919_p1 = scmp.lt.s32.totalorder %s31_s10, %s31_s10 }
   0x5   :  { %p4915_p0 = scmp.ne.s32.totalorder %s31_s10, %s4914_s11  ;;  %p4920_p2 = scmp.lt.s32.totalorder %s4914_s11, %s4914_s11 }
   0x7   :  { %p4921_p3 = por %p4920_p2, %p4919_p1 }
   0x9   :  { %p4922_p4 = pnand %p4921_p3, %p4915_p0 }
   0xb   :  { %4925 = shalt.err (!%p4922_p4)
}
   0xc   :  { %s4997_s12 = smov 128   ;;  %s4998_s13 = smov 8  }
   0xd   :  { %36 = dma.hbm_to_vmem [thread:$0]  %s6297_s4, 2048, %s31_s10, [#allocation10], %s4997_s12, %s4997_s12, %s4998_s13  }
   0xe   :  { %s4999_s16 = smov [#allocation12]  }
   0xf   :  { %s44_s17 = sshll.u32 %s4999_s16, 4  ;;  %s45_s17 = int_to_ptr.vmem [resolvable:$true] %s44_s17 }
  0x10   :  { %s4934_s18 = scalar_lea.vmem %s45_s17, 2048  ;;  %p4939_p6 = scmp.lt.s32.totalorder %s45_s17, %s45_s17 }
  0x11   :  { %p4935_p5 = scmp.ne.s32.totalorder %s45_s17, %s4934_s18  ;;  %p4940_p7 = scmp.lt.s32.totalorder %s4934_s18, %s4934_s18 }
  0x13   :  { %p4941_p8 = por %p4940_p7, %p4939_p6 }
  0x15   :  { %p4942_p9 = pnand %p4941_p8, %p4935_p5 }
  0x17   :  { %4945 = shalt.err (!%p4942_p9)
}
  0x18   :  { %50 = dma.hbm_to_vmem [thread:$0]  %s6299_s6, 2048, %s45_s17, [#allocation13], %s4997_s12, %s4997_s12, %s4998_s13  }
  0x19   :  { %4986 = dma.done.wait [#allocation10], 2048  }
  0x1a   :  { %4987 = vsyncadd [#allocation10], 4294965248 }
  0x1b   :  { %4988 = dma.done.wait [#allocation13], 2048  }
  0x1c   :  { %4989 = vsyncadd [#allocation13], 4294965248  ;;  %v5077_v0 = vld [vmem:[%s6300_s7] sm:$0xff]  ;;  %v5082_v1 = vld [vmem:[%s6300_s7 + $0x8] sm:$0xff] }
  0x1d   :  { %6312 = vst [vmem:[#allocation25_spill] sm:$0xff] %v5077_v0  ;;  %6313 = vst [vmem:[#allocation26_spill] sm:$0xff] %v5082_v1  ;;  %v5087_v2 = vld [vmem:[%s6300_s7 + $0x10] sm:$0xff]  ;;  %v5092_v3 = vld [vmem:[%s6300_s7 + $0x18] sm:$0xff]  ;;  %v6303_v1 = vmov 0.0  }
  0x1e   :  { %6314 = vst [vmem:[#allocation27_spill] sm:$0xff] %v5087_v2  ;;  %6315 = vst [vmem:[#allocation28_spill] sm:$0xff] %v5092_v3  ;;  %v5097_v4 = vld [vmem:[%s6300_s7 + $0x20] sm:$0xff]  ;;  %v5102_v5 = vld [vmem:[%s6300_s7 + $0x28] sm:$0xff]  ;;  %4522 = vmatprep.subr.mxu0 %v6303_v1 }
  0x1f   :  { %6316 = vst [vmem:[#allocation29_spill] sm:$0xff] %v5097_v4  ;;  %6317 = vst [vmem:[#allocation30_spill] sm:$0xff] %v5102_v5  ;;  %v5107_v6 = vld [vmem:[%s6300_s7 + $0x30] sm:$0xff]  ;;  %v5112_v7 = vld [vmem:[%s6300_s7 + $0x38] sm:$0xff] }
  0x20   :  { %6318 = vst [vmem:[#allocation31_spill] sm:$0xff] %v5107_v6  ;;  %6319 = vst [vmem:[#allocation32_spill] sm:$0xff] %v5112_v7  ;;  %v5117_v8 = vld [vmem:[%s6300_s7 + $0x40] sm:$0xff]  ;;  %v5122_v9 = vld [vmem:[%s6300_s7 + $0x48] sm:$0xff] }
  0x21   :  { %6320 = vst [vmem:[#allocation33_spill] sm:$0xff] %v5117_v8  ;;  %6321 = vst [vmem:[#allocation34_spill] sm:$0xff] %v5122_v9  ;;  %v5127_v10 = vld [vmem:[%s6300_s7 + $0x50] sm:$0xff]  ;;  %v5132_v11 = vld [vmem:[%s6300_s7 + $0x58] sm:$0xff] }
  0x22   :  { %6322 = vst [vmem:[#allocation35_spill] sm:$0xff] %v5127_v10  ;;  %6323 = vst [vmem:[#allocation36_spill] sm:$0xff] %v5132_v11  ;;  %v5137_v12 = vld [vmem:[%s6300_s7 + $0x60] sm:$0xff]  ;;  %v5142_v13 = vld [vmem:[%s6300_s7 + $0x68] sm:$0xff] }
  0x23   :  { %6324 = vst [vmem:[#allocation37_spill] sm:$0xff] %v5137_v12  ;;  %6325 = vst [vmem:[#allocation38_spill] sm:$0xff] %v5142_v13  ;;  %v5147_v14 = vld [vmem:[%s6300_s7 + $0x70] sm:$0xff]  ;;  %v5152_v15 = vld [vmem:[%s6300_s7 + $0x78] sm:$0xff] }
  0x24   :  { %6326 = vst [vmem:[#allocation39_spill] sm:$0xff] %v5147_v14  ;;  %6327 = vst [vmem:[#allocation40_spill] sm:$0xff] %v5152_v15  ;;  %v5157_v16 = vld [vmem:[%s6300_s7 + $0x80] sm:$0xff]  ;;  %v5162_v17 = vld [vmem:[%s6300_s7 + $0x88] sm:$0xff] }
  0x25   :  { %6328 = vst [vmem:[#allocation41_spill] sm:$0xff] %v5157_v16  ;;  %6329 = vst [vmem:[#allocation42_spill] sm:$0xff] %v5162_v17  ;;  %v5167_v18 = vld [vmem:[%s6300_s7 + $0x90] sm:$0xff]  ;;  %v5172_v19 = vld [vmem:[%s6300_s7 + $0x98] sm:$0xff] }
  0x26   :  { %6330 = vst [vmem:[#allocation43_spill] sm:$0xff] %v5167_v18  ;;  %6331 = vst [vmem:[#allocation44_spill] sm:$0xff] %v5172_v19  ;;  %v5177_v20 = vld [vmem:[%s6300_s7 + $0xa0] sm:$0xff]  ;;  %v5182_v21 = vld [vmem:[%s6300_s7 + $0xa8] sm:$0xff] }
  0x27   :  { %6332 = vst [vmem:[#allocation45_spill] sm:$0xff] %v5177_v20  ;;  %6333 = vst [vmem:[#allocation46_spill] sm:$0xff] %v5182_v21  ;;  %v5187_v22 = vld [vmem:[%s6300_s7 + $0xb0] sm:$0xff]  ;;  %v5192_v23 = vld [vmem:[%s6300_s7 + $0xb8] sm:$0xff] }
  0x28   :  { %6334 = vst [vmem:[#allocation47_spill] sm:$0xff] %v5187_v22  ;;  %6335 = vst [vmem:[#allocation48_spill] sm:$0xff] %v5192_v23  ;;  %v5197_v24 = vld [vmem:[%s6300_s7 + $0xc0] sm:$0xff]  ;;  %v5202_v25 = vld [vmem:[%s6300_s7 + $0xc8] sm:$0xff] }
  0x29   :  { %6336 = vst [vmem:[#allocation49_spill] sm:$0xff] %v5197_v24  ;;  %6337 = vst [vmem:[#allocation50_spill] sm:$0xff] %v5202_v25  ;;  %v5207_v26 = vld [vmem:[%s6300_s7 + $0xd0] sm:$0xff]  ;;  %v5212_v27 = vld [vmem:[%s6300_s7 + $0xd8] sm:$0xff] }
  0x2a   :  { %6338 = vst [vmem:[#allocation51_spill] sm:$0xff] %v5207_v26  ;;  %6339 = vst [vmem:[#allocation52_spill] sm:$0xff] %v5212_v27  ;;  %v5217_v28 = vld [vmem:[%s6300_s7 + $0xe0] sm:$0xff]  ;;  %v5222_v29 = vld [vmem:[%s6300_s7 + $0xe8] sm:$0xff] }
  0x2b   :  { %6340 = vst [vmem:[#allocation53_spill] sm:$0xff] %v5217_v28  ;;  %6341 = vst [vmem:[#allocation54_spill] sm:$0xff] %v5222_v29  ;;  %v5227_v30 = vld [vmem:[%s6300_s7 + $0xf0] sm:$0xff]  ;;  %v5232_v31 = vld [vmem:[%s6300_s7 + $0xf8] sm:$0xff] }
  0x2c   :  { %6342 = vst [vmem:[#allocation55_spill] sm:$0xff] %v5227_v30  ;;  %6343 = vst [vmem:[#allocation56_spill] sm:$0xff] %v5232_v31  ;;  %v5237_v32 = vld [vmem:[%s6300_s7 + $0x100] sm:$0xff]  ;;  %v5242_v33 = vld [vmem:[%s6300_s7 + $0x108] sm:$0xff] }
  0x2d   :  { %v5247_v34 = vld [vmem:[%s6300_s7 + $0x110] sm:$0xff]  ;;  %v5252_v35 = vld [vmem:[%s6300_s7 + $0x118] sm:$0xff]  ;;  %v5257_v36 = vld [vmem:[%s6300_s7 + $0x120] sm:$0xff] }
  0x2e   :  { %6344 = vst [vmem:[#allocation57_spill] sm:$0xff] %v5247_v34  ;;  %v5262_v37 = vld [vmem:[%s6300_s7 + $0x128] sm:$0xff]  ;;  %v5267_v38 = vld [vmem:[%s6300_s7 + $0x130] sm:$0xff]  ;;  %v5272_v39 = vld [vmem:[%s6300_s7 + $0x138] sm:$0xff] }
  0x2f   :  { %v5277_v40 = vld [vmem:[%s6300_s7 + $0x140] sm:$0xff]  ;;  %v5282_v41 = vld [vmem:[%s6300_s7 + $0x148] sm:$0xff]  ;;  %v5287_v42 = vld [vmem:[%s6300_s7 + $0x150] sm:$0xff] }
  0x30   :  { %v5292_v43 = vld [vmem:[%s6300_s7 + $0x158] sm:$0xff]  ;;  %v5297_v44 = vld [vmem:[%s6300_s7 + $0x160] sm:$0xff]  ;;  %v5302_v45 = vld [vmem:[%s6300_s7 + $0x168] sm:$0xff] }
  0x31   :  { %v5307_v46 = vld [vmem:[%s6300_s7 + $0x170] sm:$0xff]  ;;  %v5312_v47 = vld [vmem:[%s6300_s7 + $0x178] sm:$0xff]  ;;  %v5317_v48 = vld [vmem:[%s6300_s7 + $0x180] sm:$0xff] }
  0x32   :  { %v5322_v49 = vld [vmem:[%s6300_s7 + $0x188] sm:$0xff]  ;;  %v5327_v50 = vld [vmem:[%s6300_s7 + $0x190] sm:$0xff]  ;;  %v5332_v51 = vld [vmem:[%s6300_s7 + $0x198] sm:$0xff] }
  0x33   :  { %v5337_v52 = vld [vmem:[%s6300_s7 + $0x1a0] sm:$0xff]  ;;  %v5342_v53 = vld [vmem:[%s6300_s7 + $0x1a8] sm:$0xff]  ;;  %v5347_v54 = vld [vmem:[%s6300_s7 + $0x1b0] sm:$0xff] }
  0x34   :  { %v5352_v55 = vld [vmem:[%s6300_s7 + $0x1b8] sm:$0xff]  ;;  %v5357_v56 = vld [vmem:[%s6300_s7 + $0x1c0] sm:$0xff]  ;;  %v5362_v57 = vld [vmem:[%s6300_s7 + $0x1c8] sm:$0xff] }
  0x35   :  { %v5367_v58 = vld [vmem:[%s6300_s7 + $0x1d0] sm:$0xff]  ;;  %v5372_v59 = vld [vmem:[%s6300_s7 + $0x1d8] sm:$0xff]  ;;  %v5377_v60 = vld [vmem:[%s6300_s7 + $0x1e0] sm:$0xff] }
  0x36   :  { %v5382_v61 = vld [vmem:[%s6300_s7 + $0x1e8] sm:$0xff]  ;;  %v5387_v62 = vld [vmem:[%s6300_s7 + $0x1f0] sm:$0xff]  ;;  %v5392_v63 = vld [vmem:[%s6300_s7 + $0x1f8] sm:$0xff] }
  0x37   :  { %v366_v2 = vld [vmem:[%s6298_s5 + $0xf8] sm:$0xff]  ;;  %v260_v0 = vld [vmem:[#allocation9 + $0x78] sm:$0xff]  ;;  %v365_v3 = vld [vmem:[%s6298_s5 + $0xf0] sm:$0xff] }
  0x38   :  { %367 = vmatprep.subr.mxu1 %v366_v2  ;;  %v364_v6 = vld [vmem:[%s6298_s5 + $0xe8] sm:$0xff]  ;;  %v259_v4 = vld [vmem:[#allocation9 + $0x70] sm:$0xff]  ;;  %4523 = vmatpush3.msra.mxu0 %v260_v0  ;;  %v362_v5 = vld [vmem:[%s6298_s5 + $0xd8] sm:$0xff] }
  0x39   :  { %v363_v7 = vld [vmem:[%s6298_s5 + $0xe0] sm:$0xff]  ;;  %368 = vmatpush1.msra.mxu1 %v365_v3  ;;  %4524 = vmatprep.subr.mxu0 %v6303_v1  ;;  %v258_v10 = vld [vmem:[#allocation9 + $0x68] sm:$0xff]  ;;  %v361_v2 = vld [vmem:[%s6298_s5 + $0xd0] sm:$0xff] }
  0x3a   :  { %369 = vmatprep.subr.mxu1 %v364_v6  ;;  %4525 = vmatpush3.msra.mxu0 %v259_v4  ;;  %v360_v8 = vld [vmem:[%s6298_s5 + $0xc8] sm:$0xff]  ;;  %v257_v0 = vld [vmem:[#allocation9 + $0x60] sm:$0xff]  ;;  %v359_v3 = vld [vmem:[%s6298_s5 + $0xc0] sm:$0xff] }
  0x3b   :  { %370 = vmatpush1.msra.mxu1 %v363_v7  ;;  %4526 = vmatprep.subr.mxu0 %v6303_v1  ;;  %v358_v6 = vld [vmem:[%s6298_s5 + $0xb8] sm:$0xff]  ;;  %v256_v4 = vld [vmem:[#allocation9 + $0x58] sm:$0xff]  ;;  %v357_v7 = vld [vmem:[%s6298_s5 + $0xb0] sm:$0xff] }
  0x3c   :  { %371 = vmatprep.subr.mxu1 %v362_v5  ;;  %4527 = vmatpush3.msra.mxu0 %v258_v10  ;;  %v356_v5 = vld [vmem:[%s6298_s5 + $0xa8] sm:$0xff]  ;;  %v255_v10 = vld [vmem:[#allocation9 + $0x50] sm:$0xff] }
  0x3d   :  { %372 = vmatpush1.msra.mxu1 %v361_v2  ;;  %4528 = vmatprep.subr.mxu0 %v6303_v1  ;;  %v355_v2 = vld [vmem:[%s6298_s5 + $0xa0] sm:$0xff] }
  0x3e   :  { %373 = vmatprep.subr.mxu1 %v360_v8  ;;  %4529 = vmatpush3.msra.mxu0 %v257_v0  ;;  %v354_v8 = vld [vmem:[%s6298_s5 + $0x98] sm:$0xff] }
  0x3f   :  { %374 = vmatpush1.msra.mxu1 %v359_v3  ;;  %4530 = vmatprep.subr.mxu0 %v6303_v1  ;;  %v254_v0 = vld [vmem:[#allocation9 + $0x48] sm:$0xff]  ;;  %v353_v3 = vld [vmem:[%s6298_s5 + $0x90] sm:$0xff] }
  0x40   :  { %375 = vmatprep.subr.mxu1 %v358_v6  ;;  %4531 = vmatpush3.msra.mxu0 %v256_v4  ;;  %v352_v6 = vld [vmem:[%s6298_s5 + $0x88] sm:$0xff]  ;;  %v253_v4 = vld [vmem:[#allocation9 + $0x40] sm:$0xff] }
  0x41   :  { %376 = vmatpush1.msra.mxu1 %v357_v7  ;;  %4532 = vmatprep.subr.mxu0 %v6303_v1  ;;  %v351_v7 = vld [vmem:[%s6298_s5 + $0x80] sm:$0xff] }
  0x42   :  { %377 = vmatprep.subr.mxu1 %v356_v5  ;;  %4533 = vmatpush3.msra.mxu0 %v255_v10  ;;  %v350_v5 = vld [vmem:[%s6298_s5 + $0x78] sm:$0xff]  ;;  %v252_v10 = vld [vmem:[#allocation9 + $0x38] sm:$0xff] }
  0x43   :  { %378 = vmatpush1.msra.mxu1 %v355_v2  ;;  %4534 = vmatprep.subr.mxu0 %v6303_v1  ;;  %v349_v2 = vld [vmem:[%s6298_s5 + $0x70] sm:$0xff] }
  0x44   :  { %379 = vmatprep.subr.mxu1 %v354_v8  ;;  %4535 = vmatpush3.msra.mxu0 %v254_v0  ;;  %v348_v8 = vld [vmem:[%s6298_s5 + $0x68] sm:$0xff]  ;;  %v251_v0 = vld [vmem:[#allocation9 + $0x30] sm:$0xff] }
  0x45   :  { %380 = vmatpush1.msra.mxu1 %v353_v3  ;;  %4536 = vmatprep.subr.mxu0 %v6303_v1  ;;  %v347_v3 = vld [vmem:[%s6298_s5 + $0x60] sm:$0xff] }
  0x46   :  { %381 = vmatprep.subr.mxu1 %v352_v6  ;;  %4537 = vmatpush3.msra.mxu0 %v253_v4  ;;  %v346_v6 = vld [vmem:[%s6298_s5 + $0x58] sm:$0xff] }
  0x47   :  { %382 = vmatpush1.msra.mxu1 %v351_v7  ;;  %4538 = vmatprep.subr.mxu0 %v6303_v1 }
  0x48   :  { %383 = vmatprep.subr.mxu1 %v350_v5  ;;  %4539 = vmatpush3.msra.mxu0 %v252_v10 }
  0x49   :  { %384 = vmatpush1.msra.mxu1 %v349_v2 }
  0x4a   :  { %225 = vsyncadd [#allocation8], 8192  ;;  %4540 = vmatprep.subr.mxu0 %v6303_v1  ;;  %385 = vmatprep.subr.mxu1 %v348_v8  ;;  %v250_v4 = vld [vmem:[#allocation9 + $0x28] sm:$0xff]  ;;  %v345_v7 = vld [vmem:[%s6298_s5 + $0x50] sm:$0xff]  ;;  %vm5001_vm0 = vmmov 0   ;;  %vm472_vm1 = vcmask 130048  }
  0x4b   :  { %4541 = vmatpush3.msra.mxu0 %v251_v0  ;;  %386 = vmatpush1.msra.mxu1 %v347_v3  ;;  %v344_v5 = vld [vmem:[%s6298_s5 + $0x48] sm:$0xff]  ;;  %v249_v10 = vld [vmem:[#allocation9 + $0x20] sm:$0xff]  ;;  %v343_v2 = vld [vmem:[%s6298_s5 + $0x40] sm:$0xff]  ;;  %s5003_s29 = smov 96   ;;  %s5004_s30 = smov 80   ;;  %vm3496_vm2 = vcmask 261248  }
  0x4c   :  { %4542 = vmatprep.subr.mxu0 %v6303_v1  ;;  %387 = vmatprep.subr.mxu1 %v346_v6  ;;  %v342_v8 = vld [vmem:[%s6298_s5 + $0x38] sm:$0xff]  ;;  %v248_v0 = vld [vmem:[#allocation9 + $0x18] sm:$0xff]  ;;  %v341_v3 = vld [vmem:[%s6298_s5 + $0x30] sm:$0xff]  ;;  %s5005_s10 = smov 64   ;;  %s5006_s11 = smov 48   ;;  %vm3507_vm3 = vcmask 392448  }
  0x4d   :  { %4543 = vmatpush3.msra.mxu0 %v250_v4  ;;  %388 = vmatpush1.msra.mxu1 %v345_v7  ;;  %v340_v6 = vld [vmem:[%s6298_s5 + $0x28] sm:$0xff]  ;;  %v247_v4 = vld [vmem:[#allocation9 + $0x10] sm:$0xff]  ;;  %s5007_s14 = smov 32   ;;  %s5008_s15 = smov 16   ;;  %vm3518_vm4 = vcmask 523648   ;;  %vm3529_vm5 = vcmask 654848  }
  0x4e   :  { %4544 = vmatprep.subr.mxu0 %v6303_v1  ;;  %389 = vmatprep.subr.mxu1 %v344_v5  ;;  %v339_v7 = vld [vmem:[%s6298_s5 + $0x20] sm:$0xff]  ;;  %v338_v5 = vld [vmem:[%s6298_s5 + $0x18] sm:$0xff]  ;;  %vm3540_vm6 = vcmask 786048   ;;  %vm3551_vm7 = vcmask 917248   ;;  %vm3562_vm8 = vcmask 1048448  }
  0x4f   :  { %4545 = vmatpush3.msra.mxu0 %v249_v10  ;;  %390 = vmatpush1.msra.mxu1 %v343_v2  ;;  %v246_v10 = vld [vmem:[#allocation9 + $0x8] sm:$0xff]  ;;  %v337_v2 = vld [vmem:[%s6298_s5 + $0x10] sm:$0xff] }
  0x50   :  { %4546 = vmatprep.subr.mxu0 %v6303_v1  ;;  %391 = vmatprep.subr.mxu1 %v342_v8  ;;  %v336_v8 = vld [vmem:[%s6298_s5 + $0x8] sm:$0xff] }
  0x51   :  { %4547 = vmatpush3.msra.mxu0 %v248_v0  ;;  %392 = vmatpush1.msra.mxu1 %v341_v3  ;;  %v245_v0 = vld [vmem:[#allocation9] sm:$0xff]  ;;  %v335_v3 = vld [vmem:[%s6298_s5] sm:$0xff] }
  0x52   :  { %4548 = vmatprep.subr.mxu0 %v6303_v1  ;;  %393 = vmatprep.subr.mxu1 %v340_v6  ;;  %v242_v6 = vld [vmem:[%s6294_s1] sm:$0xff] }
  0x53   :  { %4549 = vmatpush3.msra.mxu0 %v247_v4  ;;  %394 = vmatpush1.msra.mxu1 %v339_v7  ;;  %v238_v4 = vld [vmem:[%s6293_s0] sm:$0xff]  ;;  %v239_v7 = vld [vmem:[%s6293_s0 + $0x8] sm:$0xff] }
  0x54   :  { %4550 = vmatprep.subr.mxu0 %v6303_v1  ;;  %395 = vmatprep.subr.mxu1 %v338_v5  ;;  %v240_v5 = vld [vmem:[%s6293_s0 + $0x10] sm:$0xff] }
  0x55   :  { %4551 = vmatpush3.msra.mxu0 %v246_v10  ;;  %396 = vmatpush1.msra.mxu1 %v337_v2  ;;  %v241_v10 = vld [vmem:[%s6293_s0 + $0x18] sm:$0xff]  ;;  %v261_v2 = vlaneseq  ;;  %s5002_s0 = smov 112  }
  0x56   :  { %4552 = vmatprep.subr.mxu0 %v6303_v1  ;;  %397 = vmatprep.subr.mxu1 %v336_v8 }
  0x57   :  { %4553 = vmatpush3.msra.mxu0 %v245_v0  ;;  %4554 = vmatprep.mubr.msk.f32.mxu0 %vm5001_vm0, %v6303_v1  ;;  %v5533_v8 = vshrl.u32 %v261_v2, 7 }
  0x58   :  { %398 = vmatpush1.msra.mxu1 %v335_v3  ;;  %431 = vmatprep.mubr.f32.mxu1 %v6303_v1 }
  0x59   :  { %4555 = vmatmul.mubr.f32.vlgmr.msra.gmra.mxu0 %v242_v6  ;;  %432 = vmatmul.mubr.f32.vlgmr.msra.gmra.mxu1 %v238_v4  ;;  %v5536_v0 = vsub.s32 0, %v5533_v8  ;;  %v6305_v3 = vsub.s32 1, %v5533_v8  ;;  %v5542_v6 = vld [vmem:[%s6295_s2] sm:$0xff]  ;;  %v6306_v4 = vsub.s32 2, %v5533_v8 }
  0x5a   :  { %437 = vmatprep.mubr.f32.mxu1 %v6303_v1  ;;  %4557 = vmatprep.subr.mxu1 %v6303_v1  ;;  %6346 = vst [vmem:[#allocation59_spill] sm:$0xff] %v5542_v6 }
  0x5b   :  { %4578 = vmatprep.subr.mxu0 %v6303_v1  ;;  %4582 = vmatprep.mubr.msk.f32.mxu0 %vm5001_vm0, %v6303_v1  ;;  %6345 = vst [vmem:[#allocation58_spill] sm:$0xff] %v5536_v0 }
  0x5d   :  { %438 = vmatmul.mubr.f32.gmra.mxu1 %v239_v7  ;;  %v264_v7 = vrot.slane %v5542_v6, %v5536_v0 }
  0x5e   :  { %443 = vmatprep.mubr.f32.mxu1 %v6303_v1 }
  0x61   :  { %444 = vmatmul.mubr.f32.gmra.mxu1 %v240_v5  ;;  %v459_v5 = vrot.slane %v5542_v6, %v6305_v3 }
  0x62   :  { %449 = vmatprep.mubr.f32.mxu1 %v6303_v1 }
  0x65   :  { %450 = vmatmul.mubr.f32.gmra.mxu1 %v241_v10  ;;  %v467_v10 = vrot.slane %v5542_v6, %v6306_v4 }
  0x66   :  { %4561 = vmatprep.mubr.msk.f32.mxu1 %vm5001_vm0, %v6303_v1 }
 0x119   :  { %v331_v2 = vpop.f32.mrf.mxu0  ;;  %v433_v1 = vpop.f32.mrf.mxu1 }
 0x11a   :  { %v5553_v11 = vadd.f32 %v331_v2, %v264_v7  ;;  %v5555_v9 = vadd.f32 %v459_v5, %v433_v1 }
 0x11b   :  { %v435_v14 = vpop.f32.mrf.mxu1  ;;  %v4556_v12 = vpop.f32.mrf.mxu0 }
 0x11c   :  { %473 = vst.msk [vmem:[#allocation2] sm:$0xff] %vm472_vm1, %v5553_v11  ;;  %474 = vst.msk [vmem:[#allocation3] sm:$0xff] %vm472_vm1, %v5555_v9  ;;  %v5561_v3 = vadd.f32 %v467_v10, %v435_v14  ;;  %483 = vrot.lane.b32.xlu0 %v5553_v11, %s5002_s0  ;;  %492 = vrot.lane.b32.xlu1 %v5555_v9, %s5002_s0 }
 0x11d   :  { %v439_v7 = vpop.f32.mrf.mxu1 }
 0x11e   :  { %478 = vst.msk [vmem:[#allocation4] sm:$0xff] %vm472_vm1, %v5561_v3  ;;  %v5569_v1 = vadd.f32 %v459_v5, %v439_v7 }
 0x11f   :  { %v441_v12 = vpop.f32.mrf.mxu1 }
 0x120   :  { %475 = vst.msk [vmem:[#allocation3 + $0x8] sm:$0xff] %vm472_vm1, %v5569_v1  ;;  %v5573_v2 = vadd.f32 %v467_v10, %v441_v12  ;;  %535 = vrot.lane.b32.xlu1 %v5555_v9, %s5003_s29  ;;  %494 = vrot.lane.b32.xlu0 %v5569_v1, %s5002_s0 }
 0x121   :  { %v445_v14 = vpop.f32.mrf.mxu1 }
 0x122   :  { %479 = vst.msk [vmem:[#allocation4 + $0x8] sm:$0xff] %vm472_vm1, %v5573_v2  ;;  %v462_v4 = vadd.f32 %v459_v5, %v445_v14 }
 0x123   :  { %v447_v7 = vpop.f32.mrf.mxu1  ;;  %v772_v16 = vld [vmem:[#allocation3] sm:$0xff] }
 0x124   :  { %476 = vst.msk [vmem:[#allocation3 + $0x10] sm:$0xff] %vm472_vm1, %v462_v4  ;;  %v5582_v6 = vadd.f32 %v467_v10, %v447_v7  ;;  %530 = vrot.lane.b32.xlu1 %v5553_v11, %s5003_s29  ;;  %539 = vrot.lane.b32.xlu0 %v462_v4, %s5003_s29  ;;  %v6347_v7 = vmov 0.0  }
 0x125   :  { %v451_v12 = vpop.f32.mrf.mxu1 }
 0x126   :  { %480 = vst.msk [vmem:[#allocation4 + $0x10] sm:$0xff] %vm472_vm1, %v5582_v6  ;;  %v463_v15 = vadd.f32 %v459_v5, %v451_v12 }
 0x127   :  { %v773_v13 = vld [vmem:[#allocation3 + $0x8] sm:$0xff]  ;;  %v453_v18 = vpop.f32.mrf.mxu1 }
 0x128   :  { %477 = vst.msk [vmem:[#allocation3 + $0x18] sm:$0xff] %vm472_vm1, %v463_v15  ;;  %537 = vrot.lane.b32.xlu1 %v5569_v1, %s5003_s29  ;;  %4558 = vmatpush3.xpose.msk.msra.mxu1 %vm472_vm1, %v773_v13  ;;  %v5593_v14 = vadd.f32 %v467_v10, %v453_v18  ;;  %v764_v13 = vld [vmem:[#allocation2] sm:$0xff] }
 0x129   :  { %498 = vrot.lane.b32.xlu0 %v463_v15, %s5002_s0  ;;  %4559 = vmatprep.subr.mxu1 %v6347_v7 }
 0x12a   :  { %481 = vst.msk [vmem:[#allocation4 + $0x18] sm:$0xff] %vm472_vm1, %v5593_v14 }
 0x12c   :  { %4560 = vmatpush3.xpose.msk.msra.mxu1 %vm472_vm1, %v772_v16  ;;  %496 = vrot.lane.b32.xlu1 %v462_v4, %s5002_s0  ;;  %v774_v16 = vld [vmem:[#allocation3 + $0x10] sm:$0xff] }
 0x12d   :  { %576 = vrot.lane.b32.xlu0 %v5569_v1, %s5004_s30  ;;  %4564 = vmatprep.subr.mxu1 %v6347_v7 }
 0x12f   :  { %4562 = vmatmul.mubr.msk.f32.vlgmr.msra.gmra.mxu1 %vm472_vm1, %v764_v13  ;;  %v775_v18 = vld [vmem:[#allocation3 + $0x18] sm:$0xff] }
 0x130   :  { %578 = vrot.lane.b32.xlu1 %v462_v4, %s5004_s30  ;;  %4565 = vmatpush3.xpose.msk.msra.mxu1 %vm472_vm1, %v775_v18 }
 0x131   :  { %541 = vrot.lane.b32.xlu0 %v463_v15, %s5003_s29  ;;  %4566 = vmatprep.subr.mxu1 %v6347_v7 }
 0x132   :  { %4568 = vmatprep.mubr.msk.f32.mxu1 %vm5001_vm0, %v6347_v7 }
 0x134   :  { %615 = vrot.lane.b32.xlu1 %v5569_v1, %s5005_s10  ;;  %4567 = vmatpush3.xpose.msk.msra.mxu1 %vm472_vm1, %v774_v16 }
 0x135   :  { %574 = vrot.lane.b32.xlu0 %v5555_v9, %s5004_s30  ;;  %4571 = vmatprep.subr.mxu1 %v6347_v7 }
 0x137   :  { %4569 = vmatmul.mubr.msk.f32.vlgmr.msra.gmra.mxu1 %vm472_vm1, %v764_v13 }
 0x138   :  { %580 = vrot.lane.b32.xlu1 %v463_v15, %s5004_s30  ;;  %4575 = vmatprep.mubr.msk.f32.mxu1 %vm5001_vm0, %v6347_v7 }
 0x139   :  { %569 = vrot.lane.b32.xlu0 %v5553_v11, %s5004_s30 }
 0x13c   :  { %613 = vrot.lane.b32.xlu1 %v5555_v9, %s5005_s10 }
 0x13d   :  { %617 = vrot.lane.b32.xlu0 %v462_v4, %s5005_s10 }
 0x140   :  { %608 = vrot.lane.b32.xlu1 %v5553_v11, %s5005_s10 }
 0x141   :  { %619 = vrot.lane.b32.xlu0 %v463_v15, %s5005_s10 }
 0x144   :  { %656 = vrot.lane.b32.xlu1 %v462_v4, %s5006_s11 }
 0x145   :  { %654 = vrot.lane.b32.xlu0 %v5569_v1, %s5006_s11 }
 0x148   :  { %658 = vrot.lane.b32.xlu1 %v463_v15, %s5006_s11 }
 0x149   :  { %652 = vrot.lane.b32.xlu0 %v5555_v9, %s5006_s11 }
 0x14c   :  { %693 = vrot.lane.b32.xlu1 %v5569_v1, %s5007_s14 }
 0x14d   :  { %647 = vrot.lane.b32.xlu0 %v5553_v11, %s5006_s11 }
 0x150   :  { %691 = vrot.lane.b32.xlu1 %v5555_v9, %s5007_s14 }
 0x151   :  { %697 = vrot.lane.b32.xlu0 %v463_v15, %s5007_s14 }
 0x154   :  { %686 = vrot.lane.b32.xlu1 %v5553_v11, %s5007_s14 }
 0x155   :  { %695 = vrot.lane.b32.xlu0 %v462_v4, %s5007_s14 }
 0x158   :  { %736 = vrot.lane.b32.xlu1 %v463_v15, %s5008_s15 }
 0x159   :  { %732 = vrot.lane.b32.xlu0 %v5569_v1, %s5008_s15 }
 0x15c   :  { %734 = vrot.lane.b32.xlu1 %v462_v4, %s5008_s15 }
 0x15d   :  { %730 = vrot.lane.b32.xlu0 %v5555_v9, %s5008_s15 }
 0x160   :  { %515 = vrot.lane.b32.xlu1 %v5573_v2, %s5002_s0 }
 0x161   :  { %725 = vrot.lane.b32.xlu0 %v5553_v11, %s5008_s15 }
 0x164   :  { %513 = vrot.lane.b32.xlu1 %v5561_v3, %s5002_s0 }
 0x165   :  { %554 = vrot.lane.b32.xlu0 %v5573_v2, %s5003_s29 }
 0x168   :  { %517 = vrot.lane.b32.xlu1 %v5582_v6, %s5002_s0 }
 0x169   :  { %552 = vrot.lane.b32.xlu0 %v5561_v3, %s5003_s29 }
 0x16c   :  { %556 = vrot.lane.b32.xlu1 %v5582_v6, %s5003_s29 }
 0x16d   :  { %593 = vrot.lane.b32.xlu0 %v5573_v2, %s5004_s30 }
 0x170   :  { %595 = vrot.lane.b32.xlu1 %v5582_v6, %s5004_s30 }
 0x171   :  { %591 = vrot.lane.b32.xlu0 %v5561_v3, %s5004_s30 }
 0x174   :  { %632 = vrot.lane.b32.xlu1 %v5573_v2, %s5005_s10 }
 0x175   :  { %634 = vrot.lane.b32.xlu0 %v5582_v6, %s5005_s10 }
 0x178   :  { %630 = vrot.lane.b32.xlu1 %v5561_v3, %s5005_s10 }
 0x179   :  { %673 = vrot.lane.b32.xlu0 %v5582_v6, %s5006_s11 }
 0x17c   :  { %671 = vrot.lane.b32.xlu1 %v5573_v2, %s5006_s11 }
 0x17d   :  { %712 = vrot.lane.b32.xlu0 %v5582_v6, %s5007_s14 }
 0x180   :  { %669 = vrot.lane.b32.xlu1 %v5561_v3, %s5006_s11 }
 0x181   :  { %519 = vrot.lane.b32.xlu0 %v5593_v14, %s5002_s0 }
 0x184   :  { %710 = vrot.lane.b32.xlu1 %v5573_v2, %s5007_s14 }
 0x185   :  { %636 = vrot.lane.b32.xlu0 %v5593_v14, %s5005_s10 }
 0x188   :  { %708 = vrot.lane.b32.xlu1 %v5561_v3, %s5007_s14 }
 0x189   :  { %675 = vrot.lane.b32.xlu0 %v5593_v14, %s5006_s11 }
 0x18c   :  { %558 = vrot.lane.b32.xlu1 %v5593_v14, %s5003_s29 }
 0x18d   :  { %714 = vrot.lane.b32.xlu0 %v5593_v14, %s5007_s14 }
 0x18e   :  { %v484_v9 = vpop.permute.xlu0 %483  ;;  %v493_v11 = vpop.permute.xlu1 %492 }
 0x18f   :  { %487 = vst.msk [vmem:[#allocation2 + $0x8] sm:$0xff] %vm472_vm1, %v484_v9  ;;  %505 = vst.msk [vmem:[#allocation3 + $0x20] sm:$0xff] %vm472_vm1, %v493_v11 }
 0x190   :  { %597 = vrot.lane.b32.xlu1 %v5593_v14, %s5004_s30 }
 0x192   :  { %v536_v15 = vpop.permute.xlu1 %535  ;;  %v495_v4 = vpop.permute.xlu0 %494 }
 0x193   :  { %548 = vst.msk [vmem:[#allocation3 + $0x40] sm:$0xff] %vm472_vm1, %v536_v15  ;;  %506 = vst.msk [vmem:[#allocation3 + $0x28] sm:$0xff] %vm472_vm1, %v495_v4 }
 0x196   :  { %v531_v5 = vpop.permute.xlu1 %530  ;;  %v540_v10 = vpop.permute.xlu0 %539  ;;  %v776_v16 = vld [vmem:[#allocation3 + $0x20] sm:$0xff]  ;;  %v765_v11 = vld [vmem:[#allocation2 + $0x8] sm:$0xff] }
 0x197   :  { %534 = vst.msk [vmem:[#allocation2 + $0x10] sm:$0xff] %vm472_vm1, %v531_v5  ;;  %550 = vst.msk [vmem:[#allocation3 + $0x50] sm:$0xff] %vm472_vm1, %v540_v10 }
 0x19a   :  { %v538_v1 = vpop.permute.xlu1 %537  ;;  %v777_v12 = vld [vmem:[#allocation3 + $0x28] sm:$0xff] }
 0x19b   :  { %549 = vst.msk [vmem:[#allocation3 + $0x48] sm:$0xff] %vm472_vm1, %v538_v1  ;;  %v499_v13 = vpop.permute.xlu0 %498  ;;  %4572 = vmatpush3.xpose.msk.msra.mxu1 %vm472_vm1, %v777_v12 }
 0x19c   :  { %508 = vst.msk [vmem:[#allocation3 + $0x38] sm:$0xff] %vm472_vm1, %v499_v13  ;;  %4573 = vmatprep.subr.mxu1 %v6347_v7  ;;  %v780_v13 = vld [vmem:[#allocation3 + $0x40] sm:$0xff] }
 0x19e   :  { %v497_v18 = vpop.permute.xlu1 %496 }
 0x19f   :  { %507 = vst.msk [vmem:[#allocation3 + $0x30] sm:$0xff] %vm472_vm1, %v497_v18  ;;  %v577_v9 = vpop.permute.xlu0 %576  ;;  %4574 = vmatpush3.xpose.msk.msra.mxu1 %vm472_vm1, %v776_v16  ;;  %v766_v16 = vld [vmem:[#allocation2 + $0x10] sm:$0xff] }
 0x1a0   :  { %588 = vst.msk [vmem:[#allocation3 + $0x68] sm:$0xff] %vm472_vm1, %v577_v9  ;;  %4585 = vmatprep.subr.mxu1 %v6347_v7 }
 0x1a2   :  { %v579_v15 = vpop.permute.xlu1 %578  ;;  %4576 = vmatmul.mubr.msk.f32.vlgmr.msra.gmra.mxu1 %vm472_vm1, %v765_v11  ;;  %v781_v4 = vld [vmem:[#allocation3 + $0x48] sm:$0xff] }
 0x1a3   :  { %589 = vst.msk [vmem:[#allocation3 + $0x70] sm:$0xff] %vm472_vm1, %v579_v15  ;;  %v542_v5 = vpop.permute.xlu0 %541  ;;  %v779_v10 = vld [vmem:[#allocation3 + $0x38] sm:$0xff]  ;;  %4586 = vmatpush3.xpose.msk.msra.mxu1 %vm472_vm1, %v781_v4  ;;  %4589 = vmatprep.mubr.msk.f32.mxu1 %vm5001_vm0, %v6347_v7 }
 0x1a4   :  { %551 = vst.msk [vmem:[#allocation3 + $0x58] sm:$0xff] %vm472_vm1, %v542_v5  ;;  %4579 = vmatpush3.xpose.msk.msra.mxu0 %vm472_vm1, %v779_v10  ;;  %4587 = vmatprep.subr.mxu1 %v6347_v7 }
 0x1a5   :  { %4580 = vmatprep.subr.mxu0 %v6347_v7 }
 0x1a6   :  { %v616_v1 = vpop.permute.xlu1 %615  ;;  %v778_v12 = vld [vmem:[#allocation3 + $0x30] sm:$0xff] }
 0x1a7   :  { %627 = vst.msk [vmem:[#allocation3 + $0x88] sm:$0xff] %vm472_vm1, %v616_v1  ;;  %v575_v18 = vpop.permute.xlu0 %574  ;;  %4588 = vmatpush3.xpose.msk.msra.mxu1 %vm472_vm1, %v780_v13  ;;  %v785_v15 = vld [vmem:[#allocation3 + $0x68] sm:$0xff]  ;;  %v782_v1 = vld [vmem:[#allocation3 + $0x50] sm:$0xff] }
 0x1a8   :  { %587 = vst.msk [vmem:[#allocation3 + $0x60] sm:$0xff] %vm472_vm1, %v575_v18  ;;  %4581 = vmatpush3.xpose.msk.msra.mxu0 %vm472_vm1, %v778_v12  ;;  %4599 = vmatprep.subr.mxu1 %v6347_v7 }
 0x1a9   :  { %4592 = vmatprep.subr.mxu0 %v6347_v7 }
 0x1aa   :  { %v581_v9 = vpop.permute.xlu1 %580  ;;  %4590 = vmatmul.mubr.msk.f32.vlgmr.msra.gmra.mxu1 %vm472_vm1, %v766_v16 }
 0x1ab   :  { %590 = vst.msk [vmem:[#allocation3 + $0x78] sm:$0xff] %vm472_vm1, %v581_v9  ;;  %4583 = vmatmul.mubr.msk.f32.vlgmr.msra.gmra.mxu0 %vm472_vm1, %v765_v11  ;;  %v570_v4 = vpop.permute.xlu0 %569  ;;  %v783_v5 = vld [vmem:[#allocation3 + $0x58] sm:$0xff]  ;;  %4600 = vmatpush3.xpose.msk.msra.mxu1 %vm472_vm1, %v785_v15 }
 0x1ac   :  { %573 = vst.msk [vmem:[#allocation2 + $0x18] sm:$0xff] %vm472_vm1, %v570_v4  ;;  %4593 = vmatpush3.xpose.msk.msra.mxu0 %vm472_vm1, %v783_v5  ;;  %4601 = vmatprep.subr.mxu1 %v6347_v7 }
 0x1ad   :  { %4594 = vmatprep.subr.mxu0 %v6347_v7  ;;  %4596 = vmatprep.mubr.msk.f32.mxu0 %vm5001_vm0, %v6347_v7 }
 0x1ae   :  { %v614_v10 = vpop.permute.xlu1 %613  ;;  %4603 = vmatprep.mubr.msk.f32.mxu1 %vm5001_vm0, %v6347_v7  ;;  %v789_v4 = vld [vmem:[#allocation3 + $0x88] sm:$0xff] }
 0x1af   :  { %626 = vst.msk [vmem:[#allocation3 + $0x80] sm:$0xff] %vm472_vm1, %v614_v10  ;;  %v618_v11 = vpop.permute.xlu0 %617  ;;  %v784_v12 = vld [vmem:[#allocation3 + $0x60] sm:$0xff] }
 0x1b0   :  { %628 = vst.msk [vmem:[#allocation3 + $0x90] sm:$0xff] %vm472_vm1, %v618_v11  ;;  %4595 = vmatpush3.xpose.msk.msra.mxu0 %vm472_vm1, %v782_v1  ;;  %4602 = vmatpush3.xpose.msk.msra.mxu1 %vm472_vm1, %v784_v12  ;;  %v786_v11 = vld [vmem:[#allocation3 + $0x70] sm:$0xff] }
 0x1b1   :  { %4606 = vmatprep.subr.mxu0 %v6347_v7  ;;  %4613 = vmatprep.subr.mxu1 %v6347_v7 }
 0x1b2   :  { %v609_v13 = vpop.permute.xlu1 %608  ;;  %v787_v18 = vld [vmem:[#allocation3 + $0x78] sm:$0xff] }
 0x1b3   :  { %612 = vst.msk [vmem:[#allocation2 + $0x20] sm:$0xff] %vm472_vm1, %v609_v13  ;;  %4597 = vmatmul.mubr.msk.f32.vlgmr.msra.gmra.mxu0 %vm472_vm1, %v766_v16  ;;  %v620_v9 = vpop.permute.xlu0 %619  ;;  %v767_v15 = vld [vmem:[#allocation2 + $0x18] sm:$0xff] }
 0x1b4   :  { %629 = vst.msk [vmem:[#allocation3 + $0x98] sm:$0xff] %vm472_vm1, %v620_v9  ;;  %4604 = vmatmul.mubr.msk.f32.vlgmr.msra.gmra.mxu1 %vm472_vm1, %v767_v15  ;;  %4607 = vmatpush3.xpose.msk.msra.mxu0 %vm472_vm1, %v787_v18 }
 0x1b5   :  { %4614 = vmatpush3.xpose.msk.msra.mxu1 %vm472_vm1, %v789_v4  ;;  %4608 = vmatprep.subr.mxu0 %v6347_v7 }
 0x1b6   :  { %v657_v5 = vpop.permute.xlu1 %656  ;;  %4615 = vmatprep.subr.mxu1 %v6347_v7  ;;  %v788_v10 = vld [vmem:[#allocation3 + $0x80] sm:$0xff]  ;;  %4610 = vmatprep.mubr.msk.f32.mxu0 %vm5001_vm0, %v6347_v7 }
 0x1b7   :  { %667 = vst.msk [vmem:[#allocation3 + $0xb0] sm:$0xff] %vm472_vm1, %v657_v5  ;;  %v655_v16 = vpop.permute.xlu0 %654  ;;  %4617 = vmatprep.mubr.msk.f32.mxu1 %vm5001_vm0, %v6347_v7  ;;  %v790_v4 = vld [vmem:[#allocation3 + $0x90] sm:$0xff] }
 0x1b8   :  { %666 = vst.msk [vmem:[#allocation3 + $0xa8] sm:$0xff] %vm472_vm1, %v655_v16  ;;  %4609 = vmatpush3.xpose.msk.msra.mxu0 %vm472_vm1, %v786_v11 }
 0x1b9   :  { %4616 = vmatpush3.xpose.msk.msra.mxu1 %vm472_vm1, %v788_v10  ;;  %4620 = vmatprep.subr.mxu0 %v6347_v7 }
 0x1ba   :  { %v659_v1 = vpop.permute.xlu1 %658  ;;  %v768_v12 = vld [vmem:[#allocation2 + $0x20] sm:$0xff]  ;;  %4627 = vmatprep.subr.mxu1 %v6347_v7 }
 0x1bb   :  { %668 = vst.msk [vmem:[#allocation3 + $0xb8] sm:$0xff] %vm472_vm1, %v659_v1  ;;  %4611 = vmatmul.mubr.msk.f32.vlgmr.msra.gmra.mxu0 %vm472_vm1, %v767_v15  ;;  %v653_v13 = vpop.permute.xlu0 %652  ;;  %v791_v18 = vld [vmem:[#allocation3 + $0x98] sm:$0xff] }
 0x1bc   :  { %665 = vst.msk [vmem:[#allocation3 + $0xa0] sm:$0xff] %vm472_vm1, %v653_v13  ;;  %4618 = vmatmul.mubr.msk.f32.vlgmr.msra.gmra.mxu1 %vm472_vm1, %v768_v12  ;;  %4621 = vmatpush3.xpose.msk.msra.mxu0 %vm472_vm1, %v791_v18 }
 0x1bd   :  { %4622 = vmatprep.subr.mxu0 %v6347_v7  ;;  %4624 = vmatprep.mubr.msk.f32.mxu0 %vm5001_vm0, %v6347_v7 }
 0x1be   :  { %v694_v9 = vpop.permute.xlu1 %693  ;;  %4631 = vmatprep.mubr.msk.f32.mxu1 %vm5001_vm0, %v6347_v7 }
 0x1bf   :  { %705 = vst.msk [vmem:[#allocation3 + $0xc8] sm:$0xff] %vm472_vm1, %v694_v9  ;;  %v648_v15 = vpop.permute.xlu0 %647  ;;  %v793_v5 = vld [vmem:[#allocation3 + $0xa8] sm:$0xff] }
 0x1c0   :  { %651 = vst.msk [vmem:[#allocation2 + $0x28] sm:$0xff] %vm472_vm1, %v648_v15  ;;  %4623 = vmatpush3.xpose.msk.msra.mxu0 %vm472_vm1, %v790_v4  ;;  %4628 = vmatpush3.xpose.msk.msra.mxu1 %vm472_vm1, %v793_v5  ;;  %v794_v15 = vld [vmem:[#allocation3 + $0xb0] sm:$0xff] }
 0x1c1   :  { %4634 = vmatprep.subr.mxu0 %v6347_v7  ;;  %4629 = vmatprep.subr.mxu1 %v6347_v7 }
 0x1c2   :  { %v692_v10 = vpop.permute.xlu1 %691  ;;  %v795_v16 = vld [vmem:[#allocation3 + $0xb8] sm:$0xff] }
 0x1c3   :  { %704 = vst.msk [vmem:[#allocation3 + $0xc0] sm:$0xff] %vm472_vm1, %v692_v10  ;;  %4625 = vmatmul.mubr.msk.f32.vlgmr.msra.gmra.mxu0 %vm472_vm1, %v768_v12  ;;  %v698_v11 = vpop.permute.xlu0 %697  ;;  %v792_v1 = vld [vmem:[#allocation3 + $0xa0] sm:$0xff] }
 0x1c4   :  { %707 = vst.msk [vmem:[#allocation3 + $0xd8] sm:$0xff] %vm472_vm1, %v698_v11  ;;  %4630 = vmatpush3.xpose.msk.msra.mxu1 %vm472_vm1, %v792_v1  ;;  %4635 = vmatpush3.xpose.msk.msra.mxu0 %vm472_vm1, %v795_v16 }
 0x1c5   :  { %4636 = vmatprep.subr.mxu0 %v6347_v7  ;;  %4641 = vmatprep.subr.mxu1 %v6347_v7 }
 0x1c6   :  { %v687_v13 = vpop.permute.xlu1 %686  ;;  %v797_v18 = vld [vmem:[#allocation3 + $0xc8] sm:$0xff]  ;;  %4638 = vmatprep.mubr.msk.f32.mxu0 %vm5001_vm0, %v6347_v7 }
 0x1c7   :  { %690 = vst.msk [vmem:[#allocation2 + $0x30] sm:$0xff] %vm472_vm1, %v687_v13  ;;  %v696_v12 = vpop.permute.xlu0 %695  ;;  %v769_v9 = vld [vmem:[#allocation2 + $0x28] sm:$0xff] }
 0x1c8   :  { %706 = vst.msk [vmem:[#allocation3 + $0xd0] sm:$0xff] %vm472_vm1, %v696_v12  ;;  %4632 = vmatmul.mubr.msk.f32.vlgmr.msra.gmra.mxu1 %vm472_vm1, %v769_v9  ;;  %4637 = vmatpush3.xpose.msk.msra.mxu0 %vm472_vm1, %v794_v15 }
 0x1c9   :  { %4642 = vmatpush3.xpose.msk.msra.mxu1 %vm472_vm1, %v797_v18  ;;  %4648 = vmatprep.subr.mxu0 %v6347_v7 }
 0x1ca   :  { %v737_v4 = vpop.permute.xlu1 %736  ;;  %4643 = vmatprep.subr.mxu1 %v6347_v7  ;;  %v796_v5 = vld [vmem:[#allocation3 + $0xc0] sm:$0xff]  ;;  %4645 = vmatprep.mubr.msk.f32.mxu1 %vm5001_vm0, %v6347_v7 }
 0x1cb   :  { %746 = vst.msk [vmem:[#allocation3 + $0xf8] sm:$0xff] %vm472_vm1, %v737_v4  ;;  %4639 = vmatmul.mubr.msk.f32.vlgmr.msra.gmra.mxu0 %vm472_vm1, %v769_v9  ;;  %v733_v10 = vpop.permute.xlu0 %732  ;;  %v799_v16 = vld [vmem:[#allocation3 + $0xd8] sm:$0xff] }
 0x1cc   :  { %744 = vst.msk [vmem:[#allocation3 + $0xe8] sm:$0xff] %vm472_vm1, %v733_v10  ;;  %4649 = vmatpush3.xpose.msk.msra.mxu0 %vm472_vm1, %v799_v16  ;;  %4652 = vmatprep.mubr.msk.f32.mxu0 %vm5001_vm0, %v6347_v7 }
 0x1cd   :  { %4644 = vmatpush3.xpose.msk.msra.mxu1 %vm472_vm1, %v796_v5  ;;  %4650 = vmatprep.subr.mxu0 %v6347_v7  ;;  %v5009_v5 = vmov 1966171168  }
 0x1ce   :  { %v735_v11 = vpop.permute.xlu1 %734  ;;  %v770_v1 = vld [vmem:[#allocation2 + $0x30] sm:$0xff]  ;;  %4655 = vmatprep.subr.mxu1 %v6347_v7  ;;  %v838_v10 = vunpack.c.l.s4 %v5009_v5  ;;  %v805_v5 = vld [vmem:[#allocation4 + $0x8] sm:$0xff] }
 0x1cf   :  { %745 = vst.msk [vmem:[#allocation3 + $0xf0] sm:$0xff] %vm472_vm1, %v735_v11  ;;  %v731_v13 = vpop.permute.xlu0 %730  ;;  %v798_v18 = vld [vmem:[#allocation3 + $0xd0] sm:$0xff] }
 0x1d0   :  { %743 = vst.msk [vmem:[#allocation3 + $0xe0] sm:$0xff] %vm472_vm1, %v731_v13  ;;  %4646 = vmatmul.mubr.msk.f32.vlgmr.msra.gmra.mxu1 %vm472_vm1, %v770_v1  ;;  %4651 = vmatpush3.xpose.msk.msra.mxu0 %vm472_vm1, %v798_v18  ;;  %v839_v18 = vunpack.c.0.s8 %v838_v10  ;;  %v804_v10 = vld [vmem:[#allocation4] sm:$0xff] }
 0x1d1   :  { %4662 = vmatprep.subr.mxu0 %v6347_v7  ;;  %4659 = vmatprep.mubr.msk.f32.mxu1 %vm5001_vm0, %v6347_v7 }
 0x1d2   :  { %v516_v12 = vpop.permute.xlu1 %515  ;;  %v803_v9 = vld [vmem:[#allocation3 + $0xf8] sm:$0xff] }
 0x1d3   :  { %527 = vst.msk [vmem:[#allocation4 + $0x28] sm:$0xff] %vm472_vm1, %v516_v12  ;;  %4653 = vmatmul.mubr.msk.f32.vlgmr.msra.gmra.mxu0 %vm472_vm1, %v770_v1  ;;  %v726_v15 = vpop.permute.xlu0 %725  ;;  %v801_v4 = vld [vmem:[#allocation3 + $0xe8] sm:$0xff] }
 0x1d4   :  { %729 = vst.msk [vmem:[#allocation2 + $0x38] sm:$0xff] %vm472_vm1, %v726_v15  ;;  %4656 = vmatpush3.xpose.msk.msra.mxu1 %vm472_vm1, %v801_v4  ;;  %4663 = vmatpush3.xpose.msk.msra.mxu0 %vm472_vm1, %v803_v9 }
 0x1d5   :  { %4664 = vmatprep.subr.mxu0 %v6347_v7  ;;  %4657 = vmatprep.subr.mxu1 %v6347_v7 }
 0x1d6   :  { %v514_v16 = vpop.permute.xlu1 %513  ;;  %v802_v11 = vld [vmem:[#allocation3 + $0xf0] sm:$0xff]  ;;  %4666 = vmatprep.mubr.msk.f32.mxu0 %vm5001_vm0, %v6347_v7 }
 0x1d7   :  { %526 = vst.msk [vmem:[#allocation4 + $0x20] sm:$0xff] %vm472_vm1, %v514_v16  ;;  %v555_v1 = vpop.permute.xlu0 %554  ;;  %v800_v13 = vld [vmem:[#allocation3 + $0xe0] sm:$0xff]  ;;  %v842_v16 = vsub.s32 %v839_v18, %v5533_v8 }
 0x1d8   :  { %566 = vst.msk [vmem:[#allocation4 + $0x48] sm:$0xff] %vm472_vm1, %v555_v1  ;;  %4658 = vmatpush3.xpose.msk.msra.mxu1 %vm472_vm1, %v800_v13  ;;  %4665 = vmatpush3.xpose.msk.msra.mxu0 %vm472_vm1, %v802_v11  ;;  %v5841_v13 = vld [vmem:[%s6295_s2 + $0x8] sm:$0xff] }
 0x1d9   :  { %4683 = vmatprep.subr.mxu0 %v6347_v7  ;;  %4669 = vmatprep.subr.mxu1 %v6347_v7  ;;  %6348 = vst [vmem:[#allocation60_spill] sm:$0xff] %v5841_v13  ;;  %v843_v18 = vrot.slane %v5841_v13, %v842_v16 }
 0x1da   :  { %v518_v12 = vpop.permute.xlu1 %517  ;;  %v809_v9 = vld [vmem:[#allocation4 + $0x28] sm:$0xff] }
 0x1db   :  { %528 = vst.msk [vmem:[#allocation4 + $0x30] sm:$0xff] %vm472_vm1, %v518_v12  ;;  %v553_v15 = vpop.permute.xlu0 %552  ;;  %v771_v4 = vld [vmem:[#allocation2 + $0x38] sm:$0xff]  ;;  %v851_v13 = vrot.slane %v843_v18, %v842_v16 }
 0x1dc   :  { %565 = vst.msk [vmem:[#allocation4 + $0x40] sm:$0xff] %vm472_vm1, %v553_v15  ;;  %4660 = vmatmul.mubr.msk.f32.vlgmr.msra.gmra.mxu1 %vm472_vm1, %v771_v4  ;;  %4667 = vmatmul.mubr.msk.f32.vlgmr.msra.gmra.mxu0 %vm472_vm1, %v771_v4  ;;  %v844_v4 = vcombine.high %v843_v18, %v843_v18 }
 0x1dd   :  { %4670 = vmatpush3.msra.mxu1 %v805_v5  ;;  %4684 = vmatpush3.msra.mxu0 %v809_v9 }
 0x1de   :  { %4671 = vmatprep.subr.mxu1 %v6347_v7  ;;  %v557_v11 = vpop.permute.xlu1 %556  ;;  %4685 = vmatprep.subr.mxu0 %v6347_v7  ;;  %v808_v1 = vld [vmem:[#allocation4 + $0x20] sm:$0xff] }
 0x1df   :  { %4672 = vmatpush3.msra.mxu1 %v804_v10  ;;  %567 = vst.msk [vmem:[#allocation4 + $0x50] sm:$0xff] %vm472_vm1, %v557_v11  ;;  %v594_v12 = vpop.permute.xlu0 %593  ;;  %4686 = vmatpush3.msra.mxu0 %v808_v1  ;;  %v858_v11 = vrot.slane %v844_v4, %v842_v16  ;;  %v859_v4 = vcombine.high %v851_v13, %v851_v13 }
 0x1e0   :  { %605 = vst.msk [vmem:[#allocation4 + $0x68] sm:$0xff] %vm472_vm1, %v594_v12  ;;  %4673 = vmatprep.mubr.msk.f32.mxu1 %vm5001_vm0, %v6347_v7  ;;  %4676 = vmatprep.subr.mxu1 %v6347_v7 }
 0x1e1   :  { %4687 = vmatprep.mubr.msk.f32.mxu0 %vm5001_vm0, %v6347_v7  ;;  %4697 = vmatprep.subr.mxu0 %v6347_v7 }
 0x1e2   :  { %v596_v9 = vpop.permute.xlu1 %595 }
 0x1e3   :  { %606 = vst.msk [vmem:[#allocation4 + $0x70] sm:$0xff] %vm472_vm1, %v596_v9  ;;  %v592_v15 = vpop.permute.xlu0 %591  ;;  %v5859_v9 = vrot.slane %v858_v11, %v5536_v0 }
 0x1e4   :  { %604 = vst.msk [vmem:[#allocation4 + $0x60] sm:$0xff] %vm472_vm1, %v592_v15 }
 0x1e6   :  { %v633_v5 = vpop.permute.xlu1 %632 }
 0x1e7   :  { %644 = vst.msk [vmem:[#allocation4 + $0x88] sm:$0xff] %vm472_vm1, %v633_v5  ;;  %v635_v10 = vpop.permute.xlu0 %634 }
 0x1e8   :  { %645 = vst.msk [vmem:[#allocation4 + $0x90] sm:$0xff] %vm472_vm1, %v635_v10 }
 0x1ea   :  { %v631_v1 = vpop.permute.xlu1 %630 }
 0x1eb   :  { %643 = vst.msk [vmem:[#allocation4 + $0x80] sm:$0xff] %vm472_vm1, %v631_v1  ;;  %v674_v12 = vpop.permute.xlu0 %673 }
 0x1ec   :  { %684 = vst.msk [vmem:[#allocation4 + $0xb0] sm:$0xff] %vm472_vm1, %v674_v12 }
 0x1ee   :  { %v672_v19 = vpop.permute.xlu1 %671 }
 0x1ef   :  { %683 = vst.msk [vmem:[#allocation4 + $0xa8] sm:$0xff] %vm472_vm1, %v672_v19  ;;  %v713_v15 = vpop.permute.xlu0 %712  ;;  %v945_v17 = vpop.f32.mrf.mxu1  ;;  %v5871_v19 = vrot.slane %v859_v4, %v5536_v0 }
 0x1f0   :  { %723 = vst.msk [vmem:[#allocation4 + $0xd0] sm:$0xff] %vm472_vm1, %v713_v15  ;;  %v2110_v5 = vmul.f32 0.25, %v945_v17 }
 0x1f1   :  { %v4563_v10 = vpop.f32.mrf.mxu1 }
 0x1f2   :  { %v670_v22 = vpop.permute.xlu1 %669  ;;  %v5864_v1 = vadd.f32 %v2110_v5, %v5859_v9 }
 0x1f3   :  { %682 = vst.msk [vmem:[#allocation4 + $0xa0] sm:$0xff] %vm472_vm1, %v670_v22  ;;  %v520_v16 = vpop.permute.xlu0 %519 }
 0x1f4   :  { %529 = vst.msk [vmem:[#allocation4 + $0x38] sm:$0xff] %vm472_vm1, %v520_v16  ;;  %v2142_v18 = vsel %vm472_vm1, %v5864_v1, -inf }
 0x1f5   :  { %2143 = vmax.xlane.f32.xlu1 %v2142_v18 }
 0x1f6   :  { %v711_v11 = vpop.permute.xlu1 %710 }
 0x1f7   :  { %722 = vst.msk [vmem:[#allocation4 + $0xc8] sm:$0xff] %vm472_vm1, %v711_v11  ;;  %v637_v17 = vpop.permute.xlu0 %636  ;;  %v1021_v13 = vpop.f32.mrf.mxu1 }
 0x1f8   :  { %646 = vst.msk [vmem:[#allocation4 + $0x98] sm:$0xff] %vm472_vm1, %v637_v17  ;;  %v2111_v12 = vmul.f32 0.25, %v1021_v13 }
 0x1f9   :  { %v4570_v15 = vpop.f32.mrf.mxu1 }
 0x1fa   :  { %v709_v22 = vpop.permute.xlu1 %708  ;;  %v5876_v5 = vadd.f32 %v2111_v12, %v5871_v19 }
 0x1fb   :  { %721 = vst.msk [vmem:[#allocation4 + $0xc0] sm:$0xff] %vm472_vm1, %v709_v22  ;;  %v676_v10 = vpop.permute.xlu0 %675 }
 0x1fc   :  { %685 = vst.msk [vmem:[#allocation4 + $0xb8] sm:$0xff] %vm472_vm1, %v676_v10  ;;  %v2145_v4 = vsel %vm472_vm1, %v5876_v5, -inf }
 0x1fd   :  { %2146 = vmax.xlane.f32.xlu0 %v2145_v4 }
 0x1fe   :  { %v559_v16 = vpop.permute.xlu1 %558 }
 0x1ff   :  { %568 = vst.msk [vmem:[#allocation4 + $0x58] sm:$0xff] %vm472_vm1, %v559_v16  ;;  %v715_v18 = vpop.permute.xlu0 %714 }
 0x200   :  { %724 = vst.msk [vmem:[#allocation4 + $0xd8] sm:$0xff] %vm472_vm1, %v715_v18 }
 0x202   :  { %v598_v11 = vpop.permute.xlu1 %597 }
 0x203   :  { %607 = vst.msk [vmem:[#allocation4 + $0x78] sm:$0xff] %vm472_vm1, %v598_v11 }
 0x262   :  { %v1100_v17 = vpop.f32.mrf.mxu1 }
 0x263   :  { %v2112_v13 = vmul.f32 0.25, %v1100_v17 }
 0x264   :  { %v4577_v12 = vpop.f32.mrf.mxu1 }
 0x265   :  { %v5886_v15 = vadd.f32 %v2112_v13, %v5859_v9 }
 0x267   :  { %v2148_v22 = vsel %vm472_vm1, %v5886_v15, -inf }
 0x268   :  { %2149 = vmax.xlane.f32.xlu0 %v2148_v22 }
 0x26a   :  { %v1255_v10 = vpop.f32.mrf.mxu1 }
 0x26b   :  { %v1176_v4 = vpop.f32.mrf.mxu0  ;;  %v2114_v0 = vmul.f32 0.25, %v1255_v10 }
 0x26c   :  { %v2113_v16 = vmul.f32 0.25, %v1176_v4  ;;  %v4591_v20 = vpop.f32.mrf.mxu1 }
 0x26d   :  { %v4584_v23 = vpop.f32.mrf.mxu0  ;;  %v5891_v18 = vadd.f32 %v2114_v0, %v5859_v9 }
 0x26e   :  { %v5894_v11 = vadd.f32 %v2113_v16, %v5871_v19 }
 0x26f   :  { %v2154_v17 = vsel %vm472_vm1, %v5891_v18, -inf }
 0x270   :  { %v2151_v13 = vsel %vm472_vm1, %v5894_v11, -inf  ;;  %2155 = vmax.xlane.f32.xlu0 %v2154_v17 }
 0x271   :  { %2152 = vmax.xlane.f32.xlu1 %v2151_v13 }
 0x273   :  { %v1331_v12 = vpop.f32.mrf.mxu0 }
 0x274   :  { %v2115_v22 = vmul.f32 0.25, %v1331_v12  ;;  %v1410_v10 = vpop.f32.mrf.mxu1 }
 0x275   :  { %v2116_v4 = vmul.f32 0.25, %v1410_v10  ;;  %v4598_v20 = vpop.f32.mrf.mxu0 }
 0x276   :  { %v4605_v23 = vpop.f32.mrf.mxu1  ;;  %v5901_v0 = vadd.f32 %v2115_v22, %v5871_v19 }
 0x277   :  { %v5904_v16 = vadd.f32 %v2116_v4, %v5859_v9 }
 0x278   :  { %v2157_v21 = vsel %vm472_vm1, %v5901_v0, -inf }
 0x279   :  { %2158 = vmax.xlane.f32.xlu1 %v2157_v21  ;;  %v2160_v17 = vsel %vm472_vm1, %v5904_v16, -inf }
 0x27a   :  { %2161 = vmax.xlane.f32.xlu0 %v2160_v17 }
 0x27b   :  { %v1486_v13 = vpop.f32.mrf.mxu0 }
 0x27c   :  { %v2117_v12 = vmul.f32 0.25, %v1486_v13  ;;  %v1565_v26 = vpop.f32.mrf.mxu1 }
 0x27d   :  { %v2118_v10 = vmul.f32 0.25, %v1565_v26  ;;  %v4612_v20 = vpop.f32.mrf.mxu0 }
 0x27e   :  { %v4619_v23 = vpop.f32.mrf.mxu1  ;;  %v2144_v24 = vpop.xlane.xlu1 %2143  ;;  %v5911_v22 = vadd.f32 %v2117_v12, %v5871_v19 }
 0x27f   :  { %v5914_v4 = vadd.f32 %v2118_v10, %v5859_v9  ;;  %v2190_v27 = vsub.f32 %v5864_v1, %v2144_v24 }
 0x280   :  { %v2163_v21 = vsel %vm472_vm1, %v5911_v22, -inf }
 0x281   :  { %2164 = vmax.xlane.f32.xlu1 %v2163_v21  ;;  %v2166_v17 = vsel %vm472_vm1, %v5914_v4, -inf  ;;  %v2206_v20 = vmul.f32 1.442695, %v2190_v27 }
 0x282   :  { %2167 = vmax.xlane.f32.xlu0 %v2166_v17 }
 0x283   :  { %v1641_v26 = vpop.f32.mrf.mxu0  ;;  %4832 = vpow2.f32 %v2206_v20 }
 0x284   :  { %v2119_v13 = vmul.f32 0.25, %v1641_v26 }
 0x285   :  { %v4626_v23 = vpop.f32.mrf.mxu0 }
 0x286   :  { %v2147_v25 = vpop.xlane.xlu0 %2146  ;;  %v5922_v12 = vadd.f32 %v2119_v13, %v5871_v19 }
 0x287   :  { %v2191_v10 = vsub.f32 %v5876_v5, %v2147_v25 }
 0x288   :  { %v1720_v30 = vpop.f32.mrf.mxu1  ;;  %v2169_v28 = vsel %vm472_vm1, %v5922_v12, -inf }
 0x289   :  { %v2208_v24 = vmul.f32 1.442695, %v2191_v10  ;;  %v2120_v1 = vmul.f32 0.25, %v1720_v30  ;;  %2170 = vmax.xlane.f32.xlu1 %v2169_v28 }
 0x28a   :  { %v4633_v21 = vpop.f32.mrf.mxu1 }
 0x28b   :  { %v1796_v17 = vpop.f32.mrf.mxu0  ;;  %v5928_v26 = vadd.f32 %v2120_v1, %v5859_v9  ;;  %4834 = vpow2.f32 %v2208_v24 }
 0x28c   :  { %v2121_v27 = vmul.f32 0.25, %v1796_v17 }
 0x28d   :  { %v4640_v23 = vpop.f32.mrf.mxu0  ;;  %v2172_v13 = vsel %vm472_vm1, %v5928_v26, -inf }
 0x28e   :  { %2173 = vmax.xlane.f32.xlu0 %v2172_v13  ;;  %v5933_v25 = vadd.f32 %v2121_v27, %v5871_v19 }
 0x290   :  { %v1875_v5 = vpop.f32.mrf.mxu1  ;;  %v2175_v30 = vsel %vm472_vm1, %v5933_v25, -inf  ;;  %v5942_v23 = vpop.eup %4832 }
 0x291   :  { %v2122_v28 = vmul.f32 0.25, %v1875_v5  ;;  %2176 = vmax.xlane.f32.xlu1 %v2175_v30  ;;  %v2238_v30 = vsel %vm472_vm1, %v5942_v23, 0.0 }
 0x292   :  { %v4647_v20 = vpop.f32.mrf.mxu1 }
 0x293   :  { %v1951_v10 = vpop.f32.mrf.mxu0  ;;  %v5938_v1 = vadd.f32 %v2122_v28, %v5859_v9 }
 0x294   :  { %v2123_v24 = vmul.f32 0.25, %v1951_v10 }
 0x295   :  { %v4654_v21 = vpop.f32.mrf.mxu0  ;;  %v2178_v17 = vsel %vm472_vm1, %v5938_v1, -inf }
 0x296   :  { %2179 = vmax.xlane.f32.xlu0 %v2178_v17  ;;  %v5945_v27 = vadd.f32 %v2123_v24, %v5871_v19 }
 0x298   :  { %v2181_v13 = vsel %vm472_vm1, %v5945_v27, -inf  ;;  %v5949_v5 = vpop.eup %4834 }
 0x299   :  { %2182 = vmax.xlane.f32.xlu1 %v2181_v13  ;;  %v2241_v10 = vsel %vm472_vm1, %v5949_v5, 0.0 }
 0x29a   :  { %2239 = vadd.xlane.f32.xlu0 %v2238_v30 }
 0x29c   :  { %v2030_v28 = vpop.f32.mrf.mxu1  ;;  %v2106_v20 = vpop.f32.mrf.mxu0 }
 0x29d   :  { %v2124_v21 = vmul.f32 0.25, %v2030_v28  ;;  %v2125_v17 = vmul.f32 0.25, %v2106_v20  ;;  %2242 = vadd.xlane.f32.xlu1 %v2241_v10 }
 0x29e   :  { %v4661_v24 = vpop.f32.mrf.mxu1  ;;  %v4668_v31 = vpop.f32.mrf.mxu0 }
 0x29f   :  { %v5956_v29 = vadd.f32 %v2124_v21, %v5859_v9  ;;  %v5959_v34 = vadd.f32 %v2125_v17, %v5871_v19 }
 0x2a1   :  { %v2184_v13 = vsel %vm472_vm1, %v5956_v29, -inf  ;;  %v2187_v30 = vsel %vm472_vm1, %v5959_v34, -inf }
 0x2a2   :  { %2185 = vmax.xlane.f32.xlu0 %v2184_v13  ;;  %2188 = vmax.xlane.f32.xlu1 %v2187_v30 }
 0x2b3   :  { %749 = vrot.lane.b32.xlu1 %v5573_v2, %s5008_s15 }
 0x2b8   :  { %753 = vrot.lane.b32.xlu0 %v5593_v14, %s5008_s15 }
 0x2f1   :  { %v2150_v31 = vpop.xlane.xlu0 %2149 }
 0x2f2   :  { %v2192_v9 = vsub.f32 %v5886_v15, %v2150_v31 }
 0x2f4   :  { %v2210_v28 = vmul.f32 1.442695, %v2192_v9 }
 0x2f6   :  { %4836 = vpow2.f32 %v2210_v28 }
 0x2f9   :  { %v2156_v19 = vpop.xlane.xlu0 %2155 }
 0x2fa   :  { %v2153_v20 = vpop.xlane.xlu1 %2152  ;;  %v2194_v10 = vsub.f32 %v5891_v18, %v2156_v19 }
 0x2fb   :  { %v2193_v21 = vsub.f32 %v5894_v11, %v2153_v20 }
 0x2fc   :  { %v2214_v17 = vmul.f32 1.442695, %v2194_v10 }
 0x2fd   :  { %v2212_v24 = vmul.f32 1.442695, %v2193_v21 }
 0x2fe   :  { %4838 = vpow2.f32 %v2214_v17 }
 0x2ff   :  { %4840 = vpow2.f32 %v2212_v24 }
 0x302   :  { %v2159_v13 = vpop.xlane.xlu1 %2158 }
 0x303   :  { %v5972_v2 = vpop.eup %4836  ;;  %v2195_v14 = vsub.f32 %v5901_v0, %v2159_v13  ;;  %v2162_v30 = vpop.xlane.xlu0 %2161 }
 0x304   :  { %v2196_v15 = vsub.f32 %v5904_v16, %v2162_v30  ;;  %v2244_v31 = vsel %vm472_vm1, %v5972_v2, 0.0 }
 0x305   :  { %v2216_v9 = vmul.f32 1.442695, %v2195_v14  ;;  %2245 = vadd.xlane.f32.xlu0 %v2244_v31 }
 0x306   :  { %v2218_v18 = vmul.f32 1.442695, %v2196_v15 }
 0x307   :  { %4842 = vpow2.f32 %v2216_v9 }
 0x308   :  { %4844 = vpow2.f32 %v2218_v18 }
 0x30a   :  { %v2165_v11 = vpop.xlane.xlu1 %2164 }
 0x30b   :  { %v5978_v28 = vpop.eup %4838  ;;  %v2197_v19 = vsub.f32 %v5911_v22, %v2165_v11  ;;  %v2168_v20 = vpop.xlane.xlu0 %2167 }
 0x30c   :  { %v5981_v10 = vpop.eup %4840  ;;  %v2198_v0 = vsub.f32 %v5914_v4, %v2168_v20  ;;  %v2250_v16 = vsel %vm472_vm1, %v5978_v28, 0.0 }
 0x30d   :  { %v2220_v21 = vmul.f32 1.442695, %v2197_v19  ;;  %v2247_v17 = vsel %vm472_vm1, %v5981_v10, 0.0  ;;  %2251 = vadd.xlane.f32.xlu0 %v2250_v16 }
 0x30e   :  { %v2222_v24 = vmul.f32 1.442695, %v2198_v0  ;;  %2248 = vadd.xlane.f32.xlu1 %v2247_v17 }
 0x30f   :  { %4846 = vpow2.f32 %v2220_v21 }
 0x310   :  { %4848 = vpow2.f32 %v2222_v24 }
 0x312   :  { %v2171_v13 = vpop.xlane.xlu1 %2170 }
 0x313   :  { %v2199_v22 = vsub.f32 %v5922_v12, %v2171_v13 }
 0x314   :  { %v5989_v14 = vpop.eup %4842 }
 0x315   :  { %v5991_v30 = vpop.eup %4844  ;;  %v2224_v4 = vmul.f32 1.442695, %v2199_v22  ;;  %v2253_v15 = vsel %vm472_vm1, %v5989_v14, 0.0 }
 0x316   :  { %2254 = vadd.xlane.f32.xlu1 %v2253_v15  ;;  %v2256_v31 = vsel %vm472_vm1, %v5991_v30, 0.0 }
 0x317   :  { %4850 = vpow2.f32 %v2224_v4  ;;  %2257 = vadd.xlane.f32.xlu0 %v2256_v31  ;;  %v2174_v9 = vpop.xlane.xlu0 %2173 }
 0x318   :  { %v2200_v18 = vsub.f32 %v5928_v26, %v2174_v9 }
 0x31a   :  { %v2226_v11 = vmul.f32 1.442695, %v2200_v18  ;;  %v2177_v19 = vpop.xlane.xlu1 %2176 }
 0x31b   :  { %v2201_v12 = vsub.f32 %v5933_v25, %v2177_v19 }
 0x31c   :  { %v5999_v20 = vpop.eup %4846  ;;  %4852 = vpow2.f32 %v2226_v11 }
 0x31d   :  { %v6001_v0 = vpop.eup %4848  ;;  %v2228_v16 = vmul.f32 1.442695, %v2201_v12  ;;  %v2259_v21 = vsel %vm472_vm1, %v5999_v20, 0.0 }
 0x31e   :  { %2260 = vadd.xlane.f32.xlu1 %v2259_v21  ;;  %v2262_v17 = vsel %vm472_vm1, %v6001_v0, 0.0 }
 0x31f   :  { %4854 = vpow2.f32 %v2228_v16  ;;  %2263 = vadd.xlane.f32.xlu0 %v2262_v17  ;;  %v2180_v26 = vpop.xlane.xlu0 %2179 }
 0x320   :  { %v2202_v24 = vsub.f32 %v5938_v1, %v2180_v26 }
 0x322   :  { %v2230_v13 = vmul.f32 1.442695, %v2202_v24  ;;  %v2183_v25 = vpop.xlane.xlu1 %2182 }
 0x323   :  { %v2203_v22 = vsub.f32 %v5945_v27, %v2183_v25  ;;  %v2240_v4 = vpop.xlane.xlu0 %2239 }
 0x324   :  { %v6009_v15 = vpop.eup %4850  ;;  %4856 = vpow2.f32 %v2230_v13 }
 0x325   :  { %v2232_v31 = vmul.f32 1.442695, %v2203_v22  ;;  %4858 = vrcp.f32 %v2240_v4  ;;  %v2265_v9 = vsel %vm472_vm1, %v6009_v15, 0.0 }
 0x326   :  { %2266 = vadd.xlane.f32.xlu1 %v2265_v9  ;;  %v2243_v18 = vpop.xlane.xlu1 %2242 }
 0x327   :  { %4860 = vpow2.f32 %v2232_v31 }
 0x328   :  { %4862 = vrcp.f32 %v2243_v18  ;;  %v807_v18 = vld [vmem:[#allocation4 + $0x18] sm:$0xff] }
 0x329   :  { %v6013_v11 = vpop.eup %4852 }
 0x32a   :  { %v2268_v1 = vsel %vm472_vm1, %v6013_v11, 0.0 }
 0x32b   :  { %v2189_v19 = vpop.xlane.xlu1 %2188  ;;  %2269 = vadd.xlane.f32.xlu0 %v2268_v1  ;;  %v2186_v27 = vpop.xlane.xlu0 %2185 }
 0x32c   :  { %v6017_v12 = vpop.eup %4854  ;;  %v2205_v16 = vsub.f32 %v5959_v34, %v2189_v19  ;;  %v2204_v21 = vsub.f32 %v5956_v29, %v2186_v27  ;;  %v806_v27 = vld [vmem:[#allocation4 + $0x10] sm:$0xff] }
 0x32d   :  { %v2271_v17 = vsel %vm472_vm1, %v6017_v12, 0.0 }
 0x32e   :  { %v2236_v26 = vmul.f32 1.442695, %v2205_v16  ;;  %v2234_v24 = vmul.f32 1.442695, %v2204_v21  ;;  %v810_v16 = vld [vmem:[#allocation4 + $0x30] sm:$0xff] }
 0x32f   :  { %v750_v13 = vpop.permute.xlu1 %749  ;;  %2272 = vadd.xlane.f32.xlu0 %v2271_v17  ;;  %v754_v25 = vpop.permute.xlu0 %753 }
 0x330   :  { %4864 = vpow2.f32 %v2236_v26  ;;  %761 = vst.msk [vmem:[#allocation4 + $0xe8] sm:$0xff] %vm472_vm1, %v750_v13  ;;  %763 = vst.msk [vmem:[#allocation4 + $0xf8] sm:$0xff] %vm472_vm1, %v754_v25 }
 0x331   :  { %v6025_v22 = vpop.eup %4856  ;;  %4866 = vpow2.f32 %v2234_v24 }
 0x332   :  { %v4859_v4 = vpop.eup %4858  ;;  %v2274_v29 = vsel %vm472_vm1, %v6025_v22, 0.0 }
 0x333   :  { %2275 = vadd.xlane.f32.xlu1 %v2274_v29  ;;  %v2287_v34 = vmul.f32 %v4859_v4, %v5942_v23  ;;  %v811_v23 = vld [vmem:[#allocation4 + $0x38] sm:$0xff] }
 0x334   :  { %v6030_v31 = vpop.eup %4860 }
 0x335   :  { %v4863_v9 = vpop.eup %4862  ;;  %4674 = vmatmul.mubr.msk.f32.vlgmr.msra.gmra.mxu1 %vm472_vm1, %v2287_v34  ;;  %v2277_v1 = vsel %vm472_vm1, %v6030_v31, 0.0 }
 0x336   :  { %4677 = vmatpush3.msra.mxu1 %v807_v18  ;;  %2278 = vadd.xlane.f32.xlu0 %v2277_v1  ;;  %v2289_v19 = vmul.f32 %v4863_v9, %v5949_v5  ;;  %v813_v9 = vld [vmem:[#allocation4 + $0x48] sm:$0xff] }
 0x337   :  { %4678 = vmatprep.subr.mxu1 %v6347_v7  ;;  %4680 = vmatprep.mubr.msk.f32.mxu1 %vm5001_vm0, %v6347_v7 }
 0x338   :  { %4679 = vmatpush3.msra.mxu1 %v806_v27 }
 0x339   :  { %4690 = vmatprep.subr.mxu1 %v6347_v7  ;;  %4681 = vmatmul.mubr.msk.f32.vlgmr.msra.gmra.mxu1 %vm472_vm1, %v2289_v19 }
 0x33a   :  { %4691 = vmatpush3.msra.mxu1 %v811_v23  ;;  %4694 = vmatprep.mubr.msk.f32.mxu1 %vm5001_vm0, %v6347_v7  ;;  %v817_v23 = vld [vmem:[#allocation4 + $0x68] sm:$0xff] }
 0x33b   :  { %4692 = vmatprep.subr.mxu1 %v6347_v7 }
 0x33c   :  { %4693 = vmatpush3.msra.mxu1 %v810_v16 }
 0x33d   :  { %v6044_v5 = vpop.eup %4864  ;;  %4704 = vmatprep.subr.mxu1 %v6347_v7 }
 0x33e   :  { %v6047_v21 = vpop.eup %4866  ;;  %v2283_v17 = vsel %vm472_vm1, %v6044_v5, 0.0 }
 0x33f   :  { %2284 = vadd.xlane.f32.xlu0 %v2283_v17  ;;  %v2280_v26 = vsel %vm472_vm1, %v6047_v21, 0.0  ;;  %v815_v17 = vld [vmem:[#allocation4 + $0x58] sm:$0xff] }
 0x340   :  { %2281 = vadd.xlane.f32.xlu1 %v2280_v26  ;;  %v816_v26 = vld [vmem:[#allocation4 + $0x60] sm:$0xff] }
 0x351   :  { %747 = vrot.lane.b32.xlu1 %v5561_v3, %s5008_s15  ;;  %v812_v3 = vld [vmem:[#allocation4 + $0x40] sm:$0xff] }
 0x355   :  { %751 = vrot.lane.b32.xlu0 %v5582_v6, %s5008_s15 }
 0x38e   :  { %v2246_v24 = vpop.xlane.xlu0 %2245 }
 0x38f   :  { %4868 = vrcp.f32 %v2246_v24 }
 0x396   :  { %v2252_v13 = vpop.xlane.xlu0 %2251 }
 0x397   :  { %v2249_v25 = vpop.xlane.xlu1 %2248  ;;  %4870 = vrcp.f32 %v2252_v13 }
 0x398   :  { %4872 = vrcp.f32 %v2249_v25 }
 0x39c   :  { %v4869_v4 = vpop.eup %4868 }
 0x39d   :  { %v2291_v29 = vmul.f32 %v4869_v4, %v5972_v2 }
 0x39f   :  { %v2255_v34 = vpop.xlane.xlu1 %2254  ;;  %4688 = vmatmul.mubr.msk.f32.vlgmr.msra.gmra.mxu0 %vm472_vm1, %v2291_v29  ;;  %v819_v29 = vld [vmem:[#allocation4 + $0x78] sm:$0xff] }
 0x3a0   :  { %4874 = vrcp.f32 %v2255_v34  ;;  %4698 = vmatpush3.msra.mxu0 %v813_v9  ;;  %v2258_v18 = vpop.xlane.xlu0 %2257  ;;  %4701 = vmatprep.mubr.msk.f32.mxu0 %vm5001_vm0, %v6347_v7  ;;  %v821_v34 = vld [vmem:[#allocation4 + $0x88] sm:$0xff]  ;;  %v818_v9 = vld [vmem:[#allocation4 + $0x70] sm:$0xff] }
 0x3a1   :  { %4876 = vrcp.f32 %v2258_v18  ;;  %4699 = vmatprep.subr.mxu0 %v6347_v7  ;;  %v820_v18 = vld [vmem:[#allocation4 + $0x80] sm:$0xff] }
 0x3a2   :  { %4700 = vmatpush3.msra.mxu0 %v812_v3 }
 0x3a3   :  { %4711 = vmatprep.subr.mxu0 %v6347_v7 }
 0x3a4   :  { %v4871_v6 = vpop.eup %4870 }
 0x3a5   :  { %v4873_v1 = vpop.eup %4872  ;;  %v2295_v2 = vmul.f32 %v4871_v6, %v5978_v28  ;;  %v814_v28 = vld [vmem:[#allocation4 + $0x50] sm:$0xff] }
 0x3a6   :  { %v2293_v19 = vmul.f32 %v4873_v1, %v5981_v10 }
 0x3a7   :  { %v2261_v27 = vpop.xlane.xlu1 %2260  ;;  %4702 = vmatmul.mubr.msk.f32.vlgmr.msra.gmra.mxu0 %vm472_vm1, %v2295_v2 }
 0x3a8   :  { %4878 = vrcp.f32 %v2261_v27  ;;  %4712 = vmatpush3.msra.mxu0 %v817_v23  ;;  %v2264_v16 = vpop.xlane.xlu0 %2263  ;;  %4695 = vmatmul.mubr.msk.f32.vlgmr.msra.gmra.mxu1 %vm472_vm1, %v2293_v19  ;;  %v823_v19 = vld [vmem:[#allocation4 + $0x98] sm:$0xff]  ;;  %v825_v27 = vld [vmem:[#allocation4 + $0xa8] sm:$0xff]  ;;  %v822_v23 = vld [vmem:[#allocation4 + $0x90] sm:$0xff] }
 0x3a9   :  { %4880 = vrcp.f32 %v2264_v16  ;;  %4705 = vmatpush3.msra.mxu1 %v815_v17  ;;  %4713 = vmatprep.subr.mxu0 %v6347_v7  ;;  %v824_v16 = vld [vmem:[#allocation4 + $0xa0] sm:$0xff] }
 0x3aa   :  { %4706 = vmatprep.subr.mxu1 %v6347_v7  ;;  %4714 = vmatpush3.msra.mxu0 %v816_v26 }
 0x3ab   :  { %4707 = vmatpush3.msra.mxu1 %v814_v28  ;;  %4708 = vmatprep.mubr.msk.f32.mxu1 %vm5001_vm0, %v6347_v7  ;;  %v827_v28 = vld [vmem:[#allocation4 + $0xb8] sm:$0xff] }
 0x3ac   :  { %4718 = vmatprep.subr.mxu1 %v6347_v7  ;;  %4715 = vmatprep.mubr.msk.f32.mxu0 %vm5001_vm0, %v6347_v7 }
 0x3ad   :  { %v4875_v10 = vpop.eup %4874  ;;  %4725 = vmatprep.subr.mxu0 %v6347_v7 }
 0x3ae   :  { %v4877_v24 = vpop.eup %4876  ;;  %v2297_v13 = vmul.f32 %v4875_v10, %v5989_v14 }
 0x3af   :  { %v2267_v25 = vpop.xlane.xlu1 %2266  ;;  %v2299_v4 = vmul.f32 %v4877_v24, %v5991_v30  ;;  %v826_v24 = vld [vmem:[#allocation4 + $0xb0] sm:$0xff] }
 0x3b0   :  { %4882 = vrcp.f32 %v2267_v25  ;;  %4709 = vmatmul.mubr.msk.f32.vlgmr.msra.gmra.mxu1 %vm472_vm1, %v2297_v13 }
 0x3b1   :  { %4719 = vmatpush3.msra.mxu1 %v819_v29  ;;  %4716 = vmatmul.mubr.msk.f32.vlgmr.msra.gmra.mxu0 %vm472_vm1, %v2299_v4  ;;  %v828_v4 = vld [vmem:[#allocation4 + $0xc0] sm:$0xff] }
 0x3b2   :  { %4720 = vmatprep.subr.mxu1 %v6347_v7  ;;  %4726 = vmatpush3.msra.mxu0 %v821_v34 }
 0x3b3   :  { %4721 = vmatpush3.msra.mxu1 %v818_v9  ;;  %4727 = vmatprep.subr.mxu0 %v6347_v7 }
 0x3b4   :  { %4728 = vmatpush3.msra.mxu0 %v820_v18  ;;  %v2270_v14 = vpop.xlane.xlu0 %2269  ;;  %4722 = vmatprep.mubr.msk.f32.mxu1 %vm5001_vm0, %v6347_v7 }
 0x3b5   :  { %v4879_v30 = vpop.eup %4878  ;;  %4884 = vrcp.f32 %v2270_v14  ;;  %4732 = vmatprep.subr.mxu1 %v6347_v7  ;;  %4729 = vmatprep.mubr.msk.f32.mxu0 %vm5001_vm0, %v6347_v7  ;;  %v830_v14 = vld [vmem:[#allocation4 + $0xd0] sm:$0xff] }
 0x3b6   :  { %v4881_v3 = vpop.eup %4880  ;;  %4739 = vmatprep.subr.mxu0 %v6347_v7  ;;  %v2301_v6 = vmul.f32 %v4879_v30, %v5999_v20 }
 0x3b7   :  { %v2303_v1 = vmul.f32 %v4881_v3, %v6001_v0 }
 0x3b8   :  { %v2273_v2 = vpop.xlane.xlu0 %2272  ;;  %4723 = vmatmul.mubr.msk.f32.vlgmr.msra.gmra.mxu1 %vm472_vm1, %v2301_v6 }
 0x3b9   :  { %4886 = vrcp.f32 %v2273_v2  ;;  %4733 = vmatpush3.msra.mxu1 %v823_v19  ;;  %4730 = vmatmul.mubr.msk.f32.vlgmr.msra.gmra.mxu0 %vm472_vm1, %v2303_v1  ;;  %v833_v1 = vld [vmem:[#allocation4 + $0xe8] sm:$0xff] }
 0x3ba   :  { %4734 = vmatprep.subr.mxu1 %v6347_v7  ;;  %4740 = vmatpush3.msra.mxu0 %v825_v27 }
 0x3bb   :  { %4735 = vmatpush3.msra.mxu1 %v822_v23  ;;  %4741 = vmatprep.subr.mxu0 %v6347_v7 }
 0x3bc   :  { %4742 = vmatpush3.msra.mxu0 %v824_v16  ;;  %v2276_v20 = vpop.xlane.xlu1 %2275  ;;  %4736 = vmatprep.mubr.msk.f32.mxu1 %vm5001_vm0, %v6347_v7 }
 0x3bd   :  { %v4883_v0 = vpop.eup %4882  ;;  %4888 = vrcp.f32 %v2276_v20  ;;  %4746 = vmatprep.subr.mxu1 %v6347_v7  ;;  %4743 = vmatprep.mubr.msk.f32.mxu0 %vm5001_vm0, %v6347_v7 }
 0x3be   :  { %v2305_v17 = vmul.f32 %v4883_v0, %v6009_v15  ;;  %4753 = vmatprep.subr.mxu0 %v6347_v7  ;;  %v829_v15 = vld [vmem:[#allocation4 + $0xc8] sm:$0xff] }
 0x3bf   :  { %v2279_v26 = vpop.xlane.xlu0 %2278 }
 0x3c0   :  { %4890 = vrcp.f32 %v2279_v26  ;;  %4737 = vmatmul.mubr.msk.f32.vlgmr.msra.gmra.mxu1 %vm472_vm1, %v2305_v17 }
 0x3c1   :  { %4747 = vmatpush3.msra.mxu1 %v827_v28  ;;  %4750 = vmatprep.mubr.msk.f32.mxu1 %vm5001_vm0, %v6347_v7 }
 0x3c2   :  { %v4885_v10 = vpop.eup %4884  ;;  %4748 = vmatprep.subr.mxu1 %v6347_v7 }
 0x3c3   :  { %4749 = vmatpush3.msra.mxu1 %v826_v24  ;;  %v2307_v13 = vmul.f32 %v4885_v10, %v6013_v11  ;;  %v831_v11 = vld [vmem:[#allocation4 + $0xd8] sm:$0xff] }
 0x3c4   :  { %4760 = vmatprep.subr.mxu1 %v6347_v7 }
 0x3c5   :  { %4744 = vmatmul.mubr.msk.f32.vlgmr.msra.gmra.mxu0 %vm472_vm1, %v2307_v13 }
 0x3c6   :  { %v4887_v25 = vpop.eup %4886  ;;  %4754 = vmatpush3.msra.mxu0 %v829_v15  ;;  %4757 = vmatprep.mubr.msk.f32.mxu0 %vm5001_vm0, %v6347_v7 }
 0x3c7   :  { %4755 = vmatprep.subr.mxu0 %v6347_v7  ;;  %v2309_v29 = vmul.f32 %v4887_v25, %v6017_v12 }
 0x3c8   :  { %4756 = vmatpush3.msra.mxu0 %v828_v4  ;;  %v2285_v34 = vpop.xlane.xlu0 %2284 }
 0x3c9   :  { %v2282_v9 = vpop.xlane.xlu1 %2281  ;;  %4892 = vrcp.f32 %v2285_v34  ;;  %4751 = vmatmul.mubr.msk.f32.vlgmr.msra.gmra.mxu1 %vm472_vm1, %v2309_v29  ;;  %4767 = vmatprep.subr.mxu0 %v6347_v7 }
 0x3ca   :  { %v4889_v18 = vpop.eup %4888  ;;  %4894 = vrcp.f32 %v2282_v9  ;;  %4761 = vmatpush3.msra.mxu1 %v831_v11  ;;  %4764 = vmatprep.mubr.msk.f32.mxu1 %vm5001_vm0, %v6347_v7  ;;  %v3582_v9 = vld [vmem:[#allocation12 + $0x78] sm:$0xff]  ;;  %v3581_v11 = vld [vmem:[#allocation12 + $0x70] sm:$0xff] }
 0x3cb   :  { %4762 = vmatprep.subr.mxu1 %v6347_v7  ;;  %v2311_v12 = vmul.f32 %v4889_v18, %v6025_v22  ;;  %v835_v22 = vld [vmem:[#allocation4 + $0xf8] sm:$0xff] }
 0x3cc   :  { %4763 = vmatpush3.msra.mxu1 %v830_v14  ;;  %v752_v30 = vpop.permute.xlu0 %751 }
 0x3cd   :  { %v4891_v3 = vpop.eup %4890  ;;  %v748_v6 = vpop.permute.xlu1 %747  ;;  %762 = vst.msk [vmem:[#allocation4 + $0xf0] sm:$0xff] %vm472_vm1, %v752_v30  ;;  %4758 = vmatmul.mubr.msk.f32.vlgmr.msra.gmra.mxu0 %vm472_vm1, %v2311_v12  ;;  %4774 = vmatprep.subr.mxu1 %v6347_v7  ;;  %v3580_v12 = vld [vmem:[#allocation12 + $0x68] sm:$0xff]  ;;  %v3579_v30 = vld [vmem:[#allocation12 + $0x60] sm:$0xff] }
 0x3ce   :  { %760 = vst.msk [vmem:[#allocation4 + $0xe0] sm:$0xff] %vm472_vm1, %v748_v6  ;;  %4768 = vmatpush3.msra.mxu0 %v833_v1  ;;  %v2313_v2 = vmul.f32 %v4891_v3, %v6030_v31  ;;  %4771 = vmatprep.mubr.msk.f32.mxu0 %vm5001_vm0, %v6347_v7  ;;  %v3578_v1 = vld [vmem:[#allocation12 + $0x58] sm:$0xff] }
 0x3cf   :  { %4769 = vmatprep.subr.mxu0 %v6347_v7 }
 0x3d0   :  { %4765 = vmatmul.mubr.msk.f32.vlgmr.msra.gmra.mxu1 %vm472_vm1, %v2313_v2  ;;  %v3577_v2 = vld [vmem:[#allocation12 + $0x50] sm:$0xff] }
 0x3d1   :  { %4775 = vmatpush3.msra.mxu1 %v835_v22  ;;  %4778 = vmatprep.mubr.msk.f32.mxu1 %vm5001_vm0, %v6347_v7 }
 0x3d2   :  { %4776 = vmatprep.subr.mxu1 %v6347_v7 }
 0x3d4   :  { %v834_v19 = vld [vmem:[#allocation4 + $0xf0] sm:$0xff] }
 0x3d5   :  { %v832_v27 = vld [vmem:[#allocation4 + $0xe0] sm:$0xff]  ;;  %4777 = vmatpush3.msra.mxu1 %v834_v19  ;;  %v3576_v19 = vld [vmem:[#allocation12 + $0x48] sm:$0xff] }
 0x3d6   :  { %v4893_v23 = vpop.eup %4892  ;;  %4770 = vmatpush3.msra.mxu0 %v832_v27 }
 0x3d7   :  { %v4895_v31 = vpop.eup %4894  ;;  %v2317_v16 = vmul.f32 %v4893_v23, %v6044_v5  ;;  %4781 = vmatprep.subr.mxu0 %v3582_v9  ;;  %v3575_v23 = vld [vmem:[#allocation12 + $0x40] sm:$0xff] }
 0x3d8   :  { %v2315_v20 = vmul.f32 %v4895_v31, %v6047_v21  ;;  %v3574_v31 = vld [vmem:[#allocation12 + $0x38] sm:$0xff] }
 0x3d9   :  { %4779 = vmatmul.mubr.msk.f32.vlgmr.msra.gmra.mxu1 %vm472_vm1, %v2317_v16 }
 0x3da   :  { %4772 = vmatmul.mubr.msk.f32.vlgmr.msra.gmra.mxu0 %vm472_vm1, %v2315_v20  ;;  %v3573_v20 = vld [vmem:[#allocation12 + $0x30] sm:$0xff] }
 0x3db   :  { %4782 = vmatpush3.msra.mxu0 %v3582_v9 }
 0x3dc   :  { %4783 = vmatprep.subr.mxu0 %v3581_v11 }
 0x3dd   :  { %4784 = vmatpush3.msra.mxu0 %v3581_v11 }
 0x3de   :  { %4785 = vmatprep.subr.mxu0 %v3580_v12 }
 0x3df   :  { %4786 = vmatpush3.msra.mxu0 %v3580_v12 }
 0x3e0   :  { %4787 = vmatprep.subr.mxu0 %v3579_v30 }
 0x3e1   :  { %4788 = vmatpush3.msra.mxu0 %v3579_v30 }
 0x3e2   :  { %4789 = vmatprep.subr.mxu0 %v3578_v1 }
 0x3e3   :  { %4790 = vmatpush3.msra.mxu0 %v3578_v1 }
 0x3e4   :  { %4791 = vmatprep.subr.mxu0 %v3577_v2 }
 0x3e5   :  { %4792 = vmatpush3.msra.mxu0 %v3577_v2 }
 0x3e6   :  { %4793 = vmatprep.subr.mxu0 %v3576_v19 }
 0x3e7   :  { %4794 = vmatpush3.msra.mxu0 %v3576_v19 }
 0x3e8   :  { %4795 = vmatprep.subr.mxu0 %v3575_v23 }
 0x3e9   :  { %4796 = vmatpush3.msra.mxu0 %v3575_v23 }
 0x3ea   :  { %4797 = vmatprep.subr.mxu0 %v3574_v31 }
 0x3eb   :  { %4798 = vmatpush3.msra.mxu0 %v3574_v31 }
 0x3ec   :  { %4799 = vmatprep.subr.mxu0 %v3573_v20 }
 0x3ed   :  { %4800 = vmatpush3.msra.mxu0 %v3573_v20 }
 0x3f5   :  { %v2387_v0 = vpop.f32.mrf.mxu1 }
 0x3f6   :  { %3486 = vst.msk [vmem:[#allocation5] sm:$0xff] %vm472_vm1, %v2387_v0 }
 0x3f7   :  { %v4675_v17 = vpop.f32.mrf.mxu1 }
 0x3f8   :  { %v3572_v17 = vld [vmem:[#allocation12 + $0x28] sm:$0xff] }
 0x3f9   :  { %v2460_v26 = vpop.f32.mrf.mxu1  ;;  %4801 = vmatprep.subr.mxu0 %v3572_v17 }
 0x3fa   :  { %3487 = vst.msk [vmem:[#allocation5 + $0x8] sm:$0xff] %vm472_vm1, %v2460_v26  ;;  %4802 = vmatpush3.msra.mxu0 %v3572_v17 }
 0x3fb   :  { %v4682_v28 = vpop.f32.mrf.mxu1 }
 0x3fc   :  { %v3571_v28 = vld [vmem:[#allocation12 + $0x20] sm:$0xff] }
 0x3fd   :  { %4803 = vmatprep.subr.mxu0 %v3571_v28 }
 0x3fe   :  { %4804 = vmatpush3.msra.mxu0 %v3571_v28  ;;  %v4900_v28 = vld [vmem:[%s6295_s2] sm:$0xff]  ;;  %s5010_s2 = smov [#allocation7]  }
 0x3ff   :  { %s234_s21 = sshll.u32 %s5010_s2, 4  ;;  %s235_s21 = int_to_ptr.vmem [resolvable:$true] %s234_s21 }
 0x400   :  { %s4954_s22 = scalar_lea.vmem %s235_s21, 8192  ;;  %p4959_p11 = scmp.lt.s32.totalorder %s235_s21, %s235_s21 }
 0x401   :  { %p4955_p10 = scmp.ne.s32.totalorder %s235_s21, %s4954_s22  ;;  %p4960_p12 = scmp.lt.s32.totalorder %s4954_s22, %s4954_s22 }
 0x403   :  { %p4961_p13 = por %p4960_p12, %p4959_p11 }
 0x405   :  { %p4962_p0 = pnand %p4961_p13, %p4955_p10 }
 0x45f   :  { %v2533_v10 = vpop.f32.mrf.mxu0 }
 0x460   :  { %3490 = vrot.lane.b32.xlu1 %v2533_v10, %s5008_s15 }
 0x461   :  { %v4689_v24 = vpop.f32.mrf.mxu0 }
 0x467   :  { %v2679_v13 = vpop.f32.mrf.mxu0 }
 0x468   :  { %v2606_v5 = vpop.f32.mrf.mxu1  ;;  %3501 = vrot.lane.b32.xlu1 %v2679_v13, %s5007_s14  ;;  %v3570_v13 = vld [vmem:[#allocation12 + $0x18] sm:$0xff] }
 0x469   :  { %3492 = vrot.lane.b32.xlu0 %v2606_v5, %s5008_s15  ;;  %v4703_v21 = vpop.f32.mrf.mxu0  ;;  %v3569_v5 = vld [vmem:[#allocation12 + $0x10] sm:$0xff]  ;;  %4805 = vmatprep.subr.mxu0 %v3570_v13 }
 0x46a   :  { %v4696_v15 = vpop.f32.mrf.mxu1  ;;  %4806 = vmatpush3.msra.mxu0 %v3570_v13 }
 0x46b   :  { %4807 = vmatprep.subr.mxu0 %v3569_v5 }
 0x46c   :  { %4808 = vmatpush3.msra.mxu0 %v3569_v5 }
 0x470   :  { %v2752_v25 = vpop.f32.mrf.mxu1 }
 0x471   :  { %v2825_v4 = vpop.f32.mrf.mxu0  ;;  %3503 = vrot.lane.b32.xlu0 %v2752_v25, %s5007_s14  ;;  %v3568_v25 = vld [vmem:[#allocation12 + $0x8] sm:$0xff] }
 0x472   :  { %3512 = vrot.lane.b32.xlu1 %v2825_v4, %s5006_s11  ;;  %v4710_v29 = vpop.f32.mrf.mxu1  ;;  %4809 = vmatprep.subr.mxu0 %v3568_v25 }
 0x473   :  { %v4717_v34 = vpop.f32.mrf.mxu0  ;;  %v3567_v29 = vld [vmem:[#allocation12] sm:$0xff]  ;;  %4810 = vmatpush3.msra.mxu0 %v3568_v25 }
 0x474   :  { %4811 = vmatprep.subr.mxu0 %v3567_v29 }
 0x475   :  { %4812 = vmatpush3.msra.mxu0 %v3567_v29 }
 0x478   :  { %v2898_v18 = vpop.f32.mrf.mxu1 }
 0x479   :  { %v2971_v14 = vpop.f32.mrf.mxu0  ;;  %3514 = vrot.lane.b32.xlu0 %v2898_v18, %s5006_s11 }
 0x47a   :  { %3523 = vrot.lane.b32.xlu1 %v2971_v14, %s5005_s10  ;;  %v4724_v3 = vpop.f32.mrf.mxu1 }
 0x47b   :  { %v4731_v6 = vpop.f32.mrf.mxu0 }
 0x480   :  { %v3044_v22 = vpop.f32.mrf.mxu1 }
 0x481   :  { %3525 = vrot.lane.b32.xlu0 %v3044_v22, %s5005_s10 }
 0x482   :  { %v4738_v27 = vpop.f32.mrf.mxu1 }
 0x485   :  { %v3117_v16 = vpop.f32.mrf.mxu0 }
 0x486   :  { %3534 = vrot.lane.b32.xlu1 %v3117_v16, %s5004_s30 }
 0x487   :  { %v4745_v0 = vpop.f32.mrf.mxu0 }
 0x489   :  { %v3190_v26 = vpop.f32.mrf.mxu1 }
 0x48a   :  { %3536 = vrot.lane.b32.xlu0 %v3190_v26, %s5004_s30  ;;  %v3585_v26 = vsub.s32 3, %v5533_v8 }
 0x48b   :  { %v4752_v10 = vpop.f32.mrf.mxu1 }
 0x48c   :  { %v3586_v10 = vrot.slane %v4900_v28, %v3585_v26 }
 0x48d   :  { %v3263_v24 = vpop.f32.mrf.mxu0 }
 0x48e   :  { %3545 = vrot.lane.b32.xlu1 %v3263_v24, %s5003_s29 }
 0x48f   :  { %v4759_v21 = vpop.f32.mrf.mxu0 }
 0x490   :  { %v3336_v15 = vpop.f32.mrf.mxu1  ;;  %v4901_v21 = vld [vmem:[%s6294_s1] sm:$0xff] }
 0x491   :  { %3547 = vrot.lane.b32.xlu0 %v3336_v15, %s5003_s29 }
 0x492   :  { %v4766_v4 = vpop.f32.mrf.mxu1 }
 0x499   :  { %v3482_v34 = vpop.f32.mrf.mxu1 }
 0x49a   :  { %v3409_v9 = vpop.f32.mrf.mxu0  ;;  %3558 = vrot.lane.b32.xlu0 %v3482_v34, %s5002_s0 }
 0x49b   :  { %3556 = vrot.lane.b32.xlu1 %v3409_v9, %s5002_s0  ;;  %v4780_v11 = vpop.f32.mrf.mxu1 }
 0x49c   :  { %v4773_v18 = vpop.f32.mrf.mxu0 }
 0x4d2   :  { %v3491_v14 = vpop.permute.xlu1 %3490 }
 0x4d3   :  { %3497 = vst.msk [vmem:[#allocation5] sm:$0xff] %vm3496_vm2, %v3491_v14 }
 0x4da   :  { %v3502_v12 = vpop.permute.xlu1 %3501 }
 0x4db   :  { %3508 = vst.msk [vmem:[#allocation5] sm:$0xff] %vm3507_vm3, %v3502_v12  ;;  %v3493_v30 = vpop.permute.xlu0 %3492 }
 0x4dc   :  { %3498 = vst.msk [vmem:[#allocation5 + $0x8] sm:$0xff] %vm3496_vm2, %v3493_v30 }
 0x4e3   :  { %v3504_v3 = vpop.permute.xlu0 %3503 }
 0x4e4   :  { %3509 = vst.msk [vmem:[#allocation5 + $0x8] sm:$0xff] %vm3507_vm3, %v3504_v3  ;;  %v3513_v6 = vpop.permute.xlu1 %3512 }
 0x4e5   :  { %3519 = vst.msk [vmem:[#allocation5] sm:$0xff] %vm3518_vm4, %v3513_v6 }
 0x4eb   :  { %v3515_v1 = vpop.permute.xlu0 %3514 }
 0x4ec   :  { %3520 = vst.msk [vmem:[#allocation5 + $0x8] sm:$0xff] %vm3518_vm4, %v3515_v1  ;;  %v3524_v2 = vpop.permute.xlu1 %3523 }
 0x4ed   :  { %3530 = vst.msk [vmem:[#allocation5] sm:$0xff] %vm3529_vm5, %v3524_v2 }
 0x4f3   :  { %v3526_v22 = vpop.permute.xlu0 %3525 }
 0x4f4   :  { %3531 = vst.msk [vmem:[#allocation5 + $0x8] sm:$0xff] %vm3529_vm5, %v3526_v22 }
 0x4f8   :  { %v3535_v19 = vpop.permute.xlu1 %3534 }
 0x4f9   :  { %3541 = vst.msk [vmem:[#allocation5] sm:$0xff] %vm3540_vm6, %v3535_v19 }
 0x4fc   :  { %v3537_v27 = vpop.permute.xlu0 %3536 }
 0x4fd   :  { %3542 = vst.msk [vmem:[#allocation5 + $0x8] sm:$0xff] %vm3540_vm6, %v3537_v27 }
 0x500   :  { %v3546_v23 = vpop.permute.xlu1 %3545 }
 0x501   :  { %3552 = vst.msk [vmem:[#allocation5] sm:$0xff] %vm3551_vm7, %v3546_v23 }
 0x503   :  { %v3548_v31 = vpop.permute.xlu0 %3547 }
 0x504   :  { %3553 = vst.msk [vmem:[#allocation5 + $0x8] sm:$0xff] %vm3551_vm7, %v3548_v31 }
 0x50c   :  { %v3559_v16 = vpop.permute.xlu0 %3558 }
 0x50d   :  { %v3557_v20 = vpop.permute.xlu1 %3556  ;;  %3564 = vst.msk [vmem:[#allocation5 + $0x8] sm:$0xff] %vm3562_vm8, %v3559_v16 }
 0x50e   :  { %3563 = vst.msk [vmem:[#allocation5] sm:$0xff] %vm3562_vm8, %v3557_v20 }
 0x514   :  { %v3566_v0 = vld [vmem:[#allocation5 + $0x8] sm:$0xff] }
 0x515   :  { %v3565_v17 = vld [vmem:[#allocation5] sm:$0xff] }
 0x516   :  { %4813 = vmatprep.mubr.f32.mxu0 %v3565_v17 }
 0x517   :  { %4814 = vmatmul.mubr.f32.vlgmr.msra.gmra.mxu0 %v3566_v0 }
 0x5d7   :  { %v4815_v24 = vpop.f32.mrf.mxu0 }
 0x5d8   :  { %v3659_v13 = vadd.f32 %v4815_v24, %v3586_v10 }
 0x5d9   :  { %v3653_v5 = vpop.f32.mrf.mxu0 }
 0x5da   :  { %v3663_v15 = vadd.f32 %v4901_v21, %v3659_v13  ;;  %v3654_v25 = vadd.f32 %v3653_v5, %v3586_v10 }
 0x5dc   :  { %v3662_v4 = vadd.f32 %v4901_v21, %v3654_v25  ;;  %3666 = vadd.xlane.f32.xlu0 %v3663_v15 }
 0x5de   :  { %3664 = vadd.xlane.f32.xlu1 %v3662_v4 }
 0x665   :  { %v3667_v29 = vpop.xlane.xlu0 %3666 }
 0x666   :  { %v3670_v34 = vmul.f32 0.0078125, %v3667_v29 }
 0x667   :  { %v3665_v9 = vpop.xlane.xlu1 %3664 }
 0x668   :  { %v3672_v11 = vsub.f32 %v3663_v15, %v3670_v34  ;;  %v3669_v18 = vmul.f32 0.0078125, %v3665_v9 }
 0x66a   :  { %v3671_v14 = vsub.f32 %v3662_v4, %v3669_v18  ;;  %v3674_v12 = vmul.f32 %v3672_v11, %v3672_v11 }
 0x66c   :  { %3677 = vadd.xlane.f32.xlu1 %v3674_v12  ;;  %v3673_v30 = vmul.f32 %v3671_v14, %v3671_v14 }
 0x66e   :  { %3675 = vadd.xlane.f32.xlu0 %v3673_v30 }
 0x66f   :  { %4965 = shalt.err (!%p4962_p0)  }
 0x670   :  { %237 = dma.hbm_to_vmem [thread:$0]  %s6301_s8, 8192, %s235_s21, [#allocation8 + $0x1]  ;;  %v3689_v27 = vsub.s32 4, %v5533_v8  ;;  %v3695_v23 = vsub.s32 5, %v5533_v8  ;;  %3789 = vmatprep.subr.mxu1 %v5382_v61  ;;  %3866 = vmatprep.subr.mxu0 %v5392_v63 }
 0x672   :  { %v3690_v31 = vrot.slane %v4900_v28, %v3689_v27  ;;  %v3696_v20 = vrot.slane %v4900_v28, %v3695_v23 }
 0x6f5   :  { %v3678_v3 = vpop.xlane.xlu1 %3677 }
 0x6f6   :  { %v3680_v6 = vmul.f32 0.0078125, %v3678_v3 }
 0x6f7   :  { %v3676_v1 = vpop.xlane.xlu0 %3675 }
 0x6f8   :  { %v3682_v2 = vadd.f32 1e-05, %v3680_v6  ;;  %v3679_v22 = vmul.f32 0.0078125, %v3676_v1 }
 0x6fa   :  { %4896 = vrsqrt.f32 %v3682_v2  ;;  %v3681_v19 = vadd.f32 1e-05, %v3679_v22 }
 0x6fc   :  { %4898 = vrsqrt.f32 %v3681_v19 }
 0x707   :  { %v4897_v16 = vpop.eup %4896 }
 0x708   :  { %v3686_v0 = vmul.f32 %v4897_v16, %v3672_v11 }
 0x709   :  { %v4899_v17 = vpop.eup %4898 }
 0x70a   :  { %v3692_v10 = vmul.f32 %v3690_v31, %v3686_v0  ;;  %v3685_v24 = vmul.f32 %v4899_v17, %v3671_v14 }
 0x70c   :  { %v6163_v13 = vadd.f32 %v3696_v20, %v3692_v10  ;;  %v3691_v5 = vmul.f32 %v3690_v31, %v3685_v24 }
 0x70e   :  { %v6165_v21 = vadd.f32 %v3696_v20, %v3691_v5 }
 0x70f   :  { %4990 = dma.done.wait [#allocation8], 8192 }
 0x710   :  { %4991 = vsyncadd [#allocation8], 4294959104  ;;  %3790 = vmatpush1.msra.mxu1 %v5377_v60  ;;  %3867 = vmatpush1.msra.mxu0 %v5387_v62  ;;  %v6376_v60 = vld [vmem:[#allocation29_spill] sm:$0xff]  ;;  %v6377_v61 = vld [vmem:[#allocation31_spill] sm:$0xff]  ;;  %v6383_v34 = vsub.s32 2, %v5533_v8  ;;  %v6384_v11 = vsub.s32 1, %v5533_v8 }
 0x711   :  { %3791 = vmatprep.subr.mxu1 %v5362_v57  ;;  %3868 = vmatprep.subr.mxu0 %v5372_v59  ;;  %v6373_v57 = vld [vmem:[#allocation35_spill] sm:$0xff]  ;;  %v6375_v59 = vld [vmem:[#allocation32_spill] sm:$0xff]  ;;  %v6378_v62 = vld [vmem:[#allocation26_spill] sm:$0xff] }
 0x712   :  { %3792 = vmatpush1.msra.mxu1 %v5357_v56  ;;  %3869 = vmatpush1.msra.mxu0 %v5367_v58  ;;  %v6372_v56 = vld [vmem:[#allocation33_spill] sm:$0xff]  ;;  %v6374_v58 = vld [vmem:[#allocation30_spill] sm:$0xff]  ;;  %v6379_v63 = vld [vmem:[#allocation28_spill] sm:$0xff] }
 0x713   :  { %3793 = vmatprep.subr.mxu1 %v5342_v53  ;;  %3870 = vmatprep.subr.mxu0 %v5352_v55  ;;  %v6369_v53 = vld [vmem:[#allocation39_spill] sm:$0xff]  ;;  %v6371_v55 = vld [vmem:[#allocation36_spill] sm:$0xff]  ;;  %v6380_v28 = vld [vmem:[#allocation25_spill] sm:$0xff] }
 0x714   :  { %3794 = vmatpush1.msra.mxu1 %v5337_v52  ;;  %3871 = vmatpush1.msra.mxu0 %v5347_v54  ;;  %v6368_v52 = vld [vmem:[#allocation37_spill] sm:$0xff]  ;;  %v6370_v54 = vld [vmem:[#allocation34_spill] sm:$0xff]  ;;  %v6381_v15 = vld [vmem:[#allocation27_spill] sm:$0xff] }
 0x715   :  { %3795 = vmatprep.subr.mxu1 %v5322_v49  ;;  %3872 = vmatprep.subr.mxu0 %v5332_v51  ;;  %v6365_v49 = vld [vmem:[#allocation43_spill] sm:$0xff]  ;;  %v6367_v51 = vld [vmem:[#allocation40_spill] sm:$0xff]  ;;  %v3767_v25 = vld [vmem:[%s6296_s3] sm:$0xf] }
 0x716   :  { %3796 = vmatpush1.msra.mxu1 %v5317_v48  ;;  %3873 = vmatpush1.msra.mxu0 %v5327_v50  ;;  %v6364_v48 = vld [vmem:[#allocation41_spill] sm:$0xff]  ;;  %v6366_v50 = vld [vmem:[#allocation38_spill] sm:$0xff]  ;;  %v3780_v9 = vrot.slane %v3767_v25, %v6383_v34  ;;  %v3776_v18 = vrot.slane %v3767_v25, %v6384_v11  ;;  %v3784_v14 = vrot.slane %v3767_v25, %v3585_v26 }
 0x717   :  { %3797 = vmatprep.subr.mxu1 %v5302_v45  ;;  %3874 = vmatprep.subr.mxu0 %v5312_v47  ;;  %v6361_v45 = vld [vmem:[#allocation47_spill] sm:$0xff]  ;;  %v6363_v47 = vld [vmem:[#allocation44_spill] sm:$0xff]  ;;  %v6382_v4 = vld [vmem:[#allocation58_spill] sm:$0xff] }
 0x718   :  { %3798 = vmatpush1.msra.mxu1 %v5297_v44  ;;  %3875 = vmatpush1.msra.mxu0 %v5307_v46  ;;  %v6360_v44 = vld [vmem:[#allocation45_spill] sm:$0xff]  ;;  %v6362_v46 = vld [vmem:[#allocation42_spill] sm:$0xff]  ;;  %v3772_v29 = vrot.slane %v3767_v25, %v6382_v4 }
 0x719   :  { %3799 = vmatprep.subr.mxu1 %v5282_v41  ;;  %3876 = vmatprep.subr.mxu0 %v5292_v43  ;;  %v6349_v41 = vld [vmem:[#allocation57_spill] sm:$0xff]  ;;  %v6350_v43 = vld [vmem:[#allocation54_spill] sm:$0xff] }
 0x71a   :  { %3800 = vmatpush1.msra.mxu1 %v5277_v40  ;;  %3877 = vmatpush1.msra.mxu0 %v5287_v42  ;;  %v6351_v40 = vld [vmem:[#allocation56_spill] sm:$0xff]  ;;  %v6352_v42 = vld [vmem:[#allocation53_spill] sm:$0xff] }
 0x71b   :  { %3801 = vmatprep.subr.mxu1 %v5262_v37  ;;  %3878 = vmatprep.subr.mxu0 %v5272_v39  ;;  %v6353_v37 = vld [vmem:[#allocation55_spill] sm:$0xff]  ;;  %v6354_v39 = vld [vmem:[#allocation50_spill] sm:$0xff] }
 0x71c   :  { %3802 = vmatpush1.msra.mxu1 %v5257_v36  ;;  %3879 = vmatpush1.msra.mxu0 %v5267_v38  ;;  %v6355_v36 = vld [vmem:[#allocation52_spill] sm:$0xff]  ;;  %v6356_v38 = vld [vmem:[#allocation49_spill] sm:$0xff] }
 0x71d   :  { %3803 = vmatprep.subr.mxu1 %v5242_v33  ;;  %3880 = vmatprep.subr.mxu0 %v5252_v35  ;;  %v6357_v33 = vld [vmem:[#allocation51_spill] sm:$0xff]  ;;  %v6358_v35 = vld [vmem:[#allocation46_spill] sm:$0xff] }
 0x71e   :  { %3804 = vmatpush1.msra.mxu1 %v5237_v32  ;;  %3881 = vmatpush1.msra.mxu0 %v6349_v41  ;;  %v6359_v32 = vld [vmem:[#allocation48_spill] sm:$0xff] }
 0x71f   :  { %3805 = vmatprep.subr.mxu1 %v6350_v43  ;;  %3882 = vmatprep.subr.mxu0 %v6351_v40 }
 0x720   :  { %3806 = vmatpush1.msra.mxu1 %v6352_v42  ;;  %3883 = vmatpush1.msra.mxu0 %v6353_v37 }
 0x721   :  { %3807 = vmatprep.subr.mxu1 %v6354_v39  ;;  %3884 = vmatprep.subr.mxu0 %v6355_v36 }
 0x722   :  { %3808 = vmatpush1.msra.mxu1 %v6356_v38  ;;  %3885 = vmatpush1.msra.mxu0 %v6357_v33 }
 0x723   :  { %3809 = vmatprep.subr.mxu1 %v6358_v35  ;;  %3886 = vmatprep.subr.mxu0 %v6359_v32 }
 0x724   :  { %3810 = vmatpush1.msra.mxu1 %v6360_v44  ;;  %3887 = vmatpush1.msra.mxu0 %v6361_v45 }
 0x725   :  { %3811 = vmatprep.subr.mxu1 %v6362_v46  ;;  %3888 = vmatprep.subr.mxu0 %v6363_v47 }
 0x726   :  { %3812 = vmatpush1.msra.mxu1 %v6364_v48  ;;  %3889 = vmatpush1.msra.mxu0 %v6365_v49 }
 0x727   :  { %3813 = vmatprep.subr.mxu1 %v6366_v50  ;;  %3890 = vmatprep.subr.mxu0 %v6367_v51 }
 0x728   :  { %3814 = vmatpush1.msra.mxu1 %v6368_v52  ;;  %3891 = vmatpush1.msra.mxu0 %v6369_v53 }
 0x729   :  { %3815 = vmatprep.subr.mxu1 %v6370_v54  ;;  %3892 = vmatprep.subr.mxu0 %v6371_v55 }
 0x72a   :  { %3816 = vmatpush1.msra.mxu1 %v6372_v56  ;;  %3893 = vmatpush1.msra.mxu0 %v6373_v57 }
 0x72b   :  { %3817 = vmatprep.subr.mxu1 %v6374_v58  ;;  %3894 = vmatprep.subr.mxu0 %v6375_v59 }
 0x72c   :  { %3818 = vmatpush1.msra.mxu1 %v6376_v60  ;;  %3895 = vmatpush1.msra.mxu0 %v6377_v61 }
 0x72d   :  { %3819 = vmatprep.subr.mxu1 %v6378_v62  ;;  %3896 = vmatprep.subr.mxu0 %v6379_v63 }
 0x72e   :  { %3820 = vmatpush1.msra.mxu1 %v6380_v28  ;;  %3853 = vmatprep.mubr.f32.mxu1 %v6347_v7 }
 0x72f   :  { %3897 = vmatpush1.msra.mxu0 %v6381_v15  ;;  %3930 = vmatprep.mubr.f32.mxu0 %v6347_v7 }
 0x730   :  { %3854 = vmatmul.mubr.f32.vlgmr.msra.gmra.mxu1 %v6165_v21  ;;  %3931 = vmatmul.mubr.f32.vlgmr.msra.gmra.mxu0 %v6165_v21 }
 0x731   :  { %3859 = vmatprep.mubr.f32.mxu1 %v6347_v7  ;;  %3936 = vmatprep.mubr.f32.mxu0 %v6347_v7 }
 0x734   :  { %3860 = vmatmul.mubr.f32.gmra.mxu1 %v6163_v13  ;;  %3937 = vmatmul.mubr.f32.gmra.mxu0 %v6163_v13 }
 0x7f0   :  { %v3855_v7 = vpop.f32.mrf.mxu1  ;;  %v3932_v12 = vpop.f32.mrf.mxu0 }
 0x7f1   :  { %v6249_v30 = vadd.f32 %v3855_v7, %v3772_v29  ;;  %v6251_v3 = vadd.f32 %v3932_v12, %v3780_v9 }
 0x7f2   :  { %v3857_v6 = vpop.f32.mrf.mxu1  ;;  %v3934_v1 = vpop.f32.mrf.mxu0 }
 0x7f3   :  { %v3943_v2 = vmax.f32 %v6249_v30, 0.0  ;;  %v3945_v22 = vmax.f32 %v6251_v3, 0.0  ;;  %v3858_v19 = vadd.f32 %v3857_v6, %v3776_v18  ;;  %v3935_v27 = vadd.f32 %v3934_v1, %v3784_v14 }
 0x7f4   :  { %v3861_v23 = vpop.f32.mrf.mxu1  ;;  %v3938_v31 = vpop.f32.mrf.mxu0 }
 0x7f5   :  { %v3944_v16 = vmax.f32 %v3858_v19, 0.0  ;;  %v3946_v20 = vmax.f32 %v3935_v27, 0.0  ;;  %v6255_v0 = vadd.f32 %v3861_v23, %v3772_v29  ;;  %v6257_v26 = vadd.f32 %v3938_v31, %v3780_v9 }
 0x7f6   :  { %v3863_v17 = vpop.f32.mrf.mxu1  ;;  %v3940_v10 = vpop.f32.mrf.mxu0 }
 0x7f7   :  { %v3947_v24 = vmax.f32 %v6255_v0, 0.0  ;;  %v3949_v5 = vmax.f32 %v6257_v26, 0.0  ;;  %v6261_v41 = vadd.f32 %v3863_v17, %v3776_v18  ;;  %v6263_v43 = vadd.f32 %v3940_v10, %v3784_v14 }
 0x7f9   :  { %v3948_v40 = vmax.f32 %v6261_v41, 0.0  ;;  %v3950_v42 = vmax.f32 %v6263_v43, 0.0 }
 0x7fa   :  { %4992 = dma.done.wait [#allocation8 + $0x1], 8192 }
 0x7fb   :  { %4993 = vsyncadd [#allocation8 + $0x1], 4294959104  ;;  %4086 = vmatprep.mubr.f32.mxu1 %v3944_v16  ;;  %4161 = vmatprep.mubr.f32.mxu0 %v3946_v20  ;;  %v3985_v37 = vld [vmem:[#allocation7 + $0xf8] sm:$0xff]  ;;  %v3984_v33 = vld [vmem:[#allocation7 + $0xf0] sm:$0xff]  ;;  %s5011_s3 = smov [#allocation14]  }
 0x7fc   :  { %v4017_v39 = vld [vmem:[#allocation7 + $0x1f8] sm:$0xff]  ;;  %4446 = vmatprep.subr.mxu1 %v3985_v37  ;;  %v4016_v35 = vld [vmem:[#allocation7 + $0x1f0] sm:$0xff]  ;;  %v3983_v45 = vld [vmem:[#allocation7 + $0xe8] sm:$0xff]  ;;  %s4215_s24 = sshll.u32 %s5011_s3, 4  ;;  %s4216_s24 = int_to_ptr.vmem [resolvable:$true] %s4215_s24 }
 0x7fd   :  { %v3969_v36 = vld [vmem:[#allocation7 + $0x78] sm:$0xff]  ;;  %4484 = vmatprep.subr.mxu0 %v4017_v39  ;;  %v3968_v32 = vld [vmem:[#allocation7 + $0x70] sm:$0xff]  ;;  %v4015_v46 = vld [vmem:[#allocation7 + $0x1e8] sm:$0xff]  ;;  %s4966_s25 = scalar_lea.vmem %s4216_s24, 256  ;;  %p4971_p2 = scmp.lt.s32.totalorder %s4216_s24, %s4216_s24 }
 0x7fe   :  { %v4001_v38 = vld [vmem:[#allocation7 + $0x178] sm:$0xff]  ;;  %4447 = vmatpush3.msra.mxu1 %v3969_v36  ;;  %v4000_v44 = vld [vmem:[#allocation7 + $0x170] sm:$0xff]  ;;  %v3967_v47 = vld [vmem:[#allocation7 + $0x68] sm:$0xff]  ;;  %p4967_p1 = scmp.ne.s32.totalorder %s4216_s24, %s4966_s25  ;;  %p4972_p3 = scmp.lt.s32.totalorder %s4966_s25, %s4966_s25 }
 0x7ff   :  { %4485 = vmatpush3.msra.mxu0 %v4001_v38  ;;  %4448 = vmatprep.subr.mxu1 %v3984_v33  ;;  %v3999_v48 = vld [vmem:[#allocation7 + $0x168] sm:$0xff]  ;;  %v3982_v49 = vld [vmem:[#allocation7 + $0xe0] sm:$0xff]  ;;  %v3981_v53 = vld [vmem:[#allocation7 + $0xd8] sm:$0xff] }
 0x800   :  { %4486 = vmatprep.subr.mxu0 %v4016_v35  ;;  %4449 = vmatpush3.msra.mxu1 %v3968_v32  ;;  %v4014_v50 = vld [vmem:[#allocation7 + $0x1e0] sm:$0xff]  ;;  %v4013_v54 = vld [vmem:[#allocation7 + $0x1d8] sm:$0xff]  ;;  %v3980_v57 = vld [vmem:[#allocation7 + $0xd0] sm:$0xff]  ;;  %p4973_p4 = por %p4972_p3, %p4971_p2 }
 0x801   :  { %4487 = vmatpush3.msra.mxu0 %v4000_v44  ;;  %4450 = vmatprep.subr.mxu1 %v3983_v45  ;;  %v3966_v51 = vld [vmem:[#allocation7 + $0x60] sm:$0xff]  ;;  %v3965_v55 = vld [vmem:[#allocation7 + $0x58] sm:$0xff]  ;;  %v4012_v58 = vld [vmem:[#allocation7 + $0x1d0] sm:$0xff] }
 0x802   :  { %4488 = vmatprep.subr.mxu0 %v4015_v46  ;;  %v3998_v52 = vld [vmem:[#allocation7 + $0x160] sm:$0xff]  ;;  %4451 = vmatpush3.msra.mxu1 %v3967_v47  ;;  %v3997_v56 = vld [vmem:[#allocation7 + $0x158] sm:$0xff]  ;;  %v3964_v59 = vld [vmem:[#allocation7 + $0x50] sm:$0xff]  ;;  %p4974_p5 = pnand %p4973_p4, %p4967_p1 }
 0x803   :  { %4489 = vmatpush3.msra.mxu0 %v3999_v48  ;;  %4452 = vmatprep.subr.mxu1 %v3982_v49  ;;  %v3996_v60 = vld [vmem:[#allocation7 + $0x150] sm:$0xff]  ;;  %v3979_v61 = vld [vmem:[#allocation7 + $0xc8] sm:$0xff]  ;;  %v3978_v15 = vld [vmem:[#allocation7 + $0xc0] sm:$0xff] }
 0x804   :  { %4490 = vmatprep.subr.mxu0 %v4014_v50  ;;  %4453 = vmatpush3.msra.mxu1 %v3966_v51  ;;  %v4011_v62 = vld [vmem:[#allocation7 + $0x1c8] sm:$0xff]  ;;  %v4010_v25 = vld [vmem:[#allocation7 + $0x1c0] sm:$0xff]  ;;  %v3977_v9 = vld [vmem:[#allocation7 + $0xb8] sm:$0xff] }
 0x805   :  { %4491 = vmatpush3.msra.mxu0 %v3998_v52  ;;  %4454 = vmatprep.subr.mxu1 %v3981_v53  ;;  %v3963_v63 = vld [vmem:[#allocation7 + $0x48] sm:$0xff]  ;;  %v3962_v29 = vld [vmem:[#allocation7 + $0x40] sm:$0xff]  ;;  %v4009_v11 = vld [vmem:[#allocation7 + $0x1b8] sm:$0xff] }
 0x806   :  { %4492 = vmatprep.subr.mxu0 %v4013_v54  ;;  %4455 = vmatpush3.msra.mxu1 %v3965_v55  ;;  %v3995_v28 = vld [vmem:[#allocation7 + $0x148] sm:$0xff]  ;;  %v3994_v34 = vld [vmem:[#allocation7 + $0x140] sm:$0xff]  ;;  %v3961_v18 = vld [vmem:[#allocation7 + $0x38] sm:$0xff] }
 0x807   :  { %4493 = vmatpush3.msra.mxu0 %v3997_v56  ;;  %4456 = vmatprep.subr.mxu1 %v3980_v57  ;;  %v3993_v14 = vld [vmem:[#allocation7 + $0x138] sm:$0xff]  ;;  %v3976_v7 = vld [vmem:[#allocation7 + $0xb0] sm:$0xff]  ;;  %v3975_v19 = vld [vmem:[#allocation7 + $0xa8] sm:$0xff] }
 0x808   :  { %4494 = vmatprep.subr.mxu0 %v4012_v58  ;;  %4457 = vmatpush3.msra.mxu1 %v3964_v59  ;;  %v4008_v12 = vld [vmem:[#allocation7 + $0x1b0] sm:$0xff]  ;;  %v4007_v27 = vld [vmem:[#allocation7 + $0x1a8] sm:$0xff]  ;;  %v3974_v16 = vld [vmem:[#allocation7 + $0xa0] sm:$0xff] }
 0x809   :  { %4495 = vmatpush3.msra.mxu0 %v3996_v60  ;;  %4458 = vmatprep.subr.mxu1 %v3979_v61  ;;  %v3960_v6 = vld [vmem:[#allocation7 + $0x30] sm:$0xff]  ;;  %v3959_v23 = vld [vmem:[#allocation7 + $0x28] sm:$0xff]  ;;  %v4006_v20 = vld [vmem:[#allocation7 + $0x1a0] sm:$0xff] }
 0x80a   :  { %4496 = vmatprep.subr.mxu0 %v4011_v62  ;;  %4459 = vmatpush3.msra.mxu1 %v3963_v63  ;;  %v3992_v1 = vld [vmem:[#allocation7 + $0x130] sm:$0xff]  ;;  %v3991_v31 = vld [vmem:[#allocation7 + $0x128] sm:$0xff]  ;;  %v3958_v17 = vld [vmem:[#allocation7 + $0x20] sm:$0xff] }
 0x80b   :  { %4497 = vmatpush3.msra.mxu0 %v3995_v28  ;;  %4460 = vmatprep.subr.mxu1 %v3978_v15  ;;  %v3990_v10 = vld [vmem:[#allocation7 + $0x120] sm:$0xff]  ;;  %v3973_v37 = vld [vmem:[#allocation7 + $0x98] sm:$0xff]  ;;  %v3972_v33 = vld [vmem:[#allocation7 + $0x90] sm:$0xff] }
 0x80c   :  { %4498 = vmatprep.subr.mxu0 %v4010_v25  ;;  %4461 = vmatpush3.msra.mxu1 %v3962_v29  ;;  %v4005_v39 = vld [vmem:[#allocation7 + $0x198] sm:$0xff]  ;;  %v4004_v35 = vld [vmem:[#allocation7 + $0x190] sm:$0xff]  ;;  %v3971_v45 = vld [vmem:[#allocation7 + $0x88] sm:$0xff] }
 0x80d   :  { %4499 = vmatpush3.msra.mxu0 %v3994_v34  ;;  %4462 = vmatprep.subr.mxu1 %v3977_v9  ;;  %v3957_v36 = vld [vmem:[#allocation7 + $0x18] sm:$0xff]  ;;  %v3956_v32 = vld [vmem:[#allocation7 + $0x10] sm:$0xff]  ;;  %v4003_v46 = vld [vmem:[#allocation7 + $0x188] sm:$0xff] }
 0x80e   :  { %4500 = vmatprep.subr.mxu0 %v4009_v11  ;;  %4463 = vmatpush3.msra.mxu1 %v3961_v18  ;;  %v3989_v38 = vld [vmem:[#allocation7 + $0x118] sm:$0xff]  ;;  %v3988_v44 = vld [vmem:[#allocation7 + $0x110] sm:$0xff]  ;;  %v3955_v47 = vld [vmem:[#allocation7 + $0x8] sm:$0xff] }
 0x80f   :  { %4501 = vmatpush3.msra.mxu0 %v3993_v14  ;;  %4464 = vmatprep.subr.mxu1 %v3976_v7  ;;  %v3987_v48 = vld [vmem:[#allocation7 + $0x108] sm:$0xff]  ;;  %v3970_v49 = vld [vmem:[#allocation7 + $0x80] sm:$0xff]  ;;  %v4204_v7 = vsub.s32 7, %v5533_v8 }
 0x810   :  { %4502 = vmatprep.subr.mxu0 %v4008_v12  ;;  %4465 = vmatpush3.msra.mxu1 %v3960_v6  ;;  %v4002_v50 = vld [vmem:[#allocation7 + $0x180] sm:$0xff]  ;;  %v6385_v30 = vld [vmem:[#allocation60_spill] sm:$0xff] }
 0x811   :  { %4503 = vmatpush3.msra.mxu0 %v3992_v1  ;;  %4466 = vmatprep.subr.mxu1 %v3975_v19  ;;  %v3954_v51 = vld [vmem:[#allocation7] sm:$0xff] }
 0x812   :  { %4504 = vmatprep.subr.mxu0 %v4007_v27  ;;  %4467 = vmatpush3.msra.mxu1 %v3959_v23  ;;  %v3986_v52 = vld [vmem:[#allocation7 + $0x100] sm:$0xff] }
 0x813   :  { %4505 = vmatpush3.msra.mxu0 %v3991_v31  ;;  %4468 = vmatprep.subr.mxu1 %v3974_v16  ;;  %v6386_v12 = vld [vmem:[#allocation59_spill] sm:$0xff] }
 0x814   :  { %4506 = vmatprep.subr.mxu0 %v4006_v20  ;;  %4469 = vmatpush3.msra.mxu1 %v3958_v17  ;;  %v4205_v27 = vrot.slane %v6386_v12, %v4204_v7 }
 0x815   :  { %4507 = vmatpush3.msra.mxu0 %v3990_v10  ;;  %4470 = vmatprep.subr.mxu1 %v3973_v37 }
 0x816   :  { %4508 = vmatprep.subr.mxu0 %v4005_v39  ;;  %4471 = vmatpush3.msra.mxu1 %v3957_v36 }
 0x817   :  { %4509 = vmatpush3.msra.mxu0 %v3989_v38  ;;  %4472 = vmatprep.subr.mxu1 %v3972_v33 }
 0x818   :  { %4510 = vmatprep.subr.mxu0 %v4004_v35  ;;  %4473 = vmatpush3.msra.mxu1 %v3956_v32 }
 0x819   :  { %4511 = vmatpush3.msra.mxu0 %v3988_v44  ;;  %4474 = vmatprep.subr.mxu1 %v3971_v45 }
 0x81a   :  { %4512 = vmatprep.subr.mxu0 %v4003_v46  ;;  %4475 = vmatpush3.msra.mxu1 %v3955_v47 }
 0x81b   :  { %4513 = vmatpush3.msra.mxu0 %v3987_v48  ;;  %4476 = vmatprep.subr.mxu1 %v3970_v49 }
 0x81c   :  { %4514 = vmatprep.subr.mxu0 %v4002_v50  ;;  %4477 = vmatpush3.msra.mxu1 %v3954_v51 }
 0x81d   :  { %4515 = vmatpush3.msra.mxu0 %v3986_v52  ;;  %4087 = vmatmul.mubr.f32.vlgmr.msra.gmra.mxu1 %v3943_v2  ;;  %v4021_v2 = vrot.slane %v6385_v30, %v6382_v4 }
 0x81e   :  { %4162 = vmatmul.mubr.f32.vlgmr.msra.gmra.mxu0 %v3945_v22  ;;  %4091 = vmatprep.mubr.f32.mxu1 %v3948_v40 }
 0x81f   :  { %4166 = vmatprep.mubr.f32.mxu0 %v3950_v42 }
 0x821   :  { %4092 = vmatmul.mubr.f32.gmra.mxu1 %v3947_v24 }
 0x822   :  { %4167 = vmatmul.mubr.f32.gmra.mxu0 %v3949_v5 }
 0x8dd   :  { %v4478_v53 = vpop.f32.mrf.mxu1 }
 0x8de   :  { %v4516_v54 = vpop.f32.mrf.mxu0 }
 0x8df   :  { %v4479_v55 = vpop.f32.mrf.mxu1 }
 0x8e0   :  { %v4517_v3 = vpop.f32.mrf.mxu0  ;;  %v4480_v22 = vadd.f32 %v4479_v55, %v4478_v53 }
 0x8e1   :  { %v4481_v56 = vpop.f32.mrf.mxu1  ;;  %v4518_v57 = vadd.f32 %v4517_v3, %v4516_v54 }
 0x8e2   :  { %v4519_v41 = vpop.f32.mrf.mxu0  ;;  %v4089_v40 = vadd.f32 %v4480_v22, %v4021_v2 }
 0x8e3   :  { %v4482_v43 = vpop.f32.mrf.mxu1 }
 0x8e4   :  { %v4520_v42 = vpop.f32.mrf.mxu0  ;;  %v4483_v58 = vadd.f32 %v4482_v43, %v4481_v56  ;;  %v4164_v0 = vadd.f32 %v4518_v57, %v4089_v40 }
 0x8e5   :  { %v4521_v59 = vadd.f32 %v4520_v42, %v4519_v41 }
 0x8e6   :  { %v4094_v24 = vadd.f32 %v4483_v58, %v4021_v2  ;;  %v4172_v26 = vadd.f32 %v4164_v0, %v6165_v21 }
 0x8e8   :  { %4174 = vadd.xlane.f32.xlu0 %v4172_v26  ;;  %v4169_v5 = vadd.f32 %v4521_v59, %v4094_v24 }
 0x8ea   :  { %v4173_v60 = vadd.f32 %v4169_v5, %v6163_v13  ;;  %v4198_v13 = vsub.s32 6, %v5533_v8 }
 0x8ec   :  { %4176 = vadd.xlane.f32.xlu0 %v4173_v60  ;;  %v4199_v6 = vrot.slane %v6386_v12, %v4198_v13 }
 0x971   :  { %v4175_v4 = vpop.xlane.xlu0 %4174 }
 0x972   :  { %v4178_v61 = vmul.f32 0.0078125, %v4175_v4 }
 0x974   :  { %v4180_v62 = vsub.f32 %v4172_v26, %v4178_v61 }
 0x975   :  { %v4177_v63 = vpop.xlane.xlu0 %4176 }
 0x976   :  { %v4179_v28 = vmul.f32 0.0078125, %v4177_v63  ;;  %v4182_v15 = vmul.f32 %v4180_v62, %v4180_v62 }
 0x978   :  { %v4181_v25 = vsub.f32 %v4173_v60, %v4179_v28  ;;  %4184 = vadd.xlane.f32.xlu1 %v4182_v15 }
 0x97a   :  { %v4183_v29 = vmul.f32 %v4181_v25, %v4181_v25 }
 0x97c   :  { %4186 = vadd.xlane.f32.xlu1 %v4183_v29 }
 0xa01   :  { %v4185_v34 = vpop.xlane.xlu1 %4184 }
 0xa02   :  { %v4188_v9 = vmul.f32 0.0078125, %v4185_v34 }
 0xa04   :  { %v4190_v11 = vadd.f32 1e-05, %v4188_v9 }
 0xa05   :  { %v4187_v18 = vpop.xlane.xlu1 %4186 }
 0xa06   :  { %4902 = vrsqrt.f32 %v4190_v11  ;;  %v4189_v21 = vmul.f32 0.0078125, %v4187_v18 }
 0xa08   :  { %v4191_v14 = vadd.f32 1e-05, %v4189_v21 }
 0xa0a   :  { %4904 = vrsqrt.f32 %v4191_v14 }
 0xa13   :  { %v4903_v1 = vpop.eup %4902 }
 0xa14   :  { %v4194_v19 = vmul.f32 %v4903_v1, %v4180_v62 }
 0xa16   :  { %v4200_v23 = vmul.f32 %v4199_v6, %v4194_v19 }
 0xa17   :  { %v4905_v31 = vpop.eup %4904 }
 0xa18   :  { %v4195_v16 = vmul.f32 %v4905_v31, %v4181_v25  ;;  %v4206_v20 = vadd.f32 %v4205_v27, %v4200_v23 }
 0xa1a   :  { %v4201_v17 = vmul.f32 %v4199_v6, %v4195_v16  ;;  %4208 = vst [vmem:[#allocation14] sm:$0xff] %v4206_v20 }
 0xa1c   :  { %v4207_v10 = vadd.f32 %v4205_v27, %v4201_v17 }
 0xa1e   :  { %4209 = vst [vmem:[#allocation14 + $0x8] sm:$0xff] %v4207_v10 }
 0xa1f   :  { %4977 = shalt.err (!%p4974_p5)
}
 0xa20   :  { %4221 = dma.vmem_to_hbm [thread:$0]  %s4216_s24, 256, %s6302_s9, [#allocation11], %s4997_s12, %s4997_s12, %s4998_s13  }
 0xa21   :  { %4994 = dma.done.wait [#allocation11], 256  }
 0xa22   :  { %4995 = vsyncadd [#allocation11], 4294967040 }
 0xa23   :  { %4225 = vsyncpa [#allocation10], 1 }
 0xa24   :  { %4226 = vsyncpa [#allocation13], 1 }
 0xa25   :  { %4227 = vsyncpa [#allocation11], 1 }
 0xa26   :  { %4228 = vsyncmov [#allocation8] }
 0xa29   :  { %s4229_s7 = vpop.sfrf %4228 }
 0xa2a   :  { %p4313_p6 = scmp.ne.s32.totalorder %s4229_s7, 0 }
 0xa2c   :  { %4233 = shalt.err (%p4313_p6)  }
 0xa2d   :  { %4235 = vsyncmov [#allocation8 + $0x1] }
 0xa30   :  { %s4236_s27 = vpop.sfrf %4235 }
 0xa31   :  { %p4314_p7 = scmp.ne.s32.totalorder %s4236_s27, 0 }
 0xa33   :  { %4240 = shalt.err (%p4314_p7)  }

</bundles_post_ra>
